<compile_context>
chip_gen: v6e
topology: v6e:2x2x1
jax: 0.10.0
libtpu: 0.0.40
codegen_flags: <defaults>
</compile_context>

<pallas_src>
import functools

import jax
import jax.numpy as jnp
from jax.experimental import pallas as pl
from jax.experimental.pallas import tpu as pltpu

_EPS = 1e-5
_INV_SQRT2 = 0.7071067811865476


def _round_up(v, m):
    return ((v + m - 1) // m) * m


def _vmem_capacity_bytes():
    """Best-effort physical VMEM query; conservative fallback (v7x per-core)."""
    try:
        info = pltpu.get_tpu_info()
        for attr in ("vmem_capacity_bytes", "vmem_bytes", "vmem_capacity"):
            v = getattr(info, attr, None)
            if isinstance(v, int) and v > 0:
                return v
    except Exception:
        pass
    return 64 * 1024 * 1024


def _pick_row_tile(H, W, Cp, budget_bytes):
    """Largest row tile TH dividing H whose double-buffered Pass-A blocks fit."""
    best = 1
    for th in range(1, H + 1):
        if H % th:
            continue
        step_bytes = (2 * ((th + 2) * (W + 2) * Cp * 4 + th * W * Cp * 2)
                      + 2 * 9 * Cp * 4)
        # also cap per-tile size so large images still get several grid steps
        if step_bytes <= budget_bytes and th * W * Cp * 4 <= (8 << 20):
            best = th
    return best


def _pick_tm(Cp, C4p, OUTp, M, budget_bytes):
    """Largest Pass-B row tile whose double-buffered working set fits VMEM."""
    fixed = 2 * 2 * (Cp * C4p + C4p * OUTp)            # bf16 weights, double-buffered
    per_row = (2 * 2 * Cp + 2 * 2 * OUTp               # bf16 in/out blocks, double-buffered
               + 4 * Cp + 6 * C4p + 4 * OUTp)          # f32/bf16 in-kernel intermediates
    tm = 128
    for cand in (1024, 512, 256, 128):
        if fixed + cand * per_row <= budget_bytes:
            tm = cand
            break
    return max(128, min(tm, _round_up(M, 128)))


def _gelu_exact(x):
    # PyTorch nn.GELU() default (approximate='none'): x * 0.5 * (1 + erf(x/sqrt(2)))
    return x * 0.5 * (1.0 + jax.lax.erf(x * _INV_SQRT2))


# ---------------------------------------------------------------------------
# Pass A: depthwise 3x3 conv + GELU + residual over one (TH+2)-row halo tile,
#         streaming per-tile per-channel sum / sum-of-squares (BN1 stats).
#         Activation is stored in bf16; stats come from the f32 value.
# ---------------------------------------------------------------------------
def _dwconv_kernel(xt_ref, wdw_ref, t_ref, st_ref):
    _, THp2, Wp2, Cp = xt_ref.shape
    TH, W = THp2 - 2, Wp2 - 2
    wdw = wdw_ref[...]                                   # (3, 3, Cp)

    xc = xt_ref[0, 1:1 + TH, 1:1 + W, :]                 # center window == residual
    acc = xc * wdw[1, 1, :]
    for dy in range(3):                                  # 9-tap depthwise conv via
        for dx in range(3):                              # ref-window loads (vld slot)
            if dy == 1 and dx == 1:
                continue
            acc = acc + xt_ref[0, dy:dy + TH, dx:dx + W, :] * wdw[dy, dx, :]

    t = _gelu_exact(acc) + xc                            # GELU + residual (f32)

    # single-pass BN1 statistics from the f32 value
    st_ref[0, 0:1, :] = jnp.sum(t, axis=(0, 1)).reshape(1, Cp)
    st_ref[0, 1:2, :] = jnp.sum(t * t, axis=(0, 1)).reshape(1, Cp)

    t_ref[0] = t.astype(t_ref.dtype)                     # bf16 store (half HBM traffic)


# ---------------------------------------------------------------------------
# Pass B: bn1 apply + 1x1 conv (expand) + GELU + 1x1 conv (project),
#         streaming per-tile sum/sumsq of the (f32) projection output.
#         Padded tail rows (Mp > M) are masked out of the statistics.
# ---------------------------------------------------------------------------
def _mlp_kernel(t_ref, w2_ref, w3_ref, mu1_ref, is1_ref, y_ref, st_ref, *, m_valid):
    TM = t_ref.shape[0]
    flat = (t_ref[...].astype(jnp.float32) - mu1_ref[...]) * is1_ref[...]   # bn1
    h = jnp.dot(flat.astype(jnp.bfloat16), w2_ref[...],
                preferred_element_type=jnp.float32)                         # (TM, C4p) MXU
    h = _gelu_exact(h)
    y = jnp.dot(h.astype(jnp.bfloat16), w3_ref[...],
                preferred_element_type=jnp.float32)                         # (TM, OUTp) MXU

    if m_valid is None:
        ys = y
    else:
        row0 = pl.program_id(0) * TM
        rows = row0 + jax.lax.broadcasted_iota(jnp.int32, (TM, 1), 0)
        ys = jnp.where(rows < m_valid, y, 0.0)           # exclude padded rows from stats

    st_ref[0, 0:1, :] = jnp.sum(ys, axis=0, keepdims=True)
    st_ref[0, 1:2, :] = jnp.sum(ys * ys, axis=0, keepdims=True)
    y_ref[...] = y.astype(y_ref.dtype)                   # bf16 store


# ---------------------------------------------------------------------------
# Pass C: final BatchNorm apply (reads bf16 y, writes f32)
# ---------------------------------------------------------------------------
def _bn_apply_kernel(y_ref, mu2_ref, is2_ref, o_ref):
    o_ref[...] = (y_ref[...].astype(jnp.float32) - mu2_ref[...]) * is2_ref[...]


def _finalize_stats(stats, count):
    """stats: (G, 2, Cpad) per-tile [sum, sumsq] partials -> mean, inv_std."""
    s = jnp.sum(stats[:, 0, :], axis=0)
    sq = jnp.sum(stats[:, 1, :], axis=0)
    mean = s / count
    # single-pass biased variance (matches training-mode BatchNorm2d, eps=1e-5)
    var = jnp.maximum(sq / count - mean * mean, 0.0)
    inv_std = jax.lax.rsqrt(var + _EPS)
    return mean.reshape(1, -1), inv_std.reshape(1, -1)


def irmlp_forward(x_nchw, w_dw, w2, w3):
    """x_nchw: (N, C, H, W) f32.  w_dw: (3,3,C), w2: (C,4C), w3: (4C,out).
    Returns (N, out_dim, H, W) f32."""
    N, C, H, W = x_nchw.shape
    C4 = w2.shape[1]
    out_dim = w3.shape[1]
    Cp = _round_up(C, 128)
    C4p = _round_up(C4, 128)
    OUTp = _round_up(out_dim, 128)

    # Generation-aware VMEM sizing (v7x: 64 MiB physical -> ~48 MiB limit;
    # v5e/v6e: 128 MiB physical -> ~96 MiB limit).
    vmem_cap = _vmem_capacity_bytes()
    vmem_limit = min(vmem_cap * 3 // 4, 100 * 1024 * 1024)
    budget = int(vmem_limit * 0.6)

    cparams = pltpu.CompilerParams(dimension_semantics=("parallel",),
                                   vmem_limit_bytes=int(vmem_limit))

    # ---- layout prep: NCHW->NHWC, lane-dense channel pad, 1-px spatial halo,
    # then per-row-tile halo windows (one fused XLA gather/copy).
    # TODO(synk): accept NHWC end-to-end to remove the NCHW<->NHWC transposes,
    # and for C << 128 avoid the channel pad of the Pass-A input stream
    # (handle the halo on the unpadded layout instead).
    x = jnp.transpose(x_nchw, (0, 2, 3, 1)).astype(jnp.float32)
    xpad = jnp.pad(x, ((0, 0), (1, 1), (1, 1), (0, Cp - C)))   # (N, H+2, W+2, Cp)

    TH = _pick_row_tile(H, W, Cp, budget)
    GH = H // TH
    if GH == 1:
        xtiles = xpad                                          # (N, H+2, W+2, Cp)
    else:
        ridx = jnp.arange(GH)[:, None] * TH + jnp.arange(TH + 2)[None, :]
        xtiles = xpad[:, ridx].reshape(N * GH, TH + 2, W + 2, Cp)

    wdw_p = jnp.pad(w_dw.astype(jnp.float32), ((0, 0), (0, 0), (0, Cp - C)))
    w2_p = jnp.pad(w2, ((0, Cp - C), (0, C4p - C4))).astype(jnp.bfloat16)
    w3_p = jnp.pad(w3, ((0, C4p - C4), (0, OUTp - out_dim))).astype(jnp.bfloat16)

    # ---- Pass A: depthwise conv + GELU + residual + bn1 partial stats ----
    t_tiled, stats1 = pl.pallas_call(
        _dwconv_kernel,
        out_shape=(jax.ShapeDtypeStruct((N * GH, TH, W, Cp), jnp.bfloat16),
                   jax.ShapeDtypeStruct((N * GH, 2, Cp), jnp.float32)),
        grid_spec=pltpu.PrefetchScalarGridSpec(
            num_scalar_prefetch=0,
            grid=(N * GH,),
            in_specs=[pl.BlockSpec((1, TH + 2, W + 2, Cp), lambda i: (i, 0, 0, 0)),
                      pl.BlockSpec((3, 3, Cp), lambda i: (0, 0, 0))],
            out_specs=[pl.BlockSpec((1, TH, W, Cp), lambda i: (i, 0, 0, 0)),
                       pl.BlockSpec((1, 2, Cp), lambda i: (i, 0, 0))]),
        compiler_params=cparams,
    )(xtiles, wdw_p)

    count = float(N * H * W)
    mu1, is1 = _finalize_stats(stats1, count)                  # (1, Cp) each

    # ---- Pass B: bn1 apply + 1x1 expand + GELU + 1x1 project + bn2 partials ----
    M = N * H * W
    TM = _pick_tm(Cp, C4p, OUTp, M, budget)
    Mp = _round_up(M, TM)
    GB = Mp // TM
    t_flat = t_tiled.reshape(M, Cp)
    if Mp > M:
        t_flat = jnp.pad(t_flat, ((0, Mp - M), (0, 0)))
    m_valid = M if Mp > M else None

    # TODO(synk): single-buffer the loop-invariant operands (w2_p, w3_p, mu1,
    # is1) via pipeline_mode=pl.Buffered(1) to free VMEM at very large C.
    y, stats2 = pl.pallas_call(
        functools.partial(_mlp_kernel, m_valid=m_valid),
        out_shape=(jax.ShapeDtypeStruct((Mp, OUTp), jnp.bfloat16),
                   jax.ShapeDtypeStruct((GB, 2, OUTp), jnp.float32)),
        grid_spec=pltpu.PrefetchScalarGridSpec(
            num_scalar_prefetch=0,
            grid=(GB,),
            in_specs=[pl.BlockSpec((TM, Cp), lambda i: (i, 0)),
                      pl.BlockSpec((Cp, C4p), lambda i: (0, 0)),
                      pl.BlockSpec((C4p, OUTp), lambda i: (0, 0)),
                      pl.BlockSpec((1, Cp), lambda i: (0, 0)),
                      pl.BlockSpec((1, Cp), lambda i: (0, 0))],
            out_specs=[pl.BlockSpec((TM, OUTp), lambda i: (i, 0)),
                       pl.BlockSpec((1, 2, OUTp), lambda i: (i, 0, 0))]),
        compiler_params=cparams,
    )(t_flat, w2_p, w3_p, mu1, is1)

    mu2, is2 = _finalize_stats(stats2, count)                   # (1, OUTp) each

    # ---- Pass C: final BatchNorm ----
    y_norm = pl.pallas_call(
        _bn_apply_kernel,
        out_shape=jax.ShapeDtypeStruct((Mp, OUTp), jnp.float32),
        grid_spec=pltpu.PrefetchScalarGridSpec(
            num_scalar_prefetch=0,
            grid=(GB,),
            in_specs=[pl.BlockSpec((TM, OUTp), lambda i: (i, 0)),
                      pl.BlockSpec((1, OUTp), lambda i: (0, 0)),
                      pl.BlockSpec((1, OUTp), lambda i: (0, 0))],
            out_specs=pl.BlockSpec((TM, OUTp), lambda i: (i, 0))),
        compiler_params=cparams,
    )(y, mu2, is2)

    out = y_norm[:M, :out_dim].reshape(N, H, W, out_dim)
    # TODO(synk): fold this NHWC->NCHW copy into Pass C's output layout (or
    # keep NHWC end-to-end) to kill the epilogue XLA copy.
    return jnp.transpose(out, (0, 3, 1, 2))


if __name__ == "__main__":
    # Small, deterministic example consistent with IRMLP(inp_dim=4, out_dim=8).
    N, C, H, W = 2, 4, 16, 16
    OUT = 8
    key = jax.random.PRNGKey(0)
    k_x, k_dw, k_w2, k_w3 = jax.random.split(key, 4)

    x = jax.random.normal(k_x, (N, C, H, W), jnp.float32)

    # conv1 (depthwise): PyTorch weight (C, 1, 3, 3) -> stored as (3, 3, C)
    w_dw = jax.random.normal(k_dw, (3, 3, C), jnp.float32) * 0.1
    # conv2: PyTorch weight (4C, C, 1, 1) -> stored transposed as (C, 4C)
    w2 = jax.random.normal(k_w2, (C, 4 * C), jnp.float32) * 0.1
    # conv3: PyTorch weight (OUT, 4C, 1, 1) -> stored transposed as (4C, OUT)
    w3 = jax.random.normal(k_w3, (4 * C, OUT), jnp.float32) * 0.1
    # BatchNorm affine params keep their PyTorch defaults (weight=1, bias=0);
    # all convs in the reference have bias=False.

    fwd = jax.jit(irmlp_forward)
    out = jax.block_until_ready(fwd(x, w_dw, w2, w3))
    assert out.shape == (N, OUT, H, W), out.shape
    assert bool(jnp.isfinite(out).all())
    print("KERNEL_OK")
</pallas_src>

<mosaic_0001>
module attributes {stable_mosaic.version = 11 : i64} {
  func.func @_dwconv_kernel(%arg0: i32, %arg1: memref<1x18x18x128xf32, #tpu.memory_space<vmem>>, %arg2: memref<3x3x128xf32, #tpu.memory_space<vmem>>, %arg3: memref<1x16x16x128xbf16, #tpu.memory_space<vmem>>, %arg4: memref<1x2x128xf32, #tpu.memory_space<vmem>>) attributes {dimension_semantics = [#tpu.dimension_semantics<parallel>], iteration_bounds = array<i64: 2>, scalar_prefetch = 0 : i64, scratch_operands = 0 : i64, tpu.core_type = #tpu.core_type<tc>, window_params = [{transform_indices = @transform_0, window_bounds = array<i64: 1, 18, 18, 128>}, {pipeline_mode = #tpu.pipeline_mode<synchronous>, transform_indices = @transform_1, window_bounds = array<i64: 3, 3, 128>}, {transform_indices = @transform_2, window_bounds = array<i64: 1, 16, 16, 128>}, {transform_indices = @transform_3, window_bounds = array<i64: 1, 2, 128>}]} {
    %c0 = arith.constant 0 : index
    %c0_0 = arith.constant 0 : index
    %c0_1 = arith.constant 0 : index
    %0 = vector.load %arg2[%c0, %c0_0, %c0_1] : memref<3x3x128xf32, #tpu.memory_space<vmem>>, vector<3x3x128xf32>
    %c0_2 = arith.constant 0 : index
    %c1 = arith.constant 1 : index
    %c1_3 = arith.constant 1 : index
    %c0_4 = arith.constant 0 : index
    %1 = vector.load %arg1[%c0_2, %c1, %c1_3, %c0_4] : memref<1x18x18x128xf32, #tpu.memory_space<vmem>>, vector<1x16x16x128xf32>
    %2 = vector.shape_cast %1 : vector<1x16x16x128xf32> to vector<16x16x128xf32>
    %3 = vector.extract_strided_slice %0 {offsets = [1, 1, 0], sizes = [1, 1, 128], strides = [1, 1, 1]} : vector<3x3x128xf32> to vector<1x1x128xf32>
    %4 = vector.shape_cast %3 : vector<1x1x128xf32> to vector<128xf32>
    %5 = vector.shape_cast %4 : vector<128xf32> to vector<1x1x128xf32>
    %6 = vector.broadcast %5 : vector<1x1x128xf32> to vector<16x16x128xf32>
    %7 = arith.mulf %2, %6 : vector<16x16x128xf32>
    %c0_5 = arith.constant 0 : index
    %c0_6 = arith.constant 0 : index
    %c0_7 = arith.constant 0 : index
    %c0_8 = arith.constant 0 : index
    %8 = vector.load %arg1[%c0_5, %c0_6, %c0_7, %c0_8] : memref<1x18x18x128xf32, #tpu.memory_space<vmem>>, vector<1x16x16x128xf32>
    %9 = vector.shape_cast %8 : vector<1x16x16x128xf32> to vector<16x16x128xf32>
    %10 = vector.extract_strided_slice %0 {offsets = [0, 0, 0], sizes = [1, 1, 128], strides = [1, 1, 1]} : vector<3x3x128xf32> to vector<1x1x128xf32>
    %11 = vector.shape_cast %10 : vector<1x1x128xf32> to vector<128xf32>
    %12 = vector.shape_cast %11 : vector<128xf32> to vector<1x1x128xf32>
    %13 = vector.broadcast %12 : vector<1x1x128xf32> to vector<16x16x128xf32>
    %14 = arith.mulf %9, %13 : vector<16x16x128xf32>
    %15 = arith.addf %7, %14 : vector<16x16x128xf32>
    %c0_9 = arith.constant 0 : index
    %c0_10 = arith.constant 0 : index
    %c1_11 = arith.constant 1 : index
    %c0_12 = arith.constant 0 : index
    %16 = vector.load %arg1[%c0_9, %c0_10, %c1_11, %c0_12] : memref<1x18x18x128xf32, #tpu.memory_space<vmem>>, vector<1x16x16x128xf32>
    %17 = vector.shape_cast %16 : vector<1x16x16x128xf32> to vector<16x16x128xf32>
    %18 = vector.extract_strided_slice %0 {offsets = [0, 1, 0], sizes = [1, 1, 128], strides = [1, 1, 1]} : vector<3x3x128xf32> to vector<1x1x128xf32>
    %19 = vector.shape_cast %18 : vector<1x1x128xf32> to vector<128xf32>
    %20 = vector.shape_cast %19 : vector<128xf32> to vector<1x1x128xf32>
    %21 = vector.broadcast %20 : vector<1x1x128xf32> to vector<16x16x128xf32>
    %22 = arith.mulf %17, %21 : vector<16x16x128xf32>
    %23 = arith.addf %15, %22 : vector<16x16x128xf32>
    %c0_13 = arith.constant 0 : index
    %c0_14 = arith.constant 0 : index
    %c2 = arith.constant 2 : index
    %c0_15 = arith.constant 0 : index
    %24 = vector.load %arg1[%c0_13, %c0_14, %c2, %c0_15] : memref<1x18x18x128xf32, #tpu.memory_space<vmem>>, vector<1x16x16x128xf32>
    %25 = vector.shape_cast %24 : vector<1x16x16x128xf32> to vector<16x16x128xf32>
    %26 = vector.extract_strided_slice %0 {offsets = [0, 2, 0], sizes = [1, 1, 128], strides = [1, 1, 1]} : vector<3x3x128xf32> to vector<1x1x128xf32>
    %27 = vector.shape_cast %26 : vector<1x1x128xf32> to vector<128xf32>
    %28 = vector.shape_cast %27 : vector<128xf32> to vector<1x1x128xf32>
    %29 = vector.broadcast %28 : vector<1x1x128xf32> to vector<16x16x128xf32>
    %30 = arith.mulf %25, %29 : vector<16x16x128xf32>
    %31 = arith.addf %23, %30 : vector<16x16x128xf32>
    %c0_16 = arith.constant 0 : index
    %c1_17 = arith.constant 1 : index
    %c0_18 = arith.constant 0 : index
    %c0_19 = arith.constant 0 : index
    %32 = vector.load %arg1[%c0_16, %c1_17, %c0_18, %c0_19] : memref<1x18x18x128xf32, #tpu.memory_space<vmem>>, vector<1x16x16x128xf32>
    %33 = vector.shape_cast %32 : vector<1x16x16x128xf32> to vector<16x16x128xf32>
    %34 = vector.extract_strided_slice %0 {offsets = [1, 0, 0], sizes = [1, 1, 128], strides = [1, 1, 1]} : vector<3x3x128xf32> to vector<1x1x128xf32>
    %35 = vector.shape_cast %34 : vector<1x1x128xf32> to vector<128xf32>
    %36 = vector.shape_cast %35 : vector<128xf32> to vector<1x1x128xf32>
    %37 = vector.broadcast %36 : vector<1x1x128xf32> to vector<16x16x128xf32>
    %38 = arith.mulf %33, %37 : vector<16x16x128xf32>
    %39 = arith.addf %31, %38 : vector<16x16x128xf32>
    %c0_20 = arith.constant 0 : index
    %c1_21 = arith.constant 1 : index
    %c2_22 = arith.constant 2 : index
    %c0_23 = arith.constant 0 : index
    %40 = vector.load %arg1[%c0_20, %c1_21, %c2_22, %c0_23] : memref<1x18x18x128xf32, #tpu.memory_space<vmem>>, vector<1x16x16x128xf32>
    %41 = vector.shape_cast %40 : vector<1x16x16x128xf32> to vector<16x16x128xf32>
    %42 = vector.extract_strided_slice %0 {offsets = [1, 2, 0], sizes = [1, 1, 128], strides = [1, 1, 1]} : vector<3x3x128xf32> to vector<1x1x128xf32>
    %43 = vector.shape_cast %42 : vector<1x1x128xf32> to vector<128xf32>
    %44 = vector.shape_cast %43 : vector<128xf32> to vector<1x1x128xf32>
    %45 = vector.broadcast %44 : vector<1x1x128xf32> to vector<16x16x128xf32>
    %46 = arith.mulf %41, %45 : vector<16x16x128xf32>
    %47 = arith.addf %39, %46 : vector<16x16x128xf32>
    %c0_24 = arith.constant 0 : index
    %c2_25 = arith.constant 2 : index
    %c0_26 = arith.constant 0 : index
    %c0_27 = arith.constant 0 : index
    %48 = vector.load %arg1[%c0_24, %c2_25, %c0_26, %c0_27] : memref<1x18x18x128xf32, #tpu.memory_space<vmem>>, vector<1x16x16x128xf32>
    %49 = vector.shape_cast %48 : vector<1x16x16x128xf32> to vector<16x16x128xf32>
    %50 = vector.extract_strided_slice %0 {offsets = [2, 0, 0], sizes = [1, 1, 128], strides = [1, 1, 1]} : vector<3x3x128xf32> to vector<1x1x128xf32>
    %51 = vector.shape_cast %50 : vector<1x1x128xf32> to vector<128xf32>
    %52 = vector.shape_cast %51 : vector<128xf32> to vector<1x1x128xf32>
    %53 = vector.broadcast %52 : vector<1x1x128xf32> to vector<16x16x128xf32>
    %54 = arith.mulf %49, %53 : vector<16x16x128xf32>
    %55 = arith.addf %47, %54 : vector<16x16x128xf32>
    %c0_28 = arith.constant 0 : index
    %c2_29 = arith.constant 2 : index
    %c1_30 = arith.constant 1 : index
    %c0_31 = arith.constant 0 : index
    %56 = vector.load %arg1[%c0_28, %c2_29, %c1_30, %c0_31] : memref<1x18x18x128xf32, #tpu.memory_space<vmem>>, vector<1x16x16x128xf32>
    %57 = vector.shape_cast %56 : vector<1x16x16x128xf32> to vector<16x16x128xf32>
    %58 = vector.extract_strided_slice %0 {offsets = [2, 1, 0], sizes = [1, 1, 128], strides = [1, 1, 1]} : vector<3x3x128xf32> to vector<1x1x128xf32>
    %59 = vector.shape_cast %58 : vector<1x1x128xf32> to vector<128xf32>
    %60 = vector.shape_cast %59 : vector<128xf32> to vector<1x1x128xf32>
    %61 = vector.broadcast %60 : vector<1x1x128xf32> to vector<16x16x128xf32>
    %62 = arith.mulf %57, %61 : vector<16x16x128xf32>
    %63 = arith.addf %55, %62 : vector<16x16x128xf32>
    %c0_32 = arith.constant 0 : index
    %c2_33 = arith.constant 2 : index
    %c2_34 = arith.constant 2 : index
    %c0_35 = arith.constant 0 : index
    %64 = vector.load %arg1[%c0_32, %c2_33, %c2_34, %c0_35] : memref<1x18x18x128xf32, #tpu.memory_space<vmem>>, vector<1x16x16x128xf32>
    %65 = vector.shape_cast %64 : vector<1x16x16x128xf32> to vector<16x16x128xf32>
    %66 = vector.extract_strided_slice %0 {offsets = [2, 2, 0], sizes = [1, 1, 128], strides = [1, 1, 1]} : vector<3x3x128xf32> to vector<1x1x128xf32>
    %67 = vector.shape_cast %66 : vector<1x1x128xf32> to vector<128xf32>
    %68 = vector.shape_cast %67 : vector<128xf32> to vector<1x1x128xf32>
    %69 = vector.broadcast %68 : vector<1x1x128xf32> to vector<16x16x128xf32>
    %70 = arith.mulf %65, %69 : vector<16x16x128xf32>
    %71 = arith.addf %63, %70 : vector<16x16x128xf32>
    %cst = arith.constant 5.000000e-01 : f32
    %72 = vector.broadcast %cst : f32 to vector<16x16x128xf32>
    %73 = arith.mulf %71, %72 : vector<16x16x128xf32>
    %cst_36 = arith.constant 0.707106769 : f32
    %74 = vector.broadcast %cst_36 : f32 to vector<16x16x128xf32>
    %75 = arith.mulf %71, %74 : vector<16x16x128xf32>
    %76 = math.erf %75 : vector<16x16x128xf32>
    %cst_37 = arith.constant 1.000000e+00 : f32
    %77 = vector.broadcast %cst_37 : f32 to vector<16x16x128xf32>
    %78 = arith.addf %77, %76 : vector<16x16x128xf32>
    %79 = arith.mulf %73, %78 : vector<16x16x128xf32>
    %80 = arith.addf %79, %2 : vector<16x16x128xf32>
    %cst_38 = arith.constant dense<0.000000e+00> : vector<128xf32>
    %81 = vector.multi_reduction <add>, %80, %cst_38 [0, 1] : vector<16x16x128xf32> to vector<128xf32>
    %82 = vector.shape_cast %81 : vector<128xf32> to vector<1x128xf32>
    %c0_39 = arith.constant 0 : index
    %c0_40 = arith.constant 0 : index
    %c0_41 = arith.constant 0 : index
    %83 = vector.load %arg4[%c0_39, %c0_40, %c0_41] : memref<1x2x128xf32, #tpu.memory_space<vmem>>, vector<1x1x128xf32>
    %84 = vector.shape_cast %83 : vector<1x1x128xf32> to vector<1x128xf32>
    %85 = vector.shape_cast %82 : vector<1x128xf32> to vector<1x1x128xf32>
    tpu.vector_store %arg4[%c0_39, %c0_40, %c0_41], %85 {strides = array<i32>} : memref<1x2x128xf32, #tpu.memory_space<vmem>>, vector<1x1x128xf32>,
    %86 = arith.mulf %80, %80 : vector<16x16x128xf32>
    %cst_42 = arith.constant dense<0.000000e+00> : vector<128xf32>
    %87 = vector.multi_reduction <add>, %86, %cst_42 [0, 1] : vector<16x16x128xf32> to vector<128xf32>
    %88 = vector.shape_cast %87 : vector<128xf32> to vector<1x128xf32>
    %c0_43 = arith.constant 0 : index
    %c1_44 = arith.constant 1 : index
    %c0_45 = arith.constant 0 : index
    %89 = vector.load %arg4[%c0_43, %c1_44, %c0_45] : memref<1x2x128xf32, #tpu.memory_space<vmem>>, vector<1x1x128xf32>
    %90 = vector.shape_cast %89 : vector<1x1x128xf32> to vector<1x128xf32>
    %91 = vector.shape_cast %88 : vector<1x128xf32> to vector<1x1x128xf32>
    tpu.vector_store %arg4[%c0_43, %c1_44, %c0_45], %91 {strides = array<i32>} : memref<1x2x128xf32, #tpu.memory_space<vmem>>, vector<1x1x128xf32>,
    %92 = arith.truncf %80 : vector<16x16x128xf32> to vector<16x16x128xbf16>
    %c0_46 = arith.constant 0 : index
    %c0_47 = arith.constant 0 : index
    %c0_48 = arith.constant 0 : index
    %c0_49 = arith.constant 0 : index
    %93 = vector.load %arg3[%c0_46, %c0_47, %c0_48, %c0_49] : memref<1x16x16x128xbf16, #tpu.memory_space<vmem>>, vector<1x16x16x128xbf16>
    %94 = vector.shape_cast %93 : vector<1x16x16x128xbf16> to vector<16x16x128xbf16>
    %95 = vector.shape_cast %92 : vector<16x16x128xbf16> to vector<1x16x16x128xbf16>
    tpu.vector_store %arg3[%c0_46, %c0_47, %c0_48, %c0_49], %95 {strides = array<i32>} : memref<1x16x16x128xbf16, #tpu.memory_space<vmem>>, vector<1x16x16x128xbf16>,
    return
  }
  func.func @transform_0(%arg0: i32) -> (i32, i32, i32, i32) {
    %c0_i32 = arith.constant 0 : i32
    %c0_i32_0 = arith.constant 0 : i32
    %c0_i32_1 = arith.constant 0 : i32
    %c0_i32_2 = arith.constant 0 : i32
    return %arg0, %c0_i32, %c0_i32_0, %c0_i32_1 : i32, i32, i32, i32
  }
  func.func @transform_1(%arg0: i32) -> (i32, i32, i32) {
    %c0_i32 = arith.constant 0 : i32
    %c0_i32_0 = arith.constant 0 : i32
    %c0_i32_1 = arith.constant 0 : i32
    %c0_i32_2 = arith.constant 0 : i32
    return %c0_i32, %c0_i32_0, %c0_i32_1 : i32, i32, i32
  }
  func.func @transform_2(%arg0: i32) -> (i32, i32, i32, i32) {
    %c0_i32 = arith.constant 0 : i32
    %c0_i32_0 = arith.constant 0 : i32
    %c0_i32_1 = arith.constant 0 : i32
    %c0_i32_2 = arith.constant 0 : i32
    return %arg0, %c0_i32, %c0_i32_0, %c0_i32_1 : i32, i32, i32, i32
  }
  func.func @transform_3(%arg0: i32) -> (i32, i32, i32) {
    %c0_i32 = arith.constant 0 : i32
    %c0_i32_0 = arith.constant 0 : i32
    %c0_i32_1 = arith.constant 0 : i32
    return %arg0, %c0_i32, %c0_i32_0 : i32, i32, i32
  }
}

module attributes {stable_mosaic.version = 11 : i64} {
  func.func @_mlp_kernel(%arg0: i32, %arg1: memref<512x128xbf16, #tpu.memory_space<vmem>>, %arg2: memref<128x128xbf16, #tpu.memory_space<vmem>>, %arg3: memref<128x128xbf16, #tpu.memory_space<vmem>>, %arg4: memref<1x128xf32, #tpu.memory_space<vmem>>, %arg5: memref<1x128xf32, #tpu.memory_space<vmem>>, %arg6: memref<512x128xbf16, #tpu.memory_space<vmem>>, %arg7: memref<1x2x128xf32, #tpu.memory_space<vmem>>) attributes {dimension_semantics = [#tpu.dimension_semantics<parallel>], iteration_bounds = array<i64: 1>, scalar_prefetch = 0 : i64, scratch_operands = 0 : i64, tpu.core_type = #tpu.core_type<tc>, window_params = [{transform_indices = @transform_0, window_bounds = array<i64: 512, 128>}, {pipeline_mode = #tpu.pipeline_mode<synchronous>, transform_indices = @transform_1, window_bounds = array<i64: 128, 128>}, {pipeline_mode = #tpu.pipeline_mode<synchronous>, transform_indices = @transform_2, window_bounds = array<i64: 128, 128>}, {pipeline_mode = #tpu.pipeline_mode<synchronous>, transform_indices = @transform_3, window_bounds = array<i64: 1, 128>}, {pipeline_mode = #tpu.pipeline_mode<synchronous>, transform_indices = @transform_4, window_bounds = array<i64: 1, 128>}, {transform_indices = @transform_5, window_bounds = array<i64: 512, 128>}, {transform_indices = @transform_6, window_bounds = array<i64: 1, 2, 128>}]} {
    %c0 = arith.constant 0 : index
    %c0_0 = arith.constant 0 : index
    %0 = vector.load %arg1[%c0, %c0_0] : memref<512x128xbf16, #tpu.memory_space<vmem>>, vector<512x128xbf16>
    %1 = arith.extf %0 : vector<512x128xbf16> to vector<512x128xf32>
    %c0_1 = arith.constant 0 : index
    %c0_2 = arith.constant 0 : index
    %2 = vector.load %arg4[%c0_1, %c0_2] : memref<1x128xf32, #tpu.memory_space<vmem>>, vector<1x128xf32>
    %3 = vector.broadcast %2 : vector<1x128xf32> to vector<512x128xf32>
    %4 = arith.subf %1, %3 : vector<512x128xf32>
    %c0_3 = arith.constant 0 : index
    %c0_4 = arith.constant 0 : index
    %5 = vector.load %arg5[%c0_3, %c0_4] : memref<1x128xf32, #tpu.memory_space<vmem>>, vector<1x128xf32>
    %6 = vector.broadcast %5 : vector<1x128xf32> to vector<512x128xf32>
    %7 = arith.mulf %4, %6 : vector<512x128xf32>
    %8 = arith.truncf %7 : vector<512x128xf32> to vector<512x128xbf16>
    %c0_5 = arith.constant 0 : index
    %c0_6 = arith.constant 0 : index
    %9 = vector.load %arg2[%c0_5, %c0_6] : memref<128x128xbf16, #tpu.memory_space<vmem>>, vector<128x128xbf16>
    %cst = arith.constant dense<0.000000e+00> : vector<512x128xf32>
    %10 = tpu.matmul %8, %9, %cst {dimension_numbers = #tpu.dot_dimension_numbers<[1], [0], [0], [1], [0, 0, 1, 1], [], []>} : vector<512x128xbf16>, vector<128x128xbf16>, vector<512x128xf32> -> vector<512x128xf32>
    %cst_7 = arith.constant 5.000000e-01 : f32
    %11 = vector.broadcast %cst_7 : f32 to vector<512x128xf32>
    %12 = arith.mulf %10, %11 : vector<512x128xf32>
    %cst_8 = arith.constant 0.707106769 : f32
    %13 = vector.broadcast %cst_8 : f32 to vector<512x128xf32>
    %14 = arith.mulf %10, %13 : vector<512x128xf32>
    %15 = math.erf %14 : vector<512x128xf32>
    %cst_9 = arith.constant 1.000000e+00 : f32
    %16 = vector.broadcast %cst_9 : f32 to vector<512x128xf32>
    %17 = arith.addf %16, %15 : vector<512x128xf32>
    %18 = arith.mulf %12, %17 : vector<512x128xf32>
    %19 = arith.truncf %18 : vector<512x128xf32> to vector<512x128xbf16>
    %c0_10 = arith.constant 0 : index
    %c0_11 = arith.constant 0 : index
    %20 = vector.load %arg3[%c0_10, %c0_11] : memref<128x128xbf16, #tpu.memory_space<vmem>>, vector<128x128xbf16>
    %cst_12 = arith.constant dense<0.000000e+00> : vector<512x128xf32>
    %21 = tpu.matmul %19, %20, %cst_12 {dimension_numbers = #tpu.dot_dimension_numbers<[1], [0], [0], [1], [0, 0, 1, 1], [], []>} : vector<512x128xbf16>, vector<128x128xbf16>, vector<512x128xf32> -> vector<512x128xf32>
    %cst_13 = arith.constant dense<0.000000e+00> : vector<128xf32>
    %22 = vector.multi_reduction <add>, %21, %cst_13 [0] : vector<512x128xf32> to vector<128xf32>
    %23 = vector.shape_cast %22 : vector<128xf32> to vector<1x128xf32>
    %c0_14 = arith.constant 0 : index
    %c0_15 = arith.constant 0 : index
    %c0_16 = arith.constant 0 : index
    %24 = vector.load %arg7[%c0_14, %c0_15, %c0_16] : memref<1x2x128xf32, #tpu.memory_space<vmem>>, vector<1x1x128xf32>
    %25 = vector.shape_cast %24 : vector<1x1x128xf32> to vector<1x128xf32>
    %26 = vector.shape_cast %23 : vector<1x128xf32> to vector<1x1x128xf32>
    tpu.vector_store %arg7[%c0_14, %c0_15, %c0_16], %26 {strides = array<i32>} : memref<1x2x128xf32, #tpu.memory_space<vmem>>, vector<1x1x128xf32>,
    %27 = arith.mulf %21, %21 : vector<512x128xf32>
    %cst_17 = arith.constant dense<0.000000e+00> : vector<128xf32>
    %28 = vector.multi_reduction <add>, %27, %cst_17 [0] : vector<512x128xf32> to vector<128xf32>
    %29 = vector.shape_cast %28 : vector<128xf32> to vector<1x128xf32>
    %c0_18 = arith.constant 0 : index
    %c1 = arith.constant 1 : index
    %c0_19 = arith.constant 0 : index
    %30 = vector.load %arg7[%c0_18, %c1, %c0_19] : memref<1x2x128xf32, #tpu.memory_space<vmem>>, vector<1x1x128xf32>
    %31 = vector.shape_cast %30 : vector<1x1x128xf32> to vector<1x128xf32>
    %32 = vector.shape_cast %29 : vector<1x128xf32> to vector<1x1x128xf32>
    tpu.vector_store %arg7[%c0_18, %c1, %c0_19], %32 {strides = array<i32>} : memref<1x2x128xf32, #tpu.memory_space<vmem>>, vector<1x1x128xf32>,
    %33 = arith.truncf %21 : vector<512x128xf32> to vector<512x128xbf16>
    %c0_20 = arith.constant 0 : index
    %c0_21 = arith.constant 0 : index
    %34 = vector.load %arg6[%c0_20, %c0_21] : memref<512x128xbf16, #tpu.memory_space<vmem>>, vector<512x128xbf16>
    tpu.vector_store %arg6[%c0_20, %c0_21], %33 {strides = array<i32>} : memref<512x128xbf16, #tpu.memory_space<vmem>>, vector<512x128xbf16>,
    return
  }
  func.func @transform_0(%arg0: i32) -> (i32, i32) {
    %c0_i32 = arith.constant 0 : i32
    %c0_i32_0 = arith.constant 0 : i32
    return %arg0, %c0_i32 : i32, i32
  }
  func.func @transform_1(%arg0: i32) -> (i32, i32) {
    %c0_i32 = arith.constant 0 : i32
    %c0_i32_0 = arith.constant 0 : i32
    %c0_i32_1 = arith.constant 0 : i32
    return %c0_i32, %c0_i32_0 : i32, i32
  }
  func.func @transform_2(%arg0: i32) -> (i32, i32) {
    %c0_i32 = arith.constant 0 : i32
    %c0_i32_0 = arith.constant 0 : i32
    %c0_i32_1 = arith.constant 0 : i32
    return %c0_i32, %c0_i32_0 : i32, i32
  }
  func.func @transform_3(%arg0: i32) -> (i32, i32) {
    %c0_i32 = arith.constant 0 : i32
    %c0_i32_0 = arith.constant 0 : i32
    %c0_i32_1 = arith.constant 0 : i32
    return %c0_i32, %c0_i32_0 : i32, i32
  }
  func.func @transform_4(%arg0: i32) -> (i32, i32) {
    %c0_i32 = arith.constant 0 : i32
    %c0_i32_0 = arith.constant 0 : i32
    %c0_i32_1 = arith.constant 0 : i32
    return %c0_i32, %c0_i32_0 : i32, i32
  }
  func.func @transform_5(%arg0: i32) -> (i32, i32) {
    %c0_i32 = arith.constant 0 : i32
    %c0_i32_0 = arith.constant 0 : i32
    return %arg0, %c0_i32 : i32, i32
  }
  func.func @transform_6(%arg0: i32) -> (i32, i32, i32) {
    %c0_i32 = arith.constant 0 : i32
    %c0_i32_0 = arith.constant 0 : i32
    %c0_i32_1 = arith.constant 0 : i32
    return %arg0, %c0_i32, %c0_i32_0 : i32, i32, i32
  }
}

module attributes {stable_mosaic.version = 11 : i64} {
  func.func @_bn_apply_kernel(%arg0: i32, %arg1: memref<512x128xbf16, #tpu.memory_space<vmem>>, %arg2: memref<1x128xf32, #tpu.memory_space<vmem>>, %arg3: memref<1x128xf32, #tpu.memory_space<vmem>>, %arg4: memref<512x128xf32, #tpu.memory_space<vmem>>) attributes {dimension_semantics = [#tpu.dimension_semantics<parallel>], iteration_bounds = array<i64: 1>, scalar_prefetch = 0 : i64, scratch_operands = 0 : i64, tpu.core_type = #tpu.core_type<tc>, window_params = [{transform_indices = @transform_0, window_bounds = array<i64: 512, 128>}, {pipeline_mode = #tpu.pipeline_mode<synchronous>, transform_indices = @transform_1, window_bounds = array<i64: 1, 128>}, {pipeline_mode = #tpu.pipeline_mode<synchronous>, transform_indices = @transform_2, window_bounds = array<i64: 1, 128>}, {transform_indices = @transform_3, window_bounds = array<i64: 512, 128>}]} {
    %c0 = arith.constant 0 : index
    %c0_0 = arith.constant 0 : index
    %0 = vector.load %arg1[%c0, %c0_0] : memref<512x128xbf16, #tpu.memory_space<vmem>>, vector<512x128xbf16>
    %1 = arith.extf %0 : vector<512x128xbf16> to vector<512x128xf32>
    %c0_1 = arith.constant 0 : index
    %c0_2 = arith.constant 0 : index
    %2 = vector.load %arg2[%c0_1, %c0_2] : memref<1x128xf32, #tpu.memory_space<vmem>>, vector<1x128xf32>
    %3 = vector.broadcast %2 : vector<1x128xf32> to vector<512x128xf32>
    %4 = arith.subf %1, %3 : vector<512x128xf32>
    %c0_3 = arith.constant 0 : index
    %c0_4 = arith.constant 0 : index
    %5 = vector.load %arg3[%c0_3, %c0_4] : memref<1x128xf32, #tpu.memory_space<vmem>>, vector<1x128xf32>
    %6 = vector.broadcast %5 : vector<1x128xf32> to vector<512x128xf32>
    %7 = arith.mulf %4, %6 : vector<512x128xf32>
    %c0_5 = arith.constant 0 : index
    %c0_6 = arith.constant 0 : index
    %8 = vector.load %arg4[%c0_5, %c0_6] : memref<512x128xf32, #tpu.memory_space<vmem>>, vector<512x128xf32>
    tpu.vector_store %arg4[%c0_5, %c0_6], %7 {strides = array<i32>} : memref<512x128xf32, #tpu.memory_space<vmem>>, vector<512x128xf32>,
    return
  }
  func.func @transform_0(%arg0: i32) -> (i32, i32) {
    %c0_i32 = arith.constant 0 : i32
    %c0_i32_0 = arith.constant 0 : i32
    return %arg0, %c0_i32 : i32, i32
  }
  func.func @transform_1(%arg0: i32) -> (i32, i32) {
    %c0_i32 = arith.constant 0 : i32
    %c0_i32_0 = arith.constant 0 : i32
    %c0_i32_1 = arith.constant 0 : i32
    return %c0_i32, %c0_i32_0 : i32, i32
  }
  func.func @transform_2(%arg0: i32) -> (i32, i32) {
    %c0_i32 = arith.constant 0 : i32
    %c0_i32_0 = arith.constant 0 : i32
    %c0_i32_1 = arith.constant 0 : i32
    return %c0_i32, %c0_i32_0 : i32, i32
  }
  func.func @transform_3(%arg0: i32) -> (i32, i32) {
    %c0_i32 = arith.constant 0 : i32
    %c0_i32_0 = arith.constant 0 : i32
    return %arg0, %c0_i32 : i32, i32
  }
}

</mosaic_0001>

<bundles_post_ra>
// kernel: irmlp_forward.5
= control target key start
LH: loop header
LB: loop body
LE: loop exit
PB: predicated region body
PF: predicated region fallthrough
CT: control target
= control target key end

     0   :  { %s959_s0 = inlined_call_operand.vmem [shape: bf16[512,128], index: 0, kind: input, shape index: {}]   ;;  %s960_s1 = inlined_call_operand.vmem [shape: f32[1,128], index: 1, kind: input, shape index: {}]   ;;  %s961_s2 = inlined_call_operand.vmem [shape: f32[1,128], index: 2, kind: input, shape index: {}]   ;;  %s962_s3 = inlined_call_operand.vmem [shape: f32[512,128], index: 3, kind: output, shape index: {}]  }
   0x1   :  { %v355_v0 = vld [vmem:[%s959_s0] sm:$0xff]   ;;  %v482_v4 = vld [vmem:[%s959_s0 + $0x8] sm:$0xff]   ;;  %v483_v5 = vld [vmem:[%s959_s0 + $0x10] sm:$0xff]  }
   0x2   :  { %v539_v1 = vld [vmem:[%s960_s1] ss:$0 sm:$0xff]  ;;  %v356_v2 = vunpack.c.l.bf16 %v355_v0  ;;  %v357_v3 = vunpack.c.h.bf16 %v355_v0  ;;  %v484_v6 = vld [vmem:[%s959_s0 + $0x18] sm:$0xff]   ;;  %v360_v8 = vunpack.c.l.bf16 %v482_v4  ;;  %v361_v9 = vunpack.c.h.bf16 %v482_v4  ;;  %v486_v25 = vld [vmem:[%s959_s0 + $0x28] sm:$0xff]  }
   0x3   :  { %v553_v7 = vld [vmem:[%s961_s2] ss:$0 sm:$0xff]  ;;  %v364_v10 = vunpack.c.l.bf16 %v483_v5  ;;  %v365_v11 = vunpack.c.h.bf16 %v483_v5  ;;  %v368_v14 = vunpack.c.l.bf16 %v484_v6  ;;  %v369_v15 = vunpack.c.h.bf16 %v484_v6  ;;  %v487_v26 = vld [vmem:[%s959_s0 + $0x30] sm:$0xff]   ;;  %v488_v31 = vld [vmem:[%s959_s0 + $0x38] sm:$0xff]  }
   0x4   :  { %v149_v12 = vsub.f32 %v356_v2, %v539_v1  ;;  %v150_v13 = vsub.f32 %v357_v3, %v539_v1  ;;  %v151_v16 = vsub.f32 %v360_v8, %v539_v1  ;;  %v152_v17 = vsub.f32 %v361_v9, %v539_v1  ;;  %v485_v20 = vld [vmem:[%s959_s0 + $0x20] sm:$0xff]   ;;  %v490_v53 = vld [vmem:[%s959_s0 + $0x48] sm:$0xff]   ;;  %v491_v54 = vld [vmem:[%s959_s0 + $0x50] sm:$0xff]  }
   0x5   :  { %v153_v18 = vsub.f32 %v364_v10, %v539_v1  ;;  %v154_v19 = vsub.f32 %v365_v11, %v539_v1  ;;  %v155_v23 = vsub.f32 %v368_v14, %v539_v1  ;;  %v156_v24 = vsub.f32 %v369_v15, %v539_v1  ;;  %v489_v48 = vld [vmem:[%s959_s0 + $0x40] sm:$0xff]   ;;  %v492_v59 = vld [vmem:[%s959_s0 + $0x58] sm:$0xff]  }
   0x6   :  { %v220_v21 = vmul.f32 %v553_v7, %v149_v12  ;;  %v221_v22 = vmul.f32 %v553_v7, %v150_v13  ;;  %v222_v27 = vmul.f32 %v553_v7, %v151_v16  ;;  %v223_v28 = vmul.f32 %v553_v7, %v152_v17  ;;  %v493_v14 = vld [vmem:[%s959_s0 + $0x60] sm:$0xff]  }
   0x7   :  { %v224_v29 = vmul.f32 %v553_v7, %v153_v18  ;;  %v225_v30 = vmul.f32 %v553_v7, %v154_v19  ;;  %v226_v32 = vmul.f32 %v553_v7, %v155_v23  ;;  %v227_v33 = vmul.f32 %v553_v7, %v156_v24  ;;  %v494_v19 = vld [vmem:[%s959_s0 + $0x68] sm:$0xff]  }
   0x8   :  { %284 = vst [vmem:[%s962_s3] sm:$0xff] %v220_v21  ;;  %285 = vst [vmem:[%s962_s3 + $0x8] sm:$0xff] %v221_v22  ;;  %v372_v34 = vunpack.c.l.bf16 %v485_v20  ;;  %v373_v35 = vunpack.c.h.bf16 %v485_v20  ;;  %v376_v36 = vunpack.c.l.bf16 %v486_v25  ;;  %v377_v37 = vunpack.c.h.bf16 %v486_v25  ;;  %v495_v20 = vld [vmem:[%s959_s0 + $0x70] sm:$0xff]   ;;  %v496_v25 = vld [vmem:[%s959_s0 + $0x78] sm:$0xff]  }
   0x9   :  { %286 = vst [vmem:[%s962_s3 + $0x10] sm:$0xff] %v222_v27  ;;  %287 = vst [vmem:[%s962_s3 + $0x18] sm:$0xff] %v223_v28  ;;  %v380_v38 = vunpack.c.l.bf16 %v487_v26  ;;  %v381_v39 = vunpack.c.h.bf16 %v487_v26  ;;  %v384_v42 = vunpack.c.l.bf16 %v488_v31  ;;  %v385_v43 = vunpack.c.h.bf16 %v488_v31 }
   0xa   :  { %288 = vst [vmem:[%s962_s3 + $0x20] sm:$0xff] %v224_v29  ;;  %289 = vst [vmem:[%s962_s3 + $0x28] sm:$0xff] %v225_v30  ;;  %v157_v40 = vsub.f32 %v372_v34, %v539_v1  ;;  %v158_v41 = vsub.f32 %v373_v35, %v539_v1  ;;  %v159_v44 = vsub.f32 %v376_v36, %v539_v1  ;;  %v388_v62 = vunpack.c.l.bf16 %v489_v48 }
   0xb   :  { %290 = vst [vmem:[%s962_s3 + $0x30] sm:$0xff] %v226_v32  ;;  %291 = vst [vmem:[%s962_s3 + $0x38] sm:$0xff] %v227_v33  ;;  %v160_v45 = vsub.f32 %v377_v37, %v539_v1  ;;  %v161_v46 = vsub.f32 %v380_v38, %v539_v1  ;;  %v162_v47 = vsub.f32 %v381_v39, %v539_v1  ;;  %v389_v63 = vunpack.c.h.bf16 %v489_v48  ;;  %v499_v48 = vld [vmem:[%s959_s0 + $0x90] sm:$0xff]  }
   0xc   :  { %v228_v49 = vmul.f32 %v553_v7, %v157_v40  ;;  %v229_v50 = vmul.f32 %v553_v7, %v158_v41  ;;  %v163_v51 = vsub.f32 %v384_v42, %v539_v1  ;;  %v164_v52 = vsub.f32 %v385_v43, %v539_v1  ;;  %v497_v42 = vld [vmem:[%s959_s0 + $0x80] sm:$0xff]  }
   0xd   :  { %v230_v55 = vmul.f32 %v553_v7, %v159_v44  ;;  %v231_v56 = vmul.f32 %v553_v7, %v160_v45  ;;  %v232_v57 = vmul.f32 %v553_v7, %v161_v46  ;;  %v233_v58 = vmul.f32 %v553_v7, %v162_v47  ;;  %v498_v47 = vld [vmem:[%s959_s0 + $0x88] sm:$0xff]  }
   0xe   :  { %292 = vst [vmem:[%s962_s3 + $0x40] sm:$0xff] %v228_v49  ;;  %293 = vst [vmem:[%s962_s3 + $0x48] sm:$0xff] %v229_v50  ;;  %v234_v60 = vmul.f32 %v553_v7, %v163_v51  ;;  %v235_v61 = vmul.f32 %v553_v7, %v164_v52  ;;  %v392_v0 = vunpack.c.l.bf16 %v490_v53  ;;  %v393_v2 = vunpack.c.h.bf16 %v490_v53  ;;  %v500_v53 = vld [vmem:[%s959_s0 + $0x98] sm:$0xff]  }
   0xf   :  { %294 = vst [vmem:[%s962_s3 + $0x50] sm:$0xff] %v230_v55  ;;  %295 = vst [vmem:[%s962_s3 + $0x58] sm:$0xff] %v231_v56  ;;  %v396_v3 = vunpack.c.l.bf16 %v491_v54  ;;  %v397_v4 = vunpack.c.h.bf16 %v491_v54  ;;  %v165_v5 = vsub.f32 %v388_v62, %v539_v1  ;;  %v166_v6 = vsub.f32 %v389_v63, %v539_v1 }
  0x10   :  { %296 = vst [vmem:[%s962_s3 + $0x60] sm:$0xff] %v232_v57  ;;  %297 = vst [vmem:[%s962_s3 + $0x68] sm:$0xff] %v233_v58  ;;  %v400_v8 = vunpack.c.l.bf16 %v492_v59  ;;  %v401_v9 = vunpack.c.h.bf16 %v492_v59  ;;  %v167_v10 = vsub.f32 %v392_v0, %v539_v1  ;;  %v168_v11 = vsub.f32 %v393_v2, %v539_v1 }
  0x11   :  { %298 = vst [vmem:[%s962_s3 + $0x70] sm:$0xff] %v234_v60  ;;  %299 = vst [vmem:[%s962_s3 + $0x78] sm:$0xff] %v235_v61  ;;  %v169_v12 = vsub.f32 %v396_v3, %v539_v1  ;;  %v170_v13 = vsub.f32 %v397_v4, %v539_v1  ;;  %v236_v15 = vmul.f32 %v553_v7, %v165_v5  ;;  %v404_v28 = vunpack.c.l.bf16 %v493_v14 }
  0x12   :  { %v237_v16 = vmul.f32 %v553_v7, %v166_v6  ;;  %v171_v17 = vsub.f32 %v400_v8, %v539_v1  ;;  %v172_v18 = vsub.f32 %v401_v9, %v539_v1  ;;  %v238_v21 = vmul.f32 %v553_v7, %v167_v10  ;;  %v501_v8 = vld [vmem:[%s959_s0 + $0xa0] sm:$0xff]  }
  0x13   :  { %v239_v22 = vmul.f32 %v553_v7, %v168_v11  ;;  %v240_v23 = vmul.f32 %v553_v7, %v169_v12  ;;  %v241_v24 = vmul.f32 %v553_v7, %v170_v13  ;;  %300 = vst [vmem:[%s962_s3 + $0x80] sm:$0xff] %v236_v15  ;;  %v405_v29 = vunpack.c.h.bf16 %v493_v14  ;;  %v502_v13 = vld [vmem:[%s959_s0 + $0xa8] sm:$0xff]   ;;  %v503_v14 = vld [vmem:[%s959_s0 + $0xb0] sm:$0xff]  }
  0x14   :  { %301 = vst [vmem:[%s962_s3 + $0x88] sm:$0xff] %v237_v16  ;;  %v242_v26 = vmul.f32 %v553_v7, %v171_v17  ;;  %v243_v27 = vmul.f32 %v553_v7, %v172_v18  ;;  %302 = vst [vmem:[%s962_s3 + $0x90] sm:$0xff] %v238_v21  ;;  %v408_v30 = vunpack.c.l.bf16 %v494_v19  ;;  %v409_v31 = vunpack.c.h.bf16 %v494_v19  ;;  %v504_v19 = vld [vmem:[%s959_s0 + $0xb8] sm:$0xff]  }
  0x15   :  { %303 = vst [vmem:[%s962_s3 + $0x98] sm:$0xff] %v239_v22  ;;  %304 = vst [vmem:[%s962_s3 + $0xa0] sm:$0xff] %v240_v23  ;;  %v412_v32 = vunpack.c.l.bf16 %v495_v20  ;;  %v413_v33 = vunpack.c.h.bf16 %v495_v20  ;;  %v173_v34 = vsub.f32 %v404_v28, %v539_v1  ;;  %v174_v35 = vsub.f32 %v405_v29, %v539_v1 }
  0x16   :  { %305 = vst [vmem:[%s962_s3 + $0xa8] sm:$0xff] %v241_v24  ;;  %306 = vst [vmem:[%s962_s3 + $0xb0] sm:$0xff] %v242_v26  ;;  %v416_v36 = vunpack.c.l.bf16 %v496_v25  ;;  %v417_v37 = vunpack.c.h.bf16 %v496_v25  ;;  %v175_v38 = vsub.f32 %v408_v30, %v539_v1  ;;  %v176_v39 = vsub.f32 %v409_v31, %v539_v1 }
  0x17   :  { %307 = vst [vmem:[%s962_s3 + $0xb8] sm:$0xff] %v243_v27  ;;  %v177_v40 = vsub.f32 %v412_v32, %v539_v1  ;;  %v178_v41 = vsub.f32 %v413_v33, %v539_v1  ;;  %v244_v43 = vmul.f32 %v553_v7, %v173_v34  ;;  %v245_v44 = vmul.f32 %v553_v7, %v174_v35 }
  0x18   :  { %v179_v45 = vsub.f32 %v416_v36, %v539_v1  ;;  %v180_v46 = vsub.f32 %v417_v37, %v539_v1  ;;  %v246_v49 = vmul.f32 %v553_v7, %v175_v38  ;;  %v247_v50 = vmul.f32 %v553_v7, %v176_v39  ;;  %v505_v36 = vld [vmem:[%s959_s0 + $0xc0] sm:$0xff]  }
  0x19   :  { %v248_v51 = vmul.f32 %v553_v7, %v177_v40  ;;  %v249_v52 = vmul.f32 %v553_v7, %v178_v41  ;;  %308 = vst [vmem:[%s962_s3 + $0xc0] sm:$0xff] %v244_v43  ;;  %309 = vst [vmem:[%s962_s3 + $0xc8] sm:$0xff] %v245_v44  ;;  %v420_v56 = vunpack.c.l.bf16 %v497_v42  ;;  %v421_v57 = vunpack.c.h.bf16 %v497_v42  ;;  %v506_v41 = vld [vmem:[%s959_s0 + $0xc8] sm:$0xff]   ;;  %v507_v42 = vld [vmem:[%s959_s0 + $0xd0] sm:$0xff]  }
  0x1a   :  { %v250_v54 = vmul.f32 %v553_v7, %v179_v45  ;;  %v251_v55 = vmul.f32 %v553_v7, %v180_v46  ;;  %310 = vst [vmem:[%s962_s3 + $0xd0] sm:$0xff] %v246_v49  ;;  %311 = vst [vmem:[%s962_s3 + $0xd8] sm:$0xff] %v247_v50  ;;  %v424_v58 = vunpack.c.l.bf16 %v498_v47  ;;  %v425_v59 = vunpack.c.h.bf16 %v498_v47  ;;  %v508_v47 = vld [vmem:[%s959_s0 + $0xd8] sm:$0xff]  }
  0x1b   :  { %312 = vst [vmem:[%s962_s3 + $0xe0] sm:$0xff] %v248_v51  ;;  %313 = vst [vmem:[%s962_s3 + $0xe8] sm:$0xff] %v249_v52  ;;  %v428_v60 = vunpack.c.l.bf16 %v499_v48  ;;  %v429_v61 = vunpack.c.h.bf16 %v499_v48  ;;  %v181_v62 = vsub.f32 %v420_v56, %v539_v1  ;;  %v182_v63 = vsub.f32 %v421_v57, %v539_v1 }
  0x1c   :  { %314 = vst [vmem:[%s962_s3 + $0xf0] sm:$0xff] %v250_v54  ;;  %315 = vst [vmem:[%s962_s3 + $0xf8] sm:$0xff] %v251_v55  ;;  %v432_v0 = vunpack.c.l.bf16 %v500_v53  ;;  %v433_v2 = vunpack.c.h.bf16 %v500_v53  ;;  %v183_v3 = vsub.f32 %v424_v58, %v539_v1  ;;  %v184_v4 = vsub.f32 %v425_v59, %v539_v1 }
  0x1d   :  { %v185_v5 = vsub.f32 %v428_v60, %v539_v1  ;;  %v186_v6 = vsub.f32 %v429_v61, %v539_v1  ;;  %v252_v9 = vmul.f32 %v553_v7, %v181_v62  ;;  %v253_v10 = vmul.f32 %v553_v7, %v182_v63 }
  0x1e   :  { %v187_v11 = vsub.f32 %v432_v0, %v539_v1  ;;  %v188_v12 = vsub.f32 %v433_v2, %v539_v1  ;;  %v254_v15 = vmul.f32 %v553_v7, %v183_v3  ;;  %v255_v16 = vmul.f32 %v553_v7, %v184_v4  ;;  %v509_v0 = vld [vmem:[%s959_s0 + $0xe0] sm:$0xff]  }
  0x1f   :  { %v256_v17 = vmul.f32 %v553_v7, %v185_v5  ;;  %v257_v18 = vmul.f32 %v553_v7, %v186_v6  ;;  %316 = vst [vmem:[%s962_s3 + $0x100] sm:$0xff] %v252_v9  ;;  %317 = vst [vmem:[%s962_s3 + $0x108] sm:$0xff] %v253_v10  ;;  %v436_v22 = vunpack.c.l.bf16 %v501_v8  ;;  %v437_v23 = vunpack.c.h.bf16 %v501_v8  ;;  %v510_v6 = vld [vmem:[%s959_s0 + $0xe8] sm:$0xff]   ;;  %v511_v8 = vld [vmem:[%s959_s0 + $0xf0] sm:$0xff]  }
  0x20   :  { %v258_v20 = vmul.f32 %v553_v7, %v187_v11  ;;  %v259_v21 = vmul.f32 %v553_v7, %v188_v12  ;;  %318 = vst [vmem:[%s962_s3 + $0x110] sm:$0xff] %v254_v15  ;;  %319 = vst [vmem:[%s962_s3 + $0x118] sm:$0xff] %v255_v16  ;;  %v440_v24 = vunpack.c.l.bf16 %v502_v13  ;;  %v441_v25 = vunpack.c.h.bf16 %v502_v13  ;;  %v512_v13 = vld [vmem:[%s959_s0 + $0xf8] sm:$0xff]  }
  0x21   :  { %320 = vst [vmem:[%s962_s3 + $0x120] sm:$0xff] %v256_v17  ;;  %321 = vst [vmem:[%s962_s3 + $0x128] sm:$0xff] %v257_v18  ;;  %v444_v26 = vunpack.c.l.bf16 %v503_v14  ;;  %v445_v27 = vunpack.c.h.bf16 %v503_v14  ;;  %v189_v28 = vsub.f32 %v436_v22, %v539_v1  ;;  %v190_v29 = vsub.f32 %v437_v23, %v539_v1 }
  0x22   :  { %322 = vst [vmem:[%s962_s3 + $0x130] sm:$0xff] %v258_v20  ;;  %323 = vst [vmem:[%s962_s3 + $0x138] sm:$0xff] %v259_v21  ;;  %v448_v30 = vunpack.c.l.bf16 %v504_v19  ;;  %v449_v31 = vunpack.c.h.bf16 %v504_v19  ;;  %v191_v32 = vsub.f32 %v440_v24, %v539_v1  ;;  %v192_v33 = vsub.f32 %v441_v25, %v539_v1 }
  0x23   :  { %v193_v34 = vsub.f32 %v444_v26, %v539_v1  ;;  %v194_v35 = vsub.f32 %v445_v27, %v539_v1  ;;  %v260_v37 = vmul.f32 %v553_v7, %v189_v28  ;;  %v261_v38 = vmul.f32 %v553_v7, %v190_v29 }
  0x24   :  { %v195_v39 = vsub.f32 %v448_v30, %v539_v1  ;;  %v196_v40 = vsub.f32 %v449_v31, %v539_v1  ;;  %v262_v43 = vmul.f32 %v553_v7, %v191_v32  ;;  %v263_v44 = vmul.f32 %v553_v7, %v192_v33 }
  0x25   :  { %v264_v45 = vmul.f32 %v553_v7, %v193_v34  ;;  %v265_v46 = vmul.f32 %v553_v7, %v194_v35  ;;  %324 = vst [vmem:[%s962_s3 + $0x140] sm:$0xff] %v260_v37  ;;  %325 = vst [vmem:[%s962_s3 + $0x148] sm:$0xff] %v261_v38  ;;  %v452_v50 = vunpack.c.l.bf16 %v505_v36  ;;  %v453_v51 = vunpack.c.h.bf16 %v505_v36 }
  0x26   :  { %v266_v48 = vmul.f32 %v553_v7, %v195_v39  ;;  %v267_v49 = vmul.f32 %v553_v7, %v196_v40  ;;  %326 = vst [vmem:[%s962_s3 + $0x150] sm:$0xff] %v262_v43  ;;  %327 = vst [vmem:[%s962_s3 + $0x158] sm:$0xff] %v263_v44  ;;  %v456_v52 = vunpack.c.l.bf16 %v506_v41  ;;  %v457_v53 = vunpack.c.h.bf16 %v506_v41 }
  0x27   :  { %328 = vst [vmem:[%s962_s3 + $0x160] sm:$0xff] %v264_v45  ;;  %329 = vst [vmem:[%s962_s3 + $0x168] sm:$0xff] %v265_v46  ;;  %v460_v54 = vunpack.c.l.bf16 %v507_v42  ;;  %v461_v55 = vunpack.c.h.bf16 %v507_v42  ;;  %v197_v56 = vsub.f32 %v452_v50, %v539_v1  ;;  %v198_v57 = vsub.f32 %v453_v51, %v539_v1 }
  0x28   :  { %330 = vst [vmem:[%s962_s3 + $0x170] sm:$0xff] %v266_v48  ;;  %331 = vst [vmem:[%s962_s3 + $0x178] sm:$0xff] %v267_v49  ;;  %v464_v58 = vunpack.c.l.bf16 %v508_v47  ;;  %v465_v59 = vunpack.c.h.bf16 %v508_v47  ;;  %v199_v60 = vsub.f32 %v456_v52, %v539_v1  ;;  %v200_v61 = vsub.f32 %v457_v53, %v539_v1 }
  0x29   :  { %v201_v62 = vsub.f32 %v460_v54, %v539_v1  ;;  %v202_v63 = vsub.f32 %v461_v55, %v539_v1  ;;  %v268_v2 = vmul.f32 %v553_v7, %v197_v56  ;;  %v269_v3 = vmul.f32 %v553_v7, %v198_v57 }
  0x2a   :  { %v203_v4 = vsub.f32 %v464_v58, %v539_v1  ;;  %v204_v5 = vsub.f32 %v465_v59, %v539_v1  ;;  %v270_v9 = vmul.f32 %v553_v7, %v199_v60  ;;  %v271_v10 = vmul.f32 %v553_v7, %v200_v61 }
  0x2b   :  { %v272_v11 = vmul.f32 %v553_v7, %v201_v62  ;;  %v273_v12 = vmul.f32 %v553_v7, %v202_v63  ;;  %332 = vst [vmem:[%s962_s3 + $0x180] sm:$0xff] %v268_v2  ;;  %333 = vst [vmem:[%s962_s3 + $0x188] sm:$0xff] %v269_v3  ;;  %v468_v16 = vunpack.c.l.bf16 %v509_v0  ;;  %v469_v17 = vunpack.c.h.bf16 %v509_v0 }
  0x2c   :  { %v274_v14 = vmul.f32 %v553_v7, %v203_v4  ;;  %v275_v15 = vmul.f32 %v553_v7, %v204_v5  ;;  %334 = vst [vmem:[%s962_s3 + $0x190] sm:$0xff] %v270_v9  ;;  %335 = vst [vmem:[%s962_s3 + $0x198] sm:$0xff] %v271_v10  ;;  %v472_v18 = vunpack.c.l.bf16 %v510_v6  ;;  %v473_v19 = vunpack.c.h.bf16 %v510_v6 }
  0x2d   :  { %336 = vst [vmem:[%s962_s3 + $0x1a0] sm:$0xff] %v272_v11  ;;  %337 = vst [vmem:[%s962_s3 + $0x1a8] sm:$0xff] %v273_v12  ;;  %v476_v20 = vunpack.c.l.bf16 %v511_v8  ;;  %v477_v21 = vunpack.c.h.bf16 %v511_v8  ;;  %v205_v22 = vsub.f32 %v468_v16, %v539_v1  ;;  %v206_v23 = vsub.f32 %v469_v17, %v539_v1 }
  0x2e   :  { %338 = vst [vmem:[%s962_s3 + $0x1b0] sm:$0xff] %v274_v14  ;;  %339 = vst [vmem:[%s962_s3 + $0x1b8] sm:$0xff] %v275_v15  ;;  %v480_v24 = vunpack.c.l.bf16 %v512_v13  ;;  %v481_v25 = vunpack.c.h.bf16 %v512_v13  ;;  %v207_v26 = vsub.f32 %v472_v18, %v539_v1  ;;  %v208_v27 = vsub.f32 %v473_v19, %v539_v1 }
  0x2f   :  { %v209_v28 = vsub.f32 %v476_v20, %v539_v1  ;;  %v210_v29 = vsub.f32 %v477_v21, %v539_v1  ;;  %v276_v30 = vmul.f32 %v553_v7, %v205_v22  ;;  %v277_v31 = vmul.f32 %v553_v7, %v206_v23 }
  0x30   :  { %v211_v32 = vsub.f32 %v480_v24, %v539_v1  ;;  %v212_v33 = vsub.f32 %v481_v25, %v539_v1  ;;  %v278_v34 = vmul.f32 %v553_v7, %v207_v26  ;;  %v279_v35 = vmul.f32 %v553_v7, %v208_v27 }
  0x31   :  { %v280_v36 = vmul.f32 %v553_v7, %v209_v28  ;;  %v281_v37 = vmul.f32 %v553_v7, %v210_v29  ;;  %340 = vst [vmem:[%s962_s3 + $0x1c0] sm:$0xff] %v276_v30  ;;  %341 = vst [vmem:[%s962_s3 + $0x1c8] sm:$0xff] %v277_v31 }
  0x32   :  { %v282_v38 = vmul.f32 %v553_v7, %v211_v32  ;;  %v283_v1 = vmul.f32 %v553_v7, %v212_v33  ;;  %342 = vst [vmem:[%s962_s3 + $0x1d0] sm:$0xff] %v278_v34  ;;  %343 = vst [vmem:[%s962_s3 + $0x1d8] sm:$0xff] %v279_v35 }
  0x33   :  { %344 = vst [vmem:[%s962_s3 + $0x1e0] sm:$0xff] %v280_v36  ;;  %345 = vst [vmem:[%s962_s3 + $0x1e8] sm:$0xff] %v281_v37 }
  0x34   :  { %346 = vst [vmem:[%s962_s3 + $0x1f0] sm:$0xff] %v282_v38  ;;  %347 = vst [vmem:[%s962_s3 + $0x1f8] sm:$0xff] %v283_v1 }

// kernel: irmlp_forward.3
= control target key start
LH: loop header
LB: loop body
LE: loop exit
PB: predicated region body
PF: predicated region fallthrough
CT: control target
= control target key end

     0   :  { %s2098_s12 = smov 0   ;;  %s4103_s0 = inlined_call_operand.vmem [shape: f32[2,18,18,128], index: 0, kind: input, shape index: {}]   ;;  %s4104_s1 = inlined_call_operand.vmem [shape: f32[3,3,128], index: 1, kind: input, shape index: {}]   ;;  %s4105_s2 = inlined_call_operand.vmem [shape: bf16[2,16,16,128], index: 2, kind: output, shape index: {0}]   ;;  %s4106_s3 = inlined_call_operand.vmem [shape: f32[2,2,128], index: 3, kind: output, shape index: {1}]  }
   0x1 LB: > { %s1601_s13 = sadd.s32 4294967295, %s2076_s12   ;;  %p1605_p0 = scmp.ge.s32.totalorder %s2076_s12, 1  ;;  %s2076_s12 = sphi %s2098_s12, %s14_s12  }
   0x2   : > { %p140_p1 = scmp.lt.s32.totalorder %s2076_s12, 3 }
   0x4   : > { %p141_p2 = pnand %p1605_p0, %p140_p1 }
   0x6   : > { %144 = sbr.rel (%p141_p2) target bundleno = 316 (0x13c), region = 28 }
   0xb   : > { %p168_p3 = scmp.lt.s32.totalorder %s1601_s13, 1  ;;  %v218_v0 = vlaneseq  ;;  %v183_v3 = vld [vmem:[%s4104_s1 + $0x4] sm:$0x7]  ;;  %v182_v5 = vld [vmem:[%s4104_s1] sm:$0x7] }
   0xc   : > { %v184_v7 = vld [vmem:[%s4104_s1 + $0x8] sm:$0x7] }
   0xd   : > { %s4632_s13 = smov (!%p168_p3, %s1601_s13), 1  ;;  %v219_v1 = vshrl.u32 %v218_v0, 7 }
   0xe   : > { %s1964_s14 = smul.u32 432, %s4632_s13  ;;  %s1836_s26 = sshll.u32 %s4632_s13, 7 }
   0xf   : > { %v220_v2 = vsub.s32 1, %v219_v1  ;;  %v288_v4 = vsub.s32 0, %v219_v1  ;;  %v2120_v6 = vsub.s32 2, %v219_v1  ;;  %s3964_s29 = scalar_lea.vmem %s4105_s2, %s1836_s26  ;;  %s1609_s30 = sshll.u32 %s4632_s13, 1 }
  0x10   : > { %s2115_s19 = scalar_lea.vmem %s4103_s0, %s1964_s14  ;;  %s181_s6 = scalar_lea.vmem %s4106_s3, %s1609_s30 }
  0x11   : > { %4253 = vst [vmem:[#allocation2_spill] sm:$0xff] %v2120_v6  ;;  %v2125_v8 = vrot.slane %v183_v3, %v220_v2  ;;  %v1610_v9 = vld [vmem:[%s2115_s19 + $0x19] sm:$0xff]  ;;  %v1611_v10 = vld [vmem:[%s2115_s19 + $0x21] sm:$0xff]  ;;  %v1612_v11 = vld [vmem:[%s2115_s19 + $0x31] sm:$0xff]  ;;  %v2133_v15 = vrot.slane %v182_v5, %v288_v4  ;;  %v2135_v16 = vrot.slane %v182_v5, %v220_v2  ;;  %v2145_v20 = vrot.slane %v182_v5, %v2120_v6 }
  0x12   : > { %v1613_v12 = vld [vmem:[%s2115_s19 + $0x39] sm:$0xff]  ;;  %v1614_v13 = vld [vmem:[%s2115_s19 + $0x49] sm:$0xff]  ;;  %v1615_v14 = vld [vmem:[%s2115_s19 + $0x51] sm:$0xff]  ;;  %v2147_v21 = vrot.slane %v183_v3, %v288_v4  ;;  %v2150_v22 = vrot.slane %v183_v3, %v2120_v6  ;;  %v2152_v23 = vrot.slane %v184_v7, %v288_v4  ;;  %v2172_v30 = vrot.slane %v184_v7, %v220_v2 }
  0x13   : > { %4254 = vst [vmem:[#allocation3_spill] sm:$0xff] %v2135_v16  ;;  %v1616_v17 = vld [vmem:[%s2115_s19 + $0x61] sm:$0xff]  ;;  %v2139_v18 = vld [vmem:[%s2115_s19 + $0x69] sm:$0xff]  ;;  %v2142_v19 = vld [vmem:[%s2115_s19 + $0x79] sm:$0xff]  ;;  %v2164_v27 = vmul.f32 %v1610_v9, %v2125_v8  ;;  %v2167_v28 = vmul.f32 %v1611_v10, %v2125_v8  ;;  %v2170_v29 = vmul.f32 %v1612_v11, %v2125_v8  ;;  %v2184_v34 = vmul.f32 %v1613_v12, %v2125_v8 }
  0x14   : > { %4255 = vst [vmem:[#allocation4_spill] sm:$0xff] %v2145_v20  ;;  %4256 = vst [vmem:[#allocation5_spill] sm:$0xff] %v2147_v21  ;;  %v2155_v24 = vld [vmem:[%s2115_s19 + $0x81] sm:$0xff]  ;;  %v2158_v25 = vld [vmem:[%s2115_s19 + $0x91] sm:$0xff]  ;;  %v2187_v35 = vmul.f32 %v1614_v13, %v2125_v8  ;;  %v2190_v36 = vmul.f32 %v1615_v14, %v2125_v8  ;;  %v2193_v37 = vmul.f32 %v1610_v9, %v2135_v16 }
  0x15   : > { %4257 = vst [vmem:[#allocation6_spill] sm:$0xff] %v2150_v22  ;;  %4258 = vst [vmem:[#allocation7_spill] sm:$0xff] %v2152_v23  ;;  %v2161_v26 = vld [vmem:[%s2115_s19 + $0x99] sm:$0xff]  ;;  %v2175_v31 = vld [vmem:[%s2115_s19 + $0xa9] sm:$0xff]  ;;  %v2205_v41 = vmul.f32 %v1616_v17, %v2125_v8  ;;  %v2209_v42 = vmul.f32 %v2139_v18, %v2125_v8  ;;  %v2213_v43 = vmul.f32 %v2142_v19, %v2125_v8 }
  0x16   : > { %4259 = vst [vmem:[#allocation8_spill] sm:$0xff] %v2172_v30  ;;  %4260 = vst [vmem:[#allocation9_spill] sm:$0xff] %v2175_v31  ;;  %v2178_v32 = vld [vmem:[%s2115_s19 + $0xb1] sm:$0xff]  ;;  %v2181_v33 = vld [vmem:[%s2115_s19 + $0xc1] sm:$0xff]  ;;  %v2216_v44 = vmul.f32 %v1611_v10, %v2135_v16  ;;  %v2229_v48 = vmul.f32 %v2155_v24, %v2125_v8  ;;  %v2233_v49 = vmul.f32 %v2158_v25, %v2125_v8 }
  0x17   : > { %4261 = vst [vmem:[#allocation10_spill] sm:$0xff] %v2178_v32  ;;  %4262 = vst [vmem:[#allocation11_spill] sm:$0xff] %v2181_v33  ;;  %v2196_v38 = vld [vmem:[%s2115_s19 + $0xc9] sm:$0xff]  ;;  %v2199_v39 = vld [vmem:[%s2115_s19 + $0xd9] sm:$0xff]  ;;  %v2237_v50 = vmul.f32 %v2161_v26, %v2125_v8  ;;  %v2240_v51 = vmul.f32 %v1612_v11, %v2135_v16  ;;  %v2253_v55 = vmul.f32 %v2175_v31, %v2125_v8 }
  0x18   : > { %4263 = vst [vmem:[#allocation12_spill] sm:$0xff] %v2193_v37  ;;  %4264 = vst [vmem:[#allocation13_spill] sm:$0xff] %v2196_v38  ;;  %v2202_v40 = vld [vmem:[%s2115_s19 + $0xe1] sm:$0xff]  ;;  %v2219_v45 = vld [vmem:[%s2115_s19 + $0xf1] sm:$0xff]  ;;  %v2257_v56 = vmul.f32 %v2178_v32, %v2125_v8  ;;  %v2261_v57 = vmul.f32 %v2181_v33, %v2125_v8  ;;  %v2264_v58 = vmul.f32 %v1613_v12, %v2135_v16 }
  0x19   : > { %4265 = vst [vmem:[#allocation14_spill] sm:$0xff] %v2199_v39  ;;  %4266 = vst [vmem:[#allocation15_spill] sm:$0xff] %v2202_v40  ;;  %v2222_v46 = vld [vmem:[%s2115_s19 + $0xf9] sm:$0xff]  ;;  %v2225_v47 = vld [vmem:[%s2115_s19 + $0x109] sm:$0xff]  ;;  %v2277_v62 = vmul.f32 %v2196_v38, %v2125_v8  ;;  %v2281_v63 = vmul.f32 %v2199_v39, %v2125_v8  ;;  %v2285_v0 = vmul.f32 %v2202_v40, %v2125_v8 }
  0x1a   : > { %4267 = vst [vmem:[#allocation16_spill] sm:$0xff] %v2216_v44  ;;  %4268 = vst [vmem:[#allocation17_spill] sm:$0xff] %v2219_v45  ;;  %v2243_v52 = vld [vmem:[%s2115_s19 + $0x111] sm:$0xff]  ;;  %v2246_v53 = vld [vmem:[%s2115_s19 + $0x121] sm:$0xff]  ;;  %v2288_v1 = vmul.f32 %v1614_v13, %v2135_v16  ;;  %v2298_v4 = vmul.f32 %v2219_v45, %v2125_v8  ;;  %v2302_v5 = vmul.f32 %v2222_v46, %v2125_v8 }
  0x1b   : > { %4269 = vst [vmem:[#allocation18_spill] sm:$0xff] %v2222_v46  ;;  %4270 = vst [vmem:[#allocation19_spill] sm:$0xff] %v2225_v47  ;;  %v2249_v54 = vld [vmem:[%s2115_s19 + $0x129] sm:$0xff]  ;;  %v2267_v59 = vld [vmem:[%s2115_s19 + $0x139] sm:$0xff]  ;;  %v2306_v7 = vmul.f32 %v2225_v47, %v2125_v8  ;;  %v2310_v10 = vmul.f32 %v1615_v14, %v2135_v16  ;;  %v2318_v13 = vmul.f32 %v2243_v52, %v2125_v8 }
  0x1c   : > { %4271 = vst [vmem:[#allocation20_spill] sm:$0xff] %v2240_v51  ;;  %4272 = vst [vmem:[#allocation21_spill] sm:$0xff] %v2243_v52  ;;  %v2270_v60 = vld [vmem:[%s2115_s19 + $0x141] sm:$0xff]  ;;  %v2273_v61 = vld [vmem:[%s2115_s19 + $0x151] sm:$0xff]  ;;  %v2322_v6 = vmul.f32 %v2246_v53, %v2125_v8  ;;  %v2326_v30 = vmul.f32 %v2249_v54, %v2125_v8  ;;  %v2330_v23 = vmul.f32 %v1616_v17, %v2135_v16 }
  0x1d   : > { %4273 = vst [vmem:[#allocation22_spill] sm:$0xff] %v2246_v53  ;;  %4274 = vst [vmem:[#allocation23_spill] sm:$0xff] %v2249_v54  ;;  %v2291_v2 = vld [vmem:[%s2115_s19 + $0x159] sm:$0xff]  ;;  %v2294_v3 = vld [vmem:[%s2115_s19 + $0x169] sm:$0xff]  ;;  %v2335_v21 = vmul.f32 %v2267_v59, %v2125_v8  ;;  %v2339_v20 = vmul.f32 %v2270_v60, %v2125_v8 }
  0x1e   : > { %4275 = vst [vmem:[#allocation24_spill] sm:$0xff] %v2264_v58  ;;  %4276 = vst [vmem:[#allocation25_spill] sm:$0xff] %v2267_v59  ;;  %v254_v9 = vld [vmem:[%s2115_s19] sm:$0xff]  ;;  %v2313_v11 = vld [vmem:[%s2115_s19 + $0x171] sm:$0xff]  ;;  %v2357_v58 = vmul.f32 %v2291_v2, %v2125_v8  ;;  %v2361_v51 = vmul.f32 %v2294_v3, %v2125_v8 }
  0x1f   : > { %4277 = vst [vmem:[#allocation26_spill] sm:$0xff] %v2270_v60  ;;  %4278 = vst [vmem:[#allocation27_spill] sm:$0xff] %v2273_v61  ;;  %v1640_v12 = vld [vmem:[%s2115_s19 + $0x181] sm:$0xff]  ;;  %v1641_v22 = vld [vmem:[%s2115_s19 + $0x189] sm:$0xff] }
  0x20   : > { %4279 = vst [vmem:[#allocation28_spill] sm:$0xff] %v2288_v1  ;;  %4280 = vst [vmem:[#allocation29_spill] sm:$0xff] %v2291_v2  ;;  %v255_v14 = vld [vmem:[%s2115_s19 + $0x8] sm:$0xff]  ;;  %v2346_v1 = vld [vmem:[%s2115_s19 + $0x18] sm:$0xff]  ;;  %v2379_v2 = vmul.f32 %v2313_v11, %v2125_v8 }
  0x21   : > { %4281 = vst [vmem:[#allocation30_spill] sm:$0xff] %v2294_v3  ;;  %4282 = vst [vmem:[#allocation31_spill] sm:$0xff] %v2310_v10  ;;  %v2343_v10 = vmul.f32 %v2273_v61, %v2125_v8  ;;  %v2349_v17 = vld [vmem:[%s2115_s19 + $0x20] sm:$0xff]  ;;  %v2364_v44 = vld [vmem:[%s2115_s19 + $0x30] sm:$0xff]  ;;  %v2382_v3 = vmul.f32 %v1640_v12, %v2125_v8  ;;  %v292_v52 = vmul.f32 %v2133_v15, %v2346_v1 }
  0x22   : > { %4283 = vst [vmem:[#allocation32_spill] sm:$0xff] %v2313_v11  ;;  %4284 = vst [vmem:[#allocation33_spill] sm:$0xff] %v2330_v23  ;;  %v2353_v23 = vmul.f32 %v2139_v18, %v2135_v16  ;;  %v2367_v37 = vld [vmem:[%s2115_s19 + $0x38] sm:$0xff]  ;;  %v2370_v61 = vld [vmem:[%s2115_s19 + $0x48] sm:$0xff]  ;;  %v290_v18 = vmul.f32 %v2133_v15, %v254_v9  ;;  %v291_v9 = vmul.f32 %v2133_v15, %v255_v14 }
  0x23   : > { %4285 = vst [vmem:[#allocation34_spill] sm:$0xff] %v2346_v1  ;;  %4286 = vst [vmem:[#allocation35_spill] sm:$0xff] %v2349_v17  ;;  %v2385_v60 = vld [vmem:[%s2115_s19 + $0x50] sm:$0xff]  ;;  %v2388_v59 = vld [vmem:[%s2115_s19 + $0x60] sm:$0xff]  ;;  %v293_v14 = vmul.f32 %v2133_v15, %v2349_v17  ;;  %v294_v47 = vmul.f32 %v2133_v15, %v2364_v44  ;;  %v295_v1 = vmul.f32 %v2133_v15, %v2367_v37 }
  0x24   : > { %4287 = vst [vmem:[#allocation36_spill] sm:$0xff] %v2353_v23  ;;  %4288 = vst [vmem:[#allocation37_spill] sm:$0xff] %v2364_v44  ;;  %v2375_v23 = vmul.f32 %v2142_v19, %v2135_v16  ;;  %v2391_v54 = vld [vmem:[%s2115_s19 + $0x68] sm:$0xff]  ;;  %v2396_v19 = vmul.f32 %v2155_v24, %v2135_v16  ;;  %v2402_v12 = vld [vmem:[%s2115_s19 + $0x78] sm:$0xff]  ;;  %v2416_v24 = vmul.f32 %v2158_v25, %v2135_v16 }
  0x25   : > { %4289 = vst [vmem:[#allocation38_spill] sm:$0xff] %v2367_v37  ;;  %4290 = vst [vmem:[#allocation39_spill] sm:$0xff] %v2370_v61  ;;  %v2405_v11 = vld [vmem:[%s2115_s19 + $0x80] sm:$0xff]  ;;  %v2408_v53 = vld [vmem:[%s2115_s19 + $0x90] sm:$0xff]  ;;  %v296_v17 = vmul.f32 %v2133_v15, %v2370_v61  ;;  %v2435_v25 = vmul.f32 %v2161_v26, %v2135_v16  ;;  %v297_v44 = vmul.f32 %v2133_v15, %v2385_v60 }
  0x26   : > { %4291 = vst [vmem:[#allocation40_spill] sm:$0xff] %v2375_v23  ;;  %4292 = vst [vmem:[#allocation41_spill] sm:$0xff] %v2385_v60  ;;  %v2399_v23 = vmul.f32 %v1641_v22, %v2125_v8  ;;  %v2419_v8 = vld [vmem:[%s2115_s19 + $0x98] sm:$0xff]  ;;  %v2422_v22 = vld [vmem:[%s2115_s19 + $0xa8] sm:$0xff]  ;;  %v298_v37 = vmul.f32 %v2133_v15, %v2388_v59  ;;  %v299_v61 = vmul.f32 %v2133_v15, %v2391_v54 }
  0x27   : > { %4293 = vst [vmem:[#allocation42_spill] sm:$0xff] %v2388_v59  ;;  %4294 = vst [vmem:[#allocation43_spill] sm:$0xff] %v2391_v54  ;;  %v2441_v46 = vld [vmem:[%s2115_s19 + $0xc8] sm:$0xff]  ;;  %v2444_v45 = vld [vmem:[%s2115_s19 + $0xd8] sm:$0xff]  ;;  %v2453_v26 = vadd.f32 %v290_v18, %v2164_v27  ;;  %v300_v60 = vmul.f32 %v2133_v15, %v2402_v12  ;;  %v301_v59 = vmul.f32 %v2133_v15, %v2405_v11 }
  0x28   : > { %4295 = vst [vmem:[#allocation44_spill] sm:$0xff] %v2396_v19  ;;  %4296 = vst [vmem:[#allocation45_spill] sm:$0xff] %v2402_v12  ;;  %v2425_v19 = vld [vmem:[%s2115_s19 + $0xb0] sm:$0xff]  ;;  %v2462_v39 = vld [vmem:[%s2115_s19 + $0xf8] sm:$0xff]  ;;  %v302_v54 = vmul.f32 %v2133_v15, %v2408_v53  ;;  %v2471_v27 = vadd.f32 %v291_v9, %v2167_v28  ;;  %v303_v12 = vmul.f32 %v2133_v15, %v2419_v8 }
  0x29   : > { %4297 = vst [vmem:[#allocation46_spill] sm:$0xff] %v2405_v11  ;;  %4298 = vst [vmem:[#allocation47_spill] sm:$0xff] %v2408_v53  ;;  %v2459_v40 = vld [vmem:[%s2115_s19 + $0xf0] sm:$0xff]  ;;  %v2474_v18 = vld [vmem:[%s2115_s19 + $0x108] sm:$0xff]  ;;  %v304_v11 = vmul.f32 %v2133_v15, %v2422_v22  ;;  %v305_v53 = vmul.f32 %v2133_v15, %v2425_v19  ;;  %v2489_v28 = vadd.f32 %v292_v52, %v2170_v29 }
  0x2a   : > { %4299 = vst [vmem:[#allocation48_spill] sm:$0xff] %v2416_v24  ;;  %4300 = vst [vmem:[#allocation49_spill] sm:$0xff] %v2419_v8  ;;  %v2438_v24 = vld [vmem:[%s2115_s19 + $0xc0] sm:$0xff]  ;;  %v2492_v9 = vld [vmem:[%s2115_s19 + $0x128] sm:$0xff]  ;;  %v307_v8 = vmul.f32 %v2133_v15, %v2441_v46  ;;  %v327_v16 = vadd.f32 %v295_v1, %v2190_v36  ;;  %v329_v1 = vadd.f32 %v297_v44, %v2209_v42 }
  0x2b   : > { %4301 = vst [vmem:[#allocation50_spill] sm:$0xff] %v2422_v22  ;;  %4302 = vst [vmem:[#allocation51_spill] sm:$0xff] %v2425_v19  ;;  %v2480_v38 = vld [vmem:[%s2115_s19 + $0x120] sm:$0xff]  ;;  %v306_v32 = vmul.f32 %v2133_v15, %v2438_v24  ;;  %v308_v22 = vmul.f32 %v2133_v15, %v2444_v45  ;;  %v2507_v19 = vadd.f32 %v293_v14, %v2184_v34  ;;  %v2510_v29 = vld [vmem:[%s2115_s19 + $0x150] sm:$0xff] }
  0x2c   : > { %4303 = vst [vmem:[#allocation52_spill] sm:$0xff] %v2435_v25  ;;  %4304 = vst [vmem:[#allocation53_spill] sm:$0xff] %v2438_v24  ;;  %v2456_v25 = vld [vmem:[%s2115_s19 + $0xe0] sm:$0xff]  ;;  %v2513_v52 = vld [vmem:[%s2115_s19 + $0x158] sm:$0xff]  ;;  %v310_v24 = vmul.f32 %v2133_v15, %v2459_v40  ;;  %v312_v14 = vmul.f32 %v2133_v15, %v2474_v18  ;;  %v337_v42 = vadd.f32 %v305_v53, %v2277_v62 }
  0x2d   : > { %4305 = vst [vmem:[#allocation54_spill] sm:$0xff] %v2441_v46  ;;  %4306 = vst [vmem:[#allocation55_spill] sm:$0xff] %v2444_v45  ;;  %v2498_v33 = vld [vmem:[%s2115_s19 + $0x140] sm:$0xff]  ;;  %v309_v31 = vmul.f32 %v2133_v15, %v2456_v25  ;;  %v311_v46 = vmul.f32 %v2133_v15, %v2462_v39  ;;  %v2525_v45 = vadd.f32 %v294_v47, %v2187_v35  ;;  %v2528_v34 = vld [vmem:[%s2115_s19 + $0x170] sm:$0xff] }
  0x2e   : > { %4307 = vst [vmem:[#allocation56_spill] sm:$0xff] %v2453_v26  ;;  %4308 = vst [vmem:[#allocation57_spill] sm:$0xff] %v2456_v25  ;;  %v2477_v26 = vld [vmem:[%s2115_s19 + $0x110] sm:$0xff]  ;;  %v314_v25 = vmul.f32 %v2133_v15, %v2480_v38  ;;  %v317_v47 = vmul.f32 %v2133_v15, %v2498_v33  ;;  %v339_v44 = vadd.f32 %v307_v8, %v2285_v0  ;;  %v4327_v62 = vld [vmem:[#allocation11_spill] sm:$0xff] }
  0x2f   : > { %4309 = vst [vmem:[#allocation58_spill] sm:$0xff] %v2459_v40  ;;  %4310 = vst [vmem:[#allocation59_spill] sm:$0xff] %v2462_v39  ;;  %v315_v40 = vmul.f32 %v2133_v15, %v2492_v9  ;;  %v328_v39 = vadd.f32 %v296_v17, %v2205_v41  ;;  %v331_v41 = vadd.f32 %v299_v61, %v2229_v48  ;;  %v4326_v61 = vld [vmem:[#allocation10_spill] sm:$0xff]  ;;  %v4328_v0 = vld [vmem:[#allocation13_spill] sm:$0xff] }
  0x30   : > { %4311 = vst [vmem:[#allocation60_spill] sm:$0xff] %v2471_v27  ;;  %4312 = vst [vmem:[#allocation61_spill] sm:$0xff] %v2474_v18  ;;  %v2495_v27 = vld [vmem:[%s2115_s19 + $0x138] sm:$0xff]  ;;  %v318_v18 = vmul.f32 %v2133_v15, %v2510_v29  ;;  %v332_v17 = vadd.f32 %v300_v60, %v2233_v49  ;;  %v342_v48 = vadd.f32 %v310_v24, %v2306_v7 }
  0x31   : > { %4313 = vst [vmem:[#allocation62_spill] sm:$0xff] %v2477_v26  ;;  %4314 = vst [vmem:[#allocation63_spill] sm:$0xff] %v2480_v38  ;;  %v316_v35 = vmul.f32 %v2133_v15, %v2495_v27  ;;  %v343_v49 = vadd.f32 %v311_v46, %v2318_v13  ;;  %v346_v53 = vadd.f32 %v314_v25, %v2335_v21  ;;  %v4324_v21 = vld [vmem:[#allocation3_spill] sm:$0xff]  ;;  %v4331_v7 = vld [vmem:[#allocation17_spill] sm:$0xff] }
  0x32   : > { %4315 = vst [vmem:[#allocation64_spill] sm:$0xff] %v2489_v28  ;;  %4316 = vst [vmem:[#allocation65_spill] sm:$0xff] %v2492_v9  ;;  %v2516_v28 = vld [vmem:[%s2115_s19 + $0x168] sm:$0xff]  ;;  %v321_v9 = vmul.f32 %v2133_v15, %v2528_v34  ;;  %v4334_v24 = vld [vmem:[#allocation21_spill] sm:$0xff] }
  0x33   : > { %4317 = vst [vmem:[#allocation66_spill] sm:$0xff] %v2495_v27  ;;  %4318 = vst [vmem:[#allocation67_spill] sm:$0xff] %v2498_v33  ;;  %v320_v36 = vmul.f32 %v2133_v15, %v2516_v28  ;;  %v330_v27 = vadd.f32 %v298_v37, %v2213_v43  ;;  %v335_v33 = vadd.f32 %v303_v12, %v2257_v56  ;;  %v2808_v38 = vld [vmem:[%s2115_s19 + $0x13a] sm:$0xff] }
  0x34   : > { %4319 = vst [vmem:[#allocation68_spill] sm:$0xff] %v2507_v19  ;;  %4320 = vst [vmem:[#allocation69_spill] sm:$0xff] %v2510_v29  ;;  %v313_v19 = vmul.f32 %v2133_v15, %v2477_v26  ;;  %v319_v26 = vmul.f32 %v2133_v15, %v2513_v52  ;;  %v333_v29 = vadd.f32 %v301_v59, %v2237_v50 }
  0x35   : > { %4321 = vst [vmem:[#allocation70_spill] sm:$0xff] %v2513_v52  ;;  %4322 = vst [vmem:[#allocation71_spill] sm:$0xff] %v2516_v28  ;;  %v334_v52 = vadd.f32 %v302_v54, %v2253_v55  ;;  %v336_v28 = vadd.f32 %v304_v11, %v2261_v57  ;;  %v338_v15 = vadd.f32 %v306_v32, %v2281_v63  ;;  %v354_v54 = vld [vmem:[%s2115_s19 + $0x1] sm:$0xff]  ;;  %v355_v55 = vld [vmem:[%s2115_s19 + $0x9] sm:$0xff] }
  0x36   : > { %4323 = vst [vmem:[#allocation72_spill] sm:$0xff] %v2528_v34  ;;  %v340_v37 = vadd.f32 %v308_v22, %v2298_v4  ;;  %v341_v43 = vadd.f32 %v309_v31, %v2302_v5  ;;  %v344_v50 = vadd.f32 %v312_v14, %v2322_v6  ;;  %v345_v56 = vadd.f32 %v313_v19, %v2326_v30  ;;  %v4330_v4 = vld [vmem:[#allocation15_spill] sm:$0xff]  ;;  %v4332_v11 = vld [vmem:[#allocation18_spill] sm:$0xff] }
  0x37   : > { %v347_v32 = vadd.f32 %v315_v40, %v2339_v20  ;;  %v348_v57 = vadd.f32 %v316_v35, %v2343_v10  ;;  %v2575_v59 = vadd.f32 %v317_v47, %v2357_v58  ;;  %v2578_v31 = vadd.f32 %v318_v18, %v2361_v51  ;;  %v4325_v40 = vld [vmem:[#allocation9_spill] sm:$0xff]  ;;  %v4333_v19 = vld [vmem:[#allocation19_spill] sm:$0xff]  ;;  %v4335_v22 = vld [vmem:[#allocation22_spill] sm:$0xff] }
  0x38   : > { %v2581_v46 = vadd.f32 %v319_v26, %v2379_v2  ;;  %v2584_v6 = vadd.f32 %v320_v36, %v2382_v3  ;;  %v2587_v30 = vadd.f32 %v321_v9, %v2399_v23  ;;  %v390_v60 = vmul.f32 %v4324_v21, %v354_v54  ;;  %v4329_v3 = vld [vmem:[#allocation14_spill] sm:$0xff]  ;;  %v4336_v26 = vld [vmem:[#allocation23_spill] sm:$0xff]  ;;  %v4337_v9 = vld [vmem:[#allocation25_spill] sm:$0xff] }
  0x39   : > { %v391_v20 = vmul.f32 %v4324_v21, %v355_v55  ;;  %v404_v58 = vmul.f32 %v4325_v40, %v4324_v21  ;;  %v405_v51 = vmul.f32 %v4326_v61, %v4324_v21  ;;  %v406_v63 = vmul.f32 %v4327_v62, %v4324_v21  ;;  %v4338_v35 = vld [vmem:[#allocation26_spill] sm:$0xff]  ;;  %v4339_v36 = vld [vmem:[#allocation27_spill] sm:$0xff]  ;;  %v4340_v55 = vld [vmem:[#allocation29_spill] sm:$0xff] }
  0x3a   : > { %v407_v2 = vmul.f32 %v4328_v0, %v4324_v21  ;;  %v408_v23 = vmul.f32 %v4329_v3, %v4324_v21  ;;  %v409_v5 = vmul.f32 %v4330_v4, %v4324_v21  ;;  %v410_v10 = vmul.f32 %v4331_v7, %v4324_v21  ;;  %v4341_v61 = vld [vmem:[#allocation30_spill] sm:$0xff]  ;;  %v4342_v0 = vld [vmem:[#allocation32_spill] sm:$0xff] }
  0x3b   : > { %v411_v13 = vmul.f32 %v4332_v11, %v4324_v21  ;;  %v412_v12 = vmul.f32 %v4333_v19, %v4324_v21  ;;  %v413_v8 = vmul.f32 %v4334_v24, %v4324_v21  ;;  %v414_v25 = vmul.f32 %v4335_v22, %v4324_v21  ;;  %v4343_v4 = vld [vmem:[#allocation56_spill] sm:$0xff] }
  0x3c   : > { %v415_v18 = vmul.f32 %v4336_v26, %v4324_v21  ;;  %v416_v14 = vmul.f32 %v4337_v9, %v4324_v21  ;;  %v417_v47 = vmul.f32 %v4338_v35, %v4324_v21  ;;  %v418_v54 = vmul.f32 %v4339_v36, %v4324_v21  ;;  %v4344_v11 = vld [vmem:[#allocation60_spill] sm:$0xff] }
  0x3d   : > { %v419_v40 = vmul.f32 %v4340_v55, %v4324_v21  ;;  %v420_v62 = vmul.f32 %v4341_v61, %v4324_v21  ;;  %v421_v3 = vmul.f32 %v4342_v0, %v4324_v21  ;;  %v2628_v7 = vadd.f32 %v390_v60, %v4343_v4  ;;  %v4345_v24 = vld [vmem:[#allocation64_spill] sm:$0xff] }
  0x3e   : > { %v2631_v19 = vadd.f32 %v391_v20, %v4344_v11  ;;  %v4346_v22 = vld [vmem:[#allocation12_spill] sm:$0xff]  ;;  %v4352_v20 = vld [vmem:[#allocation31_spill] sm:$0xff]  ;;  %v2672_v34 = vadd.f32 %v404_v58, %v336_v28  ;;  %v2694_v58 = vld [vmem:[%s2115_s19 + $0x3a] sm:$0xff] }
  0x3f   : > { %v2635_v26 = vadd.f32 %v4346_v22, %v4345_v24  ;;  %v4347_v9 = vld [vmem:[#allocation68_spill] sm:$0xff]  ;;  %v2652_v11 = vadd.f32 %v4352_v20, %v329_v1  ;;  %v4353_v24 = vld [vmem:[#allocation33_spill] sm:$0xff]  ;;  %4362 = vst [vmem:[#allocation11_spill] sm:$0xff] %v2694_v58 }
  0x40   : > { %v4348_v35 = vld [vmem:[#allocation16_spill] sm:$0xff]  ;;  %v2655_v22 = vadd.f32 %v4353_v24, %v330_v27  ;;  %v454_v27 = vld [vmem:[%s2115_s19 + $0x2] sm:$0xff]  ;;  %v2677_v24 = vld [vmem:[%s2115_s19 + $0x1a] sm:$0xff] }
  0x41   : > { %v2639_v36 = vadd.f32 %v4348_v35, %v4347_v9  ;;  %v4349_v55 = vld [vmem:[#allocation20_spill] sm:$0xff]  ;;  %4359 = vst [vmem:[#allocation3_spill] sm:$0xff] %v2677_v24 }
  0x42   : > { %v2643_v21 = vadd.f32 %v4349_v55, %v2525_v45  ;;  %v4350_v61 = vld [vmem:[#allocation24_spill] sm:$0xff] }
  0x43   : > { %v2646_v60 = vadd.f32 %v4350_v61, %v327_v16  ;;  %v4351_v0 = vld [vmem:[#allocation28_spill] sm:$0xff] }
  0x44   : > { %v2649_v4 = vadd.f32 %v4351_v0, %v328_v39  ;;  %v4354_v9 = vld [vmem:[#allocation36_spill] sm:$0xff] }
  0x45   : > { %v2658_v35 = vadd.f32 %v4354_v9, %v331_v41  ;;  %v4355_v45 = vld [vmem:[#allocation40_spill] sm:$0xff]  ;;  %v2681_v9 = vadd.f32 %v406_v63, %v338_v15  ;;  %v2703_v15 = vadd.f32 %v411_v13, %v343_v49  ;;  %v2722_v49 = vadd.f32 %v416_v14, %v348_v57  ;;  %v2746_v57 = vld [vmem:[%s2115_s19 + $0x9a] sm:$0xff] }
  0x46   : > { %v2661_v55 = vadd.f32 %v4355_v45, %v332_v17  ;;  %v4356_v16 = vld [vmem:[#allocation44_spill] sm:$0xff]  ;;  %v2679_v17 = vadd.f32 %v405_v51, %v337_v42  ;;  %v2701_v42 = vadd.f32 %v410_v10, %v342_v48  ;;  %v2711_v51 = vld [vmem:[%s2115_s19 + $0x62] sm:$0xff]  ;;  %v2720_v48 = vadd.f32 %v415_v18, %v347_v32  ;;  %4377 = vst [vmem:[#allocation32_spill] sm:$0xff] %v2746_v57 }
  0x47   : > { %v2664_v61 = vadd.f32 %v4356_v16, %v333_v29  ;;  %v4357_v39 = vld [vmem:[#allocation48_spill] sm:$0xff]  ;;  %v2683_v29 = vadd.f32 %v407_v2, %v339_v44  ;;  %v2699_v16 = vadd.f32 %v409_v5, %v341_v43  ;;  %v2705_v44 = vadd.f32 %v412_v12, %v344_v50  ;;  %4365 = vst [vmem:[#allocation15_spill] sm:$0xff] %v2711_v51  ;;  %v2725_v50 = vld [vmem:[%s2115_s19 + $0x7a] sm:$0xff] }
  0x48   : > { %v2667_v0 = vadd.f32 %v4357_v39, %v334_v52  ;;  %v4358_v1 = vld [vmem:[#allocation52_spill] sm:$0xff]  ;;  %v2685_v52 = vadd.f32 %v408_v23, %v340_v37  ;;  %v2716_v2 = vadd.f32 %v413_v8, %v345_v56  ;;  %v2718_v43 = vadd.f32 %v414_v25, %v346_v53  ;;  %4368 = vst [vmem:[#allocation19_spill] sm:$0xff] %v2720_v48  ;;  %v2728_v23 = vld [vmem:[%s2115_s19 + $0x82] sm:$0xff] }
  0x49   : > { %v2670_v20 = vadd.f32 %v4358_v1, %v335_v33  ;;  %v455_v41 = vld [vmem:[%s2115_s19 + $0xa] sm:$0xff]  ;;  %v2688_v33 = vld [vmem:[%s2115_s19 + $0x22] sm:$0xff]  ;;  %v2691_v28 = vld [vmem:[%s2115_s19 + $0x32] sm:$0xff]  ;;  %4369 = vst [vmem:[#allocation21_spill] sm:$0xff] %v2722_v49  ;;  %v2734_v10 = vadd.f32 %v417_v47, %v2575_v59  ;;  %v2737_v56 = vadd.f32 %v418_v54, %v2578_v31  ;;  %v2740_v53 = vadd.f32 %v419_v40, %v2581_v46 }
  0x4a   : > { %4360 = vst [vmem:[#allocation9_spill] sm:$0xff] %v2688_v33  ;;  %4361 = vst [vmem:[#allocation10_spill] sm:$0xff] %v2691_v28  ;;  %v2697_v45 = vld [vmem:[%s2115_s19 + $0x4a] sm:$0xff]  ;;  %v2708_v37 = vld [vmem:[%s2115_s19 + $0x52] sm:$0xff]  ;;  %v2743_v32 = vadd.f32 %v420_v62, %v2584_v6  ;;  %v2755_v59 = vadd.f32 %v421_v3, %v2587_v30 }
  0x4b   : > { %4363 = vst [vmem:[#allocation13_spill] sm:$0xff] %v2697_v45  ;;  %4364 = vst [vmem:[#allocation14_spill] sm:$0xff] %v2708_v37  ;;  %v2714_v63 = vld [vmem:[%s2115_s19 + $0x6a] sm:$0xff]  ;;  %v2731_v5 = vld [vmem:[%s2115_s19 + $0x92] sm:$0xff] }
  0x4c   : > { %4366 = vst [vmem:[#allocation17_spill] sm:$0xff] %v2714_v63  ;;  %4367 = vst [vmem:[#allocation18_spill] sm:$0xff] %v2718_v43  ;;  %v2749_v13 = vld [vmem:[%s2115_s19 + $0xaa] sm:$0xff]  ;;  %v2752_v12 = vld [vmem:[%s2115_s19 + $0xb2] sm:$0xff] }
  0x4d   : > { %4370 = vst [vmem:[#allocation22_spill] sm:$0xff] %v2725_v50  ;;  %4371 = vst [vmem:[#allocation23_spill] sm:$0xff] %v2728_v23  ;;  %v2758_v31 = vld [vmem:[%s2115_s19 + $0xc2] sm:$0xff]  ;;  %v2761_v8 = vld [vmem:[%s2115_s19 + $0xca] sm:$0xff] }
  0x4e   : > { %4372 = vst [vmem:[#allocation25_spill] sm:$0xff] %v2731_v5  ;;  %4373 = vst [vmem:[#allocation26_spill] sm:$0xff] %v2734_v10  ;;  %v2764_v46 = vld [vmem:[%s2115_s19 + $0xda] sm:$0xff]  ;;  %v4384_v6 = vld [vmem:[#allocation4_spill] sm:$0xff] }
  0x4f   : > { %4374 = vst [vmem:[#allocation27_spill] sm:$0xff] %v2737_v56  ;;  %4375 = vst [vmem:[#allocation29_spill] sm:$0xff] %v2740_v53  ;;  %v490_v25 = vmul.f32 %v4384_v6, %v454_v27  ;;  %v491_v18 = vmul.f32 %v4384_v6, %v455_v41  ;;  %v492_v14 = vmul.f32 %v4384_v6, %v2677_v24  ;;  %v2771_v47 = vld [vmem:[%s2115_s19 + $0xe2] sm:$0xff]  ;;  %v2774_v30 = vld [vmem:[%s2115_s19 + $0xf2] sm:$0xff] }
  0x50   : > { %4376 = vst [vmem:[#allocation30_spill] sm:$0xff] %v2743_v32  ;;  %4378 = vst [vmem:[#allocation56_spill] sm:$0xff] %v2749_v13  ;;  %v2777_v54 = vld [vmem:[%s2115_s19 + $0xfa] sm:$0xff]  ;;  %v493_v40 = vmul.f32 %v4384_v6, %v2688_v33  ;;  %v494_v62 = vmul.f32 %v4384_v6, %v2691_v28  ;;  %v495_v3 = vmul.f32 %v4384_v6, %v2694_v58  ;;  %v2788_v1 = vld [vmem:[%s2115_s19 + $0x10a] sm:$0xff] }
  0x51   : > { %4379 = vst [vmem:[#allocation60_spill] sm:$0xff] %v2752_v12  ;;  %4380 = vst [vmem:[#allocation64_spill] sm:$0xff] %v2755_v59  ;;  %v496_v39 = vmul.f32 %v4384_v6, %v2697_v45  ;;  %v2791_v27 = vld [vmem:[%s2115_s19 + $0x112] sm:$0xff]  ;;  %v2794_v41 = vld [vmem:[%s2115_s19 + $0x122] sm:$0xff]  ;;  %v497_v33 = vmul.f32 %v4384_v6, %v2708_v37  ;;  %v498_v28 = vmul.f32 %v4384_v6, %v2711_v51 }
  0x52   : > { %4381 = vst [vmem:[#allocation12_spill] sm:$0xff] %v2758_v31  ;;  %4382 = vst [vmem:[#allocation68_spill] sm:$0xff] %v2761_v8  ;;  %v499_v58 = vmul.f32 %v4384_v6, %v2714_v63  ;;  %v500_v45 = vmul.f32 %v4384_v6, %v2725_v50  ;;  %v2805_v24 = vld [vmem:[%s2115_s19 + $0x12a] sm:$0xff]  ;;  %v2811_v59 = vld [vmem:[%s2115_s19 + $0x142] sm:$0xff]  ;;  %v501_v32 = vmul.f32 %v4384_v6, %v2728_v23 }
  0x53   : > { %4383 = vst [vmem:[#allocation16_spill] sm:$0xff] %v2764_v46  ;;  %4385 = vst [vmem:[#allocation20_spill] sm:$0xff] %v2771_v47  ;;  %v502_v37 = vmul.f32 %v4384_v6, %v2731_v5  ;;  %v503_v51 = vmul.f32 %v4384_v6, %v2746_v57  ;;  %v504_v63 = vmul.f32 %v4384_v6, %v2749_v13  ;;  %v2822_v53 = vld [vmem:[%s2115_s19 + $0x152] sm:$0xff]  ;;  %v2825_v50 = vld [vmem:[%s2115_s19 + $0x15a] sm:$0xff] }
  0x54   : > { %4386 = vst [vmem:[#allocation24_spill] sm:$0xff] %v2774_v30  ;;  %4387 = vst [vmem:[#allocation28_spill] sm:$0xff] %v2777_v54  ;;  %v2828_v56 = vld [vmem:[%s2115_s19 + $0x16a] sm:$0xff]  ;;  %v505_v10 = vmul.f32 %v4384_v6, %v2752_v12  ;;  %v506_v23 = vmul.f32 %v4384_v6, %v2758_v31  ;;  %v507_v5 = vmul.f32 %v4384_v6, %v2761_v8  ;;  %v2839_v49 = vld [vmem:[%s2115_s19 + $0x172] sm:$0xff] }
  0x55   : > { %4388 = vst [vmem:[#allocation31_spill] sm:$0xff] %v2788_v1  ;;  %4389 = vst [vmem:[#allocation33_spill] sm:$0xff] %v2791_v27  ;;  %v508_v57 = vmul.f32 %v4384_v6, %v2764_v46  ;;  %v509_v13 = vmul.f32 %v4384_v6, %v2771_v47  ;;  %v510_v48 = vmul.f32 %v4384_v6, %v2774_v30 }
  0x56   : > { %4390 = vst [vmem:[#allocation36_spill] sm:$0xff] %v2794_v41  ;;  %4391 = vst [vmem:[#allocation40_spill] sm:$0xff] %v2805_v24  ;;  %v511_v12 = vmul.f32 %v4384_v6, %v2777_v54  ;;  %v512_v31 = vmul.f32 %v4384_v6, %v2788_v1  ;;  %v513_v8 = vmul.f32 %v4384_v6, %v2791_v27 }
  0x57   : > { %4392 = vst [vmem:[#allocation44_spill] sm:$0xff] %v2808_v38  ;;  %4393 = vst [vmem:[#allocation48_spill] sm:$0xff] %v2811_v59  ;;  %v514_v46 = vmul.f32 %v4384_v6, %v2794_v41  ;;  %v515_v43 = vmul.f32 %v4384_v6, %v2805_v24  ;;  %v516_v47 = vmul.f32 %v4384_v6, %v2808_v38 }
  0x58   : > { %4394 = vst [vmem:[#allocation52_spill] sm:$0xff] %v2822_v53  ;;  %4395 = vst [vmem:[#allocation4_spill] sm:$0xff] %v2825_v50  ;;  %v517_v30 = vmul.f32 %v4384_v6, %v2811_v59  ;;  %v518_v54 = vmul.f32 %v4384_v6, %v2822_v53  ;;  %v519_v1 = vmul.f32 %v4384_v6, %v2825_v50 }
  0x59   : > { %4396 = vst [vmem:[#allocation73_spill] sm:$0xff] %v2828_v56  ;;  %4397 = vst [vmem:[#allocation74_spill] sm:$0xff] %v2839_v49  ;;  %v520_v27 = vmul.f32 %v4384_v6, %v2828_v56  ;;  %v521_v41 = vmul.f32 %v4384_v6, %v2839_v49  ;;  %v2868_v24 = vadd.f32 %v490_v25, %v2628_v7  ;;  %v4439_v49 = vld [vmem:[#allocation63_spill] sm:$0xff] }
  0x5a   : > { %v2871_v38 = vadd.f32 %v491_v18, %v2631_v19  ;;  %v2874_v59 = vadd.f32 %v492_v14, %v2635_v26  ;;  %v2877_v53 = vadd.f32 %v493_v40, %v2639_v36  ;;  %v2880_v50 = vadd.f32 %v494_v62, %v2643_v21  ;;  %v4420_v18 = vld [vmem:[#allocation41_spill] sm:$0xff] }
  0x5b   : > { %v2883_v56 = vadd.f32 %v495_v3, %v2646_v60  ;;  %v2886_v6 = vadd.f32 %v496_v39, %v2649_v4  ;;  %v2889_v7 = vadd.f32 %v497_v33, %v2652_v11  ;;  %v2892_v19 = vadd.f32 %v498_v28, %v2655_v22  ;;  %v4423_v62 = vld [vmem:[#allocation45_spill] sm:$0xff]  ;;  %v4424_v39 = vld [vmem:[#allocation46_spill] sm:$0xff] }
  0x5c   : > { %v2895_v26 = vadd.f32 %v499_v58, %v2658_v35  ;;  %v2898_v36 = vadd.f32 %v500_v45, %v2661_v55  ;;  %v2901_v21 = vadd.f32 %v501_v32, %v2664_v61  ;;  %v2904_v60 = vadd.f32 %v502_v37, %v2667_v0  ;;  %v4402_v58 = vld [vmem:[#allocation21_spill] sm:$0xff]  ;;  %v4416_v32 = vld [vmem:[#allocation35_spill] sm:$0xff] }
  0x5d   : > { %v2907_v4 = vadd.f32 %v503_v51, %v2670_v20  ;;  %v2910_v11 = vadd.f32 %v504_v63, %v2672_v34  ;;  %v2913_v22 = vadd.f32 %v505_v10, %v2679_v17  ;;  %v2916_v35 = vadd.f32 %v506_v23, %v2681_v9  ;;  %v4410_v63 = vld [vmem:[#allocation30_spill] sm:$0xff] }
  0x5e   : > { %v2919_v55 = vadd.f32 %v507_v5, %v2683_v29  ;;  %v2922_v61 = vadd.f32 %v508_v57, %v2685_v52  ;;  %v2925_v0 = vadd.f32 %v509_v13, %v2699_v16  ;;  %v2928_v20 = vadd.f32 %v510_v48, %v2701_v42  ;;  %v4398_v29 = vld [vmem:[#allocation18_spill] sm:$0xff]  ;;  %v4400_v52 = vld [vmem:[#allocation19_spill] sm:$0xff]  ;;  %v4412_v48 = vld [vmem:[#allocation64_spill] sm:$0xff] }
  0x5f   : > { %v2931_v34 = vadd.f32 %v511_v12, %v2703_v15  ;;  %v2934_v17 = vadd.f32 %v512_v31, %v2705_v44  ;;  %v2937_v9 = vadd.f32 %v513_v8, %v2716_v2  ;;  %v2940_v33 = vadd.f32 %v514_v46, %v4398_v29  ;;  %v4404_v16 = vld [vmem:[#allocation26_spill] sm:$0xff]  ;;  %v4406_v15 = vld [vmem:[#allocation27_spill] sm:$0xff]  ;;  %v4408_v44 = vld [vmem:[#allocation29_spill] sm:$0xff] }
  0x60   : > { %v2943_v28 = vadd.f32 %v515_v43, %v4400_v52  ;;  %v2946_v45 = vadd.f32 %v516_v47, %v4402_v58  ;;  %v2949_v42 = vadd.f32 %v517_v30, %v4404_v16  ;;  %v2952_v37 = vadd.f32 %v518_v54, %v4406_v15  ;;  %v4414_v43 = vld [vmem:[#allocation34_spill] sm:$0xff]  ;;  %v4415_v5 = vld [vmem:[#allocation5_spill] sm:$0xff]  ;;  %v4419_v46 = vld [vmem:[#allocation39_spill] sm:$0xff] }
  0x61   : > { %4399 = vst [vmem:[#allocation18_spill] sm:$0xff] %v2940_v33  ;;  %v2955_v51 = vadd.f32 %v519_v1, %v4408_v44  ;;  %v2958_v2 = vadd.f32 %v520_v27, %v4410_v63  ;;  %v2961_v23 = vadd.f32 %v521_v41, %v4412_v48  ;;  %v590_v10 = vmul.f32 %v4415_v5, %v4414_v43  ;;  %v4417_v13 = vld [vmem:[#allocation37_spill] sm:$0xff]  ;;  %v4418_v31 = vld [vmem:[#allocation38_spill] sm:$0xff]  ;;  %v4422_v54 = vld [vmem:[#allocation43_spill] sm:$0xff] }
  0x62   : > { %4401 = vst [vmem:[#allocation19_spill] sm:$0xff] %v2943_v28  ;;  %4403 = vst [vmem:[#allocation21_spill] sm:$0xff] %v2946_v45  ;;  %v591_v57 = vmul.f32 %v4415_v5, %v4416_v32  ;;  %v592_v12 = vmul.f32 %v4415_v5, %v4417_v13  ;;  %v593_v8 = vmul.f32 %v4415_v5, %v4418_v31  ;;  %v4421_v47 = vld [vmem:[#allocation42_spill] sm:$0xff]  ;;  %v4425_v27 = vld [vmem:[#allocation47_spill] sm:$0xff] }
  0x63   : > { %4405 = vst [vmem:[#allocation26_spill] sm:$0xff] %v2949_v42  ;;  %4407 = vst [vmem:[#allocation27_spill] sm:$0xff] %v2952_v37  ;;  %v594_v25 = vmul.f32 %v4415_v5, %v4419_v46  ;;  %v595_v14 = vmul.f32 %v4415_v5, %v4420_v18  ;;  %v596_v30 = vmul.f32 %v4415_v5, %v4421_v47  ;;  %v4426_v29 = vld [vmem:[#allocation49_spill] sm:$0xff]  ;;  %v4427_v58 = vld [vmem:[#allocation50_spill] sm:$0xff] }
  0x64   : > { %4409 = vst [vmem:[#allocation29_spill] sm:$0xff] %v2955_v51  ;;  %4411 = vst [vmem:[#allocation30_spill] sm:$0xff] %v2958_v2  ;;  %v597_v40 = vmul.f32 %v4415_v5, %v4422_v54  ;;  %v598_v3 = vmul.f32 %v4415_v5, %v4423_v62  ;;  %v599_v1 = vmul.f32 %v4415_v5, %v4424_v39  ;;  %v4428_v15 = vld [vmem:[#allocation51_spill] sm:$0xff]  ;;  %v4429_v63 = vld [vmem:[#allocation53_spill] sm:$0xff] }
  0x65   : > { %4413 = vst [vmem:[#allocation64_spill] sm:$0xff] %v2961_v23  ;;  %v600_v41 = vmul.f32 %v4415_v5, %v4425_v27  ;;  %v601_v52 = vmul.f32 %v4415_v5, %v4426_v29  ;;  %v602_v16 = vmul.f32 %v4415_v5, %v4427_v58  ;;  %v603_v44 = vmul.f32 %v4415_v5, %v4428_v15  ;;  %v2994_v43 = vld [vmem:[%s2115_s19 + $0x180] sm:$0xff]  ;;  %v4432_v62 = vld [vmem:[#allocation55_spill] sm:$0xff]  ;;  %v4433_v54 = vld [vmem:[#allocation57_spill] sm:$0xff] }
  0x66   : > { %v604_v48 = vmul.f32 %v4415_v5, %v4429_v63  ;;  %4430 = vst [vmem:[#allocation34_spill] sm:$0xff] %v2994_v43  ;;  %v4431_v32 = vld [vmem:[#allocation54_spill] sm:$0xff]  ;;  %v606_v27 = vmul.f32 %v4415_v5, %v4432_v62  ;;  %v607_v29 = vmul.f32 %v4415_v5, %v4433_v54  ;;  %v3005_v18 = vld [vmem:[%s2115_s19 + $0x188] sm:$0xff]  ;;  %v4437_v63 = vld [vmem:[#allocation61_spill] sm:$0xff]  ;;  %v612_v62 = vmul.f32 %v4415_v5, %v4439_v49 }
  0x67   : > { %v605_v39 = vmul.f32 %v4415_v5, %v4431_v32  ;;  %v4434_v47 = vld [vmem:[#allocation58_spill] sm:$0xff]  ;;  %4435 = vst [vmem:[#allocation5_spill] sm:$0xff] %v3005_v18  ;;  %v4436_v15 = vld [vmem:[#allocation59_spill] sm:$0xff]  ;;  %v610_v31 = vmul.f32 %v4415_v5, %v4437_v63  ;;  %v4440_v23 = vld [vmem:[#allocation65_spill] sm:$0xff] }
  0x68   : > { %v608_v58 = vmul.f32 %v4415_v5, %v4434_v47  ;;  %v609_v46 = vmul.f32 %v4415_v5, %v4436_v15  ;;  %v4438_v13 = vld [vmem:[#allocation62_spill] sm:$0xff]  ;;  %v613_v54 = vmul.f32 %v4415_v5, %v4440_v23  ;;  %v4442_v51 = vld [vmem:[#allocation67_spill] sm:$0xff]  ;;  %v4443_v42 = vld [vmem:[#allocation69_spill] sm:$0xff]  ;;  %v620_v23 = vmul.f32 %v2994_v43, %v4415_v5 }
  0x69   : > { %v611_v32 = vmul.f32 %v4415_v5, %v4438_v13  ;;  %v4441_v2 = vld [vmem:[#allocation66_spill] sm:$0xff]  ;;  %v615_v37 = vmul.f32 %v4415_v5, %v4442_v51  ;;  %v616_v15 = vmul.f32 %v4415_v5, %v4443_v42  ;;  %v4445_v28 = vld [vmem:[#allocation71_spill] sm:$0xff]  ;;  %v4446_v33 = vld [vmem:[#allocation72_spill] sm:$0xff]  ;;  %v3034_v51 = vadd.f32 %v590_v10, %v2868_v24 }
  0x6a   : > { %v614_v47 = vmul.f32 %v4415_v5, %v4441_v2  ;;  %v4444_v45 = vld [vmem:[#allocation70_spill] sm:$0xff]  ;;  %v618_v13 = vmul.f32 %v4415_v5, %v4445_v28  ;;  %v619_v49 = vmul.f32 %v4415_v5, %v4446_v33  ;;  %v621_v2 = vmul.f32 %v3005_v18, %v4415_v5  ;;  %v4488_v18 = vld [vmem:[#allocation36_spill] sm:$0xff] }
  0x6b   : > { %v617_v63 = vmul.f32 %v4415_v5, %v4444_v45  ;;  %v3037_v42 = vadd.f32 %v591_v57, %v2871_v38  ;;  %v3040_v45 = vadd.f32 %v592_v12, %v2874_v59  ;;  %v3043_v28 = vadd.f32 %v593_v8, %v2877_v53 }
  0x6c   : > { %v3046_v33 = vadd.f32 %v594_v25, %v2880_v50  ;;  %v3049_v43 = vadd.f32 %v595_v14, %v2883_v56  ;;  %v3052_v5 = vadd.f32 %v596_v30, %v2886_v6  ;;  %v3055_v24 = vadd.f32 %v597_v40, %v2889_v7  ;;  %v4461_v14 = vld [vmem:[#allocation64_spill] sm:$0xff]  ;;  %v4464_v30 = vld [vmem:[#allocation6_spill] sm:$0xff]  ;;  %v4465_v40 = vld [vmem:[#allocation9_spill] sm:$0xff] }
  0x6d   : > { %v3058_v38 = vadd.f32 %v598_v3, %v2892_v19  ;;  %v3061_v59 = vadd.f32 %v599_v1, %v2895_v26  ;;  %v3064_v53 = vadd.f32 %v600_v41, %v2898_v36  ;;  %v3067_v50 = vadd.f32 %v601_v52, %v2901_v21  ;;  %v4466_v3 = vld [vmem:[#allocation10_spill] sm:$0xff]  ;;  %v4468_v1 = vld [vmem:[#allocation13_spill] sm:$0xff]  ;;  %v4470_v41 = vld [vmem:[#allocation15_spill] sm:$0xff] }
  0x6e   : > { %v3070_v56 = vadd.f32 %v602_v16, %v2904_v60  ;;  %v3073_v6 = vadd.f32 %v603_v44, %v2907_v4  ;;  %v3076_v7 = vadd.f32 %v604_v48, %v2910_v11  ;;  %v3079_v19 = vadd.f32 %v605_v39, %v2913_v22  ;;  %v4467_v39 = vld [vmem:[#allocation11_spill] sm:$0xff]  ;;  %v4471_v52 = vld [vmem:[#allocation17_spill] sm:$0xff]  ;;  %v4472_v16 = vld [vmem:[#allocation22_spill] sm:$0xff] }
  0x6f   : > { %v3082_v26 = vadd.f32 %v606_v27, %v2916_v35  ;;  %v3085_v36 = vadd.f32 %v607_v29, %v2919_v55  ;;  %v3088_v21 = vadd.f32 %v608_v58, %v2922_v61  ;;  %v3091_v60 = vadd.f32 %v609_v46, %v2925_v0  ;;  %v4447_v55 = vld [vmem:[#allocation18_spill] sm:$0xff]  ;;  %v4449_v61 = vld [vmem:[#allocation19_spill] sm:$0xff]  ;;  %v4451_v0 = vld [vmem:[#allocation21_spill] sm:$0xff] }
  0x70   : > { %v3094_v4 = vadd.f32 %v610_v31, %v2928_v20  ;;  %v3097_v11 = vadd.f32 %v611_v32, %v2931_v34  ;;  %v3100_v22 = vadd.f32 %v612_v62, %v2934_v17  ;;  %v3103_v35 = vadd.f32 %v613_v54, %v2937_v9  ;;  %v4453_v20 = vld [vmem:[#allocation26_spill] sm:$0xff]  ;;  %v4455_v34 = vld [vmem:[#allocation27_spill] sm:$0xff]  ;;  %v4457_v17 = vld [vmem:[#allocation29_spill] sm:$0xff] }
  0x71   : > { %v3106_v10 = vadd.f32 %v614_v47, %v4447_v55  ;;  %v3109_v57 = vadd.f32 %v615_v37, %v4449_v61  ;;  %v3112_v12 = vadd.f32 %v616_v15, %v4451_v0  ;;  %v3115_v31 = vadd.f32 %v617_v63, %v4453_v20  ;;  %v4459_v9 = vld [vmem:[#allocation30_spill] sm:$0xff]  ;;  %v4463_v37 = vld [vmem:[#allocation3_spill] sm:$0xff]  ;;  %v4474_v48 = vld [vmem:[#allocation25_spill] sm:$0xff] }
  0x72   : > { %v3118_v8 = vadd.f32 %v618_v13, %v4455_v34  ;;  %v3121_v46 = vadd.f32 %v619_v49, %v4457_v17  ;;  %v3124_v25 = vadd.f32 %v620_v23, %v4459_v9  ;;  %v3127_v47 = vadd.f32 %v621_v2, %v4461_v14  ;;  %v4469_v27 = vld [vmem:[#allocation14_spill] sm:$0xff]  ;;  %v4473_v44 = vld [vmem:[#allocation23_spill] sm:$0xff]  ;;  %v4475_v55 = vld [vmem:[#allocation32_spill] sm:$0xff] }
  0x73   : > { %4448 = vst [vmem:[#allocation35_spill] sm:$0xff] %v3106_v10  ;;  %4450 = vst [vmem:[#allocation18_spill] sm:$0xff] %v3109_v57  ;;  %v690_v54 = vmul.f32 %v4464_v30, %v4463_v37  ;;  %v691_v62 = vmul.f32 %v4464_v30, %v4465_v40  ;;  %v692_v13 = vmul.f32 %v4464_v30, %v4466_v3  ;;  %v4476_v0 = vld [vmem:[#allocation56_spill] sm:$0xff]  ;;  %v3160_v37 = vld [vmem:[%s2115_s19 + $0x182] sm:$0xff] }
  0x74   : > { %4452 = vst [vmem:[#allocation19_spill] sm:$0xff] %v3112_v12  ;;  %4454 = vst [vmem:[#allocation21_spill] sm:$0xff] %v3115_v31  ;;  %v693_v49 = vmul.f32 %v4464_v30, %v4467_v39  ;;  %v694_v23 = vmul.f32 %v4464_v30, %v4468_v1  ;;  %v695_v2 = vmul.f32 %v4464_v30, %v4469_v27  ;;  %v4477_v34 = vld [vmem:[#allocation60_spill] sm:$0xff]  ;;  %v4487_v3 = vld [vmem:[#allocation33_spill] sm:$0xff] }
  0x75   : > { %4456 = vst [vmem:[#allocation26_spill] sm:$0xff] %v3118_v8  ;;  %4458 = vst [vmem:[#allocation27_spill] sm:$0xff] %v3121_v46  ;;  %v696_v29 = vmul.f32 %v4464_v30, %v4470_v41  ;;  %v697_v58 = vmul.f32 %v4464_v30, %v4471_v52  ;;  %v698_v15 = vmul.f32 %v4464_v30, %v4472_v16  ;;  %v4478_v9 = vld [vmem:[#allocation12_spill] sm:$0xff]  ;;  %v4494_v57 = vld [vmem:[#allocation73_spill] sm:$0xff] }
  0x76   : > { %4460 = vst [vmem:[#allocation29_spill] sm:$0xff] %v3124_v25  ;;  %4462 = vst [vmem:[#allocation30_spill] sm:$0xff] %v3127_v47  ;;  %v699_v63 = vmul.f32 %v4464_v30, %v4473_v44  ;;  %v700_v32 = vmul.f32 %v4464_v30, %v4474_v48  ;;  %v701_v61 = vmul.f32 %v4464_v30, %v4475_v55  ;;  %v4480_v40 = vld [vmem:[#allocation68_spill] sm:$0xff]  ;;  %v4495_v10 = vld [vmem:[#allocation74_spill] sm:$0xff] }
  0x77   : > { %v702_v20 = vmul.f32 %v4464_v30, %v4476_v0  ;;  %v703_v17 = vmul.f32 %v4464_v30, %v4477_v34  ;;  %v704_v14 = vmul.f32 %v4464_v30, %v4478_v9  ;;  %4479 = vst [vmem:[#allocation64_spill] sm:$0xff] %v3160_v37  ;;  %v705_v44 = vmul.f32 %v4464_v30, %v4480_v40  ;;  %v4481_v16 = vld [vmem:[#allocation16_spill] sm:$0xff]  ;;  %v4486_v9 = vld [vmem:[#allocation31_spill] sm:$0xff] }
  0x78   : > { %v706_v48 = vmul.f32 %v4464_v30, %v4481_v16  ;;  %v4482_v52 = vld [vmem:[#allocation20_spill] sm:$0xff]  ;;  %v710_v39 = vmul.f32 %v4464_v30, %v4486_v9  ;;  %v711_v40 = vmul.f32 %v4464_v30, %v4487_v3  ;;  %v712_v16 = vmul.f32 %v4464_v30, %v4488_v18 }
  0x79   : > { %v707_v55 = vmul.f32 %v4464_v30, %v4482_v52  ;;  %v4483_v41 = vld [vmem:[#allocation24_spill] sm:$0xff]  ;;  %v718_v3 = vmul.f32 %v4464_v30, %v4494_v57  ;;  %v719_v18 = vmul.f32 %v4464_v30, %v4495_v10  ;;  %v3209_v57 = vadd.f32 %v693_v49, %v3043_v28 }
  0x7a   : > { %v708_v0 = vmul.f32 %v4464_v30, %v4483_v41  ;;  %v3171_v27 = vld [vmem:[%s2115_s19 + $0x18a] sm:$0xff]  ;;  %v3212_v10 = vadd.f32 %v694_v23, %v3046_v33  ;;  %v3230_v28 = vadd.f32 %v700_v32, %v3064_v53  ;;  %v3233_v33 = vadd.f32 %v701_v61, %v3067_v50  ;;  %v4520_v32 = vld [vmem:[#allocation45_spill] sm:$0xff]  ;;  %v4521_v61 = vld [vmem:[#allocation46_spill] sm:$0xff] }
  0x7b   : > { %4484 = vst [vmem:[#allocation3_spill] sm:$0xff] %v3171_v27  ;;  %v4485_v34 = vld [vmem:[#allocation28_spill] sm:$0xff]  ;;  %v3251_v53 = vadd.f32 %v707_v55, %v3085_v36  ;;  %v4497_v36 = vld [vmem:[#allocation35_spill] sm:$0xff] }
  0x7c   : > { %v709_v1 = vmul.f32 %v4464_v30, %v4485_v34  ;;  %v4489_v47 = vld [vmem:[#allocation40_spill] sm:$0xff]  ;;  %v3254_v50 = vadd.f32 %v708_v0, %v3088_v21  ;;  %v4499_v21 = vld [vmem:[#allocation18_spill] sm:$0xff] }
  0x7d   : > { %v713_v52 = vmul.f32 %v4464_v30, %v4489_v47  ;;  %v4490_v25 = vld [vmem:[#allocation44_spill] sm:$0xff]  ;;  %v720_v47 = vmul.f32 %v3160_v37, %v4464_v30  ;;  %v3215_v37 = vadd.f32 %v695_v2, %v3049_v43  ;;  %v3236_v43 = vadd.f32 %v702_v20, %v3070_v56  ;;  %v4511_v2 = vld [vmem:[#allocation30_spill] sm:$0xff]  ;;  %v4522_v20 = vld [vmem:[#allocation47_spill] sm:$0xff] }
  0x7e   : > { %v714_v41 = vmul.f32 %v4464_v30, %v4490_v25  ;;  %v4491_v46 = vld [vmem:[#allocation48_spill] sm:$0xff]  ;;  %v721_v25 = vmul.f32 %v3171_v27, %v4464_v30  ;;  %v3257_v56 = vadd.f32 %v709_v1, %v3091_v60  ;;  %v4501_v60 = vld [vmem:[#allocation19_spill] sm:$0xff] }
  0x7f   : > { %v715_v8 = vmul.f32 %v4464_v30, %v4491_v46  ;;  %v4492_v31 = vld [vmem:[#allocation52_spill] sm:$0xff]  ;;  %v3200_v46 = vadd.f32 %v690_v54, %v3034_v51  ;;  %v3221_v51 = vadd.f32 %v697_v58, %v3055_v24  ;;  %v3242_v24 = vadd.f32 %v704_v14, %v3076_v7  ;;  %v4515_v58 = vld [vmem:[#allocation38_spill] sm:$0xff] }
  0x80   : > { %v716_v34 = vmul.f32 %v4464_v30, %v4492_v31  ;;  %v4493_v12 = vld [vmem:[#allocation4_spill] sm:$0xff]  ;;  %v3203_v31 = vadd.f32 %v691_v62, %v3037_v42  ;;  %v3224_v42 = vadd.f32 %v698_v15, %v3058_v38  ;;  %v3245_v38 = vadd.f32 %v705_v44, %v3079_v19  ;;  %v4516_v15 = vld [vmem:[#allocation39_spill] sm:$0xff]  ;;  %v4517_v44 = vld [vmem:[#allocation41_spill] sm:$0xff] }
  0x81   : > { %v717_v9 = vmul.f32 %v4464_v30, %v4493_v12  ;;  %v3206_v12 = vadd.f32 %v692_v13, %v3040_v45  ;;  %v3218_v30 = vadd.f32 %v696_v29, %v3052_v5  ;;  %v3227_v45 = vadd.f32 %v699_v63, %v3061_v59  ;;  %v4514_v29 = vld [vmem:[#allocation7_spill] sm:$0xff]  ;;  %v4518_v63 = vld [vmem:[#allocation42_spill] sm:$0xff] }
  0x82   : > { %v3239_v5 = vadd.f32 %v703_v17, %v3073_v6  ;;  %v3248_v59 = vadd.f32 %v706_v48, %v3082_v26  ;;  %v3260_v6 = vadd.f32 %v710_v39, %v3094_v4  ;;  %v3263_v7 = vadd.f32 %v711_v40, %v3097_v11  ;;  %v4503_v4 = vld [vmem:[#allocation21_spill] sm:$0xff]  ;;  %v4505_v11 = vld [vmem:[#allocation26_spill] sm:$0xff]  ;;  %v4519_v48 = vld [vmem:[#allocation43_spill] sm:$0xff] }
  0x83   : > { %v3266_v19 = vadd.f32 %v712_v16, %v3100_v22  ;;  %v3269_v26 = vadd.f32 %v713_v52, %v3103_v35  ;;  %v3272_v54 = vadd.f32 %v714_v41, %v4497_v36  ;;  %v3275_v62 = vadd.f32 %v715_v8, %v4499_v21  ;;  %v4507_v22 = vld [vmem:[#allocation27_spill] sm:$0xff]  ;;  %v4509_v35 = vld [vmem:[#allocation29_spill] sm:$0xff]  ;;  %v4524_v14 = vld [vmem:[#allocation50_spill] sm:$0xff] }
  0x84   : > { %v3278_v13 = vadd.f32 %v716_v34, %v4501_v60  ;;  %v3281_v39 = vadd.f32 %v717_v9, %v4503_v4  ;;  %v3284_v49 = vadd.f32 %v718_v3, %v4505_v11  ;;  %v3287_v1 = vadd.f32 %v719_v18, %v4507_v22  ;;  %v4513_v8 = vld [vmem:[#allocation37_spill] sm:$0xff]  ;;  %v4525_v36 = vld [vmem:[#allocation51_spill] sm:$0xff]  ;;  %v4527_v11 = vld [vmem:[#allocation54_spill] sm:$0xff] }
  0x85   : > { %4496 = vst [vmem:[#allocation6_spill] sm:$0xff] %v3269_v26  ;;  %4498 = vst [vmem:[#allocation9_spill] sm:$0xff] %v3272_v54  ;;  %v3290_v23 = vadd.f32 %v720_v47, %v4509_v35  ;;  %v3293_v41 = vadd.f32 %v721_v25, %v4511_v2  ;;  %v791_v52 = vmul.f32 %v4514_v29, %v4513_v8  ;;  %v4523_v17 = vld [vmem:[#allocation49_spill] sm:$0xff]  ;;  %v4528_v35 = vld [vmem:[#allocation55_spill] sm:$0xff] }
  0x86   : > { %4500 = vst [vmem:[#allocation35_spill] sm:$0xff] %v3275_v62  ;;  %4502 = vst [vmem:[#allocation18_spill] sm:$0xff] %v3278_v13  ;;  %v792_v16 = vmul.f32 %v4514_v29, %v4515_v58  ;;  %v793_v3 = vmul.f32 %v4514_v29, %v4516_v15  ;;  %v794_v18 = vmul.f32 %v4514_v29, %v4517_v44  ;;  %v4526_v60 = vld [vmem:[#allocation53_spill] sm:$0xff]  ;;  %v4530_v44 = vld [vmem:[#allocation58_spill] sm:$0xff] }
  0x87   : > { %4504 = vst [vmem:[#allocation19_spill] sm:$0xff] %v3281_v39  ;;  %4506 = vst [vmem:[#allocation21_spill] sm:$0xff] %v3284_v49  ;;  %v795_v47 = vmul.f32 %v4514_v29, %v4518_v63  ;;  %v796_v25 = vmul.f32 %v4514_v29, %v4519_v48  ;;  %v797_v55 = vmul.f32 %v4514_v29, %v4520_v32  ;;  %v1736_v8 = vld [vmem:[%s2115_s19 + $0x198] sm:$0xff]  ;;  %v4531_v48 = vld [vmem:[#allocation59_spill] sm:$0xff] }
  0x88   : > { %4508 = vst [vmem:[#allocation26_spill] sm:$0xff] %v3287_v1  ;;  %4510 = vst [vmem:[#allocation27_spill] sm:$0xff] %v3290_v23  ;;  %v798_v0 = vmul.f32 %v4514_v29, %v4521_v61  ;;  %v799_v34 = vmul.f32 %v4514_v29, %v4522_v20  ;;  %v800_v9 = vmul.f32 %v4514_v29, %v4523_v17  ;;  %v4529_v58 = vld [vmem:[#allocation57_spill] sm:$0xff]  ;;  %v1737_v17 = vld [vmem:[%s2115_s19 + $0x1a0] sm:$0xff] }
  0x89   : > { %4512 = vst [vmem:[#allocation29_spill] sm:$0xff] %v3293_v41  ;;  %v801_v40 = vmul.f32 %v4514_v29, %v4524_v14  ;;  %v802_v21 = vmul.f32 %v4514_v29, %v4525_v36  ;;  %v803_v4 = vmul.f32 %v4514_v29, %v4526_v60  ;;  %v804_v22 = vmul.f32 %v4514_v29, %v4527_v11  ;;  %v4532_v61 = vld [vmem:[#allocation61_spill] sm:$0xff]  ;;  %v4533_v14 = vld [vmem:[#allocation62_spill] sm:$0xff]  ;;  %v4534_v60 = vld [vmem:[#allocation63_spill] sm:$0xff] }
  0x8a   : > { %v805_v2 = vmul.f32 %v4514_v29, %v4528_v35  ;;  %v806_v15 = vmul.f32 %v4514_v29, %v4529_v58  ;;  %v807_v63 = vmul.f32 %v4514_v29, %v4530_v44  ;;  %v808_v32 = vmul.f32 %v4514_v29, %v4531_v48  ;;  %v4535_v35 = vld [vmem:[#allocation65_spill] sm:$0xff]  ;;  %v4536_v58 = vld [vmem:[#allocation66_spill] sm:$0xff]  ;;  %v4537_v44 = vld [vmem:[#allocation67_spill] sm:$0xff] }
  0x8b   : > { %v809_v20 = vmul.f32 %v4514_v29, %v4532_v61  ;;  %v810_v36 = vmul.f32 %v4514_v29, %v4533_v14  ;;  %v811_v11 = vmul.f32 %v4514_v29, %v4534_v60  ;;  %v812_v27 = vmul.f32 %v4514_v29, %v4535_v35  ;;  %v4538_v48 = vld [vmem:[#allocation69_spill] sm:$0xff]  ;;  %v4539_v61 = vld [vmem:[#allocation70_spill] sm:$0xff]  ;;  %v4540_v39 = vld [vmem:[#allocation71_spill] sm:$0xff] }
  0x8c   : > { %v813_v41 = vmul.f32 %v4514_v29, %v4536_v58  ;;  %v814_v23 = vmul.f32 %v4514_v29, %v4537_v44  ;;  %v815_v1 = vmul.f32 %v4514_v29, %v4538_v48  ;;  %v816_v49 = vmul.f32 %v4514_v29, %v4539_v61  ;;  %v4541_v13 = vld [vmem:[#allocation72_spill] sm:$0xff]  ;;  %v4542_v35 = vld [vmem:[#allocation34_spill] sm:$0xff]  ;;  %v4543_v58 = vld [vmem:[#allocation5_spill] sm:$0xff] }
  0x8d   : > { %v817_v14 = vmul.f32 %v4514_v29, %v4540_v39  ;;  %v818_v60 = vmul.f32 %v4514_v29, %v4541_v13  ;;  %v819_v62 = vmul.f32 %v4542_v35, %v4514_v29  ;;  %v820_v54 = vmul.f32 %v4543_v58, %v4514_v29  ;;  %v1756_v58 = vld [vmem:[%s2115_s19 + $0x109] sm:$0xff] }
  0x8e   : > { %v821_v44 = vmul.f32 %v1736_v8, %v4514_v29  ;;  %v822_v26 = vmul.f32 %v1737_v17, %v4514_v29  ;;  %v3360_v48 = vadd.f32 %v791_v52, %v3200_v46  ;;  %v3363_v39 = vadd.f32 %v792_v16, %v3203_v31  ;;  %v1738_v52 = vld [vmem:[%s2115_s19 + $0x31] sm:$0xff]  ;;  %v1740_v16 = vld [vmem:[%s2115_s19 + $0x49] sm:$0xff]  ;;  %v1753_v17 = vld [vmem:[%s2115_s19 + $0xe1] sm:$0xff] }
  0x8f   : > { %v3366_v13 = vadd.f32 %v793_v3, %v3206_v12  ;;  %v3369_v61 = vadd.f32 %v794_v18, %v3209_v57  ;;  %v3372_v35 = vadd.f32 %v795_v47, %v3212_v10  ;;  %v3375_v29 = vadd.f32 %v796_v25, %v3215_v37  ;;  %v1742_v3 = vld [vmem:[%s2115_s19 + $0x61] sm:$0xff]  ;;  %v1743_v18 = vld [vmem:[%s2115_s19 + $0x69] sm:$0xff]  ;;  %v1744_v47 = vld [vmem:[%s2115_s19 + $0x79] sm:$0xff] }
  0x90   : > { %v3378_v46 = vadd.f32 %v797_v55, %v3218_v30  ;;  %v3381_v31 = vadd.f32 %v798_v0, %v3221_v51  ;;  %v3384_v12 = vadd.f32 %v799_v34, %v3224_v42  ;;  %v3387_v57 = vadd.f32 %v800_v9, %v3227_v45  ;;  %v1739_v45 = vld [vmem:[%s2115_s19 + $0x39] sm:$0xff]  ;;  %v1746_v55 = vld [vmem:[%s2115_s19 + $0x91] sm:$0xff] }
  0x91   : > { %v3390_v10 = vadd.f32 %v801_v40, %v3230_v28  ;;  %v3393_v37 = vadd.f32 %v802_v21, %v3233_v33  ;;  %v3396_v30 = vadd.f32 %v803_v4, %v3236_v43  ;;  %v3399_v51 = vadd.f32 %v804_v22, %v3239_v5  ;;  %v1747_v0 = vld [vmem:[%s2115_s19 + $0x99] sm:$0xff]  ;;  %v4550_v40 = vld [vmem:[#allocation35_spill] sm:$0xff]  ;;  %v1749_v21 = vld [vmem:[%s2115_s19 + $0xb1] sm:$0xff] }
  0x92   : > { %v3402_v42 = vadd.f32 %v805_v2, %v3242_v24  ;;  %v3408_v28 = vadd.f32 %v806_v15, %v3245_v38  ;;  %v3411_v33 = vadd.f32 %v807_v63, %v3248_v59  ;;  %v3414_v43 = vadd.f32 %v808_v32, %v3251_v53  ;;  %v1741_v24 = vld [vmem:[%s2115_s19 + $0x51] sm:$0xff]  ;;  %v4546_v34 = vld [vmem:[#allocation6_spill] sm:$0xff]  ;;  %v4554_v22 = vld [vmem:[#allocation19_spill] sm:$0xff] }
  0x93   : > { %v3417_v5 = vadd.f32 %v809_v20, %v3254_v50  ;;  %v3424_v25 = vadd.f32 %v810_v36, %v3257_v56  ;;  %v3427_v38 = vadd.f32 %v811_v11, %v3260_v6  ;;  %v3430_v59 = vadd.f32 %v812_v27, %v3263_v7  ;;  %v1745_v50 = vld [vmem:[%s2115_s19 + $0x81] sm:$0xff]  ;;  %v4548_v56 = vld [vmem:[#allocation9_spill] sm:$0xff]  ;;  %v1751_v32 = vld [vmem:[%s2115_s19 + $0xc9] sm:$0xff] }
  0x94   : > { %v3433_v53 = vadd.f32 %v813_v41, %v3266_v19  ;;  %v3439_v9 = vadd.f32 %v814_v23, %v4546_v34  ;;  %v3442_v6 = vadd.f32 %v815_v1, %v4548_v56  ;;  %v3445_v27 = vadd.f32 %v816_v49, %v4550_v40  ;;  %v4552_v7 = vld [vmem:[#allocation18_spill] sm:$0xff]  ;;  %v1748_v41 = vld [vmem:[%s2115_s19 + $0xa9] sm:$0xff]  ;;  %v4556_v23 = vld [vmem:[#allocation21_spill] sm:$0xff] }
  0x95   : > { %4544 = vst [vmem:[#allocation30_spill] sm:$0xff] %v3430_v59  ;;  %v3448_v19 = vadd.f32 %v817_v14, %v4552_v7  ;;  %v1750_v4 = vld [vmem:[%s2115_s19 + $0xc1] sm:$0xff]  ;;  %v3454_v2 = vadd.f32 %v818_v60, %v4554_v22  ;;  %v3457_v8 = vadd.f32 %v819_v62, %v4556_v23  ;;  %v1752_v20 = vld [vmem:[%s2115_s19 + $0xd9] sm:$0xff]  ;;  %v1754_v14 = vld [vmem:[%s2115_s19 + $0xf1] sm:$0xff] }
  0x96   : > { %4545 = vst [vmem:[#allocation37_spill] sm:$0xff] %v3433_v53  ;;  %4547 = vst [vmem:[#allocation7_spill] sm:$0xff] %v3439_v9  ;;  %v4558_v1 = vld [vmem:[#allocation26_spill] sm:$0xff]  ;;  %v4560_v49 = vld [vmem:[#allocation27_spill] sm:$0xff] }
  0x97   : > { %4549 = vst [vmem:[#allocation38_spill] sm:$0xff] %v3442_v6  ;;  %4551 = vst [vmem:[#allocation39_spill] sm:$0xff] %v3445_v27  ;;  %v3460_v15 = vadd.f32 %v820_v54, %v4558_v1  ;;  %v3463_v63 = vadd.f32 %v821_v44, %v4560_v49  ;;  %v4562_v36 = vld [vmem:[#allocation29_spill] sm:$0xff]  ;;  %v4564_v62 = vld [vmem:[#allocation8_spill] sm:$0xff] }
  0x98   : > { %4553 = vst [vmem:[#allocation41_spill] sm:$0xff] %v3448_v19  ;;  %4555 = vst [vmem:[#allocation42_spill] sm:$0xff] %v3454_v2  ;;  %v3469_v11 = vadd.f32 %v822_v26, %v4562_v36  ;;  %v1755_v60 = vld [vmem:[%s2115_s19 + $0xf9] sm:$0xff]  ;;  %v891_v34 = vmul.f32 %v1738_v52, %v4564_v62  ;;  %v892_v54 = vmul.f32 %v1739_v45, %v4564_v62  ;;  %v1757_v56 = vld [vmem:[%s2115_s19 + $0x111] sm:$0xff] }
  0x99   : > { %4557 = vst [vmem:[#allocation43_spill] sm:$0xff] %v3457_v8  ;;  %4559 = vst [vmem:[#allocation45_spill] sm:$0xff] %v3460_v15  ;;  %v893_v44 = vmul.f32 %v1740_v16, %v4564_v62  ;;  %v1758_v40 = vld [vmem:[%s2115_s19 + $0x121] sm:$0xff]  ;;  %v1759_v7 = vld [vmem:[%s2115_s19 + $0x129] sm:$0xff]  ;;  %v894_v22 = vmul.f32 %v1741_v24, %v4564_v62  ;;  %v895_v26 = vmul.f32 %v1742_v3, %v4564_v62 }
  0x9a   : > { %4561 = vst [vmem:[#allocation46_spill] sm:$0xff] %v3463_v63  ;;  %4563 = vst [vmem:[#allocation47_spill] sm:$0xff] %v3469_v11  ;;  %v896_v23 = vmul.f32 %v1743_v18, %v4564_v62  ;;  %v897_v1 = vmul.f32 %v1744_v47, %v4564_v62  ;;  %v1760_v52 = vld [vmem:[%s2115_s19 + $0x139] sm:$0xff]  ;;  %v1761_v45 = vld [vmem:[%s2115_s19 + $0x141] sm:$0xff]  ;;  %v898_v16 = vmul.f32 %v1745_v50, %v4564_v62 }
  0x9b   : > { %v1762_v49 = vld [vmem:[%s2115_s19 + $0x151] sm:$0xff]  ;;  %v899_v36 = vmul.f32 %v1746_v55, %v4564_v62  ;;  %v900_v11 = vmul.f32 %v1747_v0, %v4564_v62  ;;  %v901_v24 = vmul.f32 %v1748_v41, %v4564_v62  ;;  %v1763_v3 = vld [vmem:[%s2115_s19 + $0x159] sm:$0xff]  ;;  %v1764_v63 = vld [vmem:[%s2115_s19 + $0x169] sm:$0xff]  ;;  %v902_v15 = vmul.f32 %v1749_v21, %v4564_v62 }
  0x9c   : > { %v1765_v18 = vld [vmem:[%s2115_s19 + $0x171] sm:$0xff]  ;;  %v903_v47 = vmul.f32 %v1750_v4, %v4564_v62  ;;  %v904_v8 = vmul.f32 %v1751_v32, %v4564_v62  ;;  %v905_v2 = vmul.f32 %v1752_v20, %v4564_v62  ;;  %v1766_v19 = vld [vmem:[%s2115_s19 + $0x181] sm:$0xff]  ;;  %v1767_v50 = vld [vmem:[%s2115_s19 + $0x189] sm:$0xff]  ;;  %v906_v55 = vmul.f32 %v1753_v17, %v4564_v62 }
  0x9d   : > { %v1768_v27 = vld [vmem:[%s2115_s19 + $0x199] sm:$0xff]  ;;  %v907_v0 = vmul.f32 %v1754_v14, %v4564_v62  ;;  %v908_v41 = vmul.f32 %v1755_v60, %v4564_v62  ;;  %v909_v6 = vmul.f32 %v1756_v58, %v4564_v62  ;;  %v1769_v9 = vld [vmem:[%s2115_s19 + $0x1a1] sm:$0xff]  ;;  %v910_v21 = vmul.f32 %v1757_v56, %v4564_v62 }
  0x9e   : > { %v911_v4 = vmul.f32 %v1758_v40, %v4564_v62  ;;  %v912_v32 = vmul.f32 %v1759_v7, %v4564_v62  ;;  %v913_v20 = vmul.f32 %v1760_v52, %v4564_v62  ;;  %v914_v53 = vmul.f32 %v1761_v45, %v4564_v62 }
  0x9f   : > { %v915_v59 = vmul.f32 %v1762_v49, %v4564_v62  ;;  %v916_v17 = vmul.f32 %v1763_v3, %v4564_v62  ;;  %v917_v14 = vmul.f32 %v1764_v63, %v4564_v62  ;;  %v918_v60 = vmul.f32 %v1765_v18, %v4564_v62 }
  0xa0   : > { %v919_v58 = vmul.f32 %v1766_v19, %v4564_v62  ;;  %v920_v56 = vmul.f32 %v1767_v50, %v4564_v62  ;;  %v921_v40 = vmul.f32 %v1768_v27, %v4564_v62  ;;  %v922_v7 = vmul.f32 %v1769_v9, %v4564_v62  ;;  %v4573_v62 = vld [vmem:[#allocation38_spill] sm:$0xff] }
  0xa1   : > { %v3520_v52 = vadd.f32 %v891_v34, %v3360_v48  ;;  %v3523_v45 = vadd.f32 %v892_v54, %v3363_v39  ;;  %v3526_v49 = vadd.f32 %v893_v44, %v3366_v13  ;;  %v3529_v63 = vadd.f32 %v894_v22, %v3369_v61  ;;  %v4581_v22 = vld [vmem:[#allocation43_spill] sm:$0xff] }
  0xa2   : > { %v3532_v19 = vadd.f32 %v895_v26, %v3372_v35  ;;  %v3535_v3 = vadd.f32 %v896_v23, %v3375_v29  ;;  %v3538_v9 = vadd.f32 %v897_v1, %v3378_v46  ;;  %v3541_v48 = vadd.f32 %v898_v16, %v3381_v31  ;;  %v4583_v23 = vld [vmem:[#allocation45_spill] sm:$0xff] }
  0xa3   : > { %v3544_v39 = vadd.f32 %v899_v36, %v3384_v12  ;;  %v3547_v13 = vadd.f32 %v900_v11, %v3387_v57  ;;  %v3550_v61 = vadd.f32 %v901_v24, %v3390_v10  ;;  %v3553_v35 = vadd.f32 %v902_v15, %v3393_v37  ;;  %v2037_v37 = vld [vmem:[%s4104_s1 + $0x8] sm:$0x7]  ;;  %v4589_v24 = vld [vmem:[#allocation10_spill] sm:$0xff] }
  0xa4   : > { %v3556_v29 = vadd.f32 %v903_v47, %v3396_v30  ;;  %v3559_v46 = vadd.f32 %v904_v8, %v3399_v51  ;;  %v3562_v31 = vadd.f32 %v905_v2, %v3402_v42  ;;  %v3565_v12 = vadd.f32 %v906_v55, %v3408_v28  ;;  %v4565_v30 = vld [vmem:[#allocation2_spill] sm:$0xff]  ;;  %v4571_v15 = vld [vmem:[#allocation7_spill] sm:$0xff]  ;;  %v4591_v55 = vld [vmem:[#allocation13_spill] sm:$0xff] }
  0xa5   : > { %v3568_v57 = vadd.f32 %v907_v0, %v3411_v33  ;;  %v3571_v10 = vadd.f32 %v908_v41, %v3414_v43  ;;  %v990_v27 = vrot.slane %v2037_v37, %v4565_v30  ;;  %v3578_v51 = vadd.f32 %v909_v6, %v3417_v5  ;;  %v4567_v33 = vld [vmem:[#allocation30_spill] sm:$0xff]  ;;  %v4569_v43 = vld [vmem:[#allocation37_spill] sm:$0xff]  ;;  %v4575_v5 = vld [vmem:[#allocation39_spill] sm:$0xff] }
  0xa6   : > { %v3581_v42 = vadd.f32 %v910_v21, %v3424_v25  ;;  %v3584_v28 = vadd.f32 %v911_v4, %v3427_v38  ;;  %v3587_v2 = vadd.f32 %v912_v32, %v4567_v33  ;;  %v3590_v8 = vadd.f32 %v913_v20, %v4569_v43  ;;  %v4577_v25 = vld [vmem:[#allocation41_spill] sm:$0xff]  ;;  %v4579_v38 = vld [vmem:[#allocation42_spill] sm:$0xff]  ;;  %v4590_v47 = vld [vmem:[#allocation11_spill] sm:$0xff] }
  0xa7   : > { %v3593_v11 = vadd.f32 %v914_v53, %v4571_v15  ;;  %v3596_v34 = vadd.f32 %v915_v59, %v4573_v62  ;;  %v3599_v6 = vadd.f32 %v916_v17, %v4575_v5  ;;  %v3602_v54 = vadd.f32 %v917_v14, %v4577_v25  ;;  %v4585_v53 = vld [vmem:[#allocation46_spill] sm:$0xff]  ;;  %v4587_v59 = vld [vmem:[#allocation47_spill] sm:$0xff]  ;;  %v4594_v20 = vld [vmem:[#allocation17_spill] sm:$0xff] }
  0xa8   : > { %4566 = vst [vmem:[#allocation49_spill] sm:$0xff] %v3584_v28  ;;  %4568 = vst [vmem:[#allocation50_spill] sm:$0xff] %v3587_v2  ;;  %v3605_v44 = vadd.f32 %v918_v60, %v4579_v38  ;;  %v3608_v26 = vadd.f32 %v919_v58, %v4581_v22  ;;  %v3611_v1 = vadd.f32 %v920_v56, %v4583_v23  ;;  %v4592_v41 = vld [vmem:[#allocation14_spill] sm:$0xff]  ;;  %v4593_v4 = vld [vmem:[#allocation15_spill] sm:$0xff] }
  0xa9   : > { %4570 = vst [vmem:[#allocation51_spill] sm:$0xff] %v3590_v8  ;;  %4572 = vst [vmem:[#allocation53_spill] sm:$0xff] %v3593_v11  ;;  %v3614_v16 = vadd.f32 %v921_v40, %v4585_v53  ;;  %v3617_v36 = vadd.f32 %v922_v7, %v4587_v59  ;;  %v991_v18 = vmul.f32 %v990_v27, %v4589_v24  ;;  %v4595_v14 = vld [vmem:[#allocation22_spill] sm:$0xff]  ;;  %v4596_v58 = vld [vmem:[#allocation23_spill] sm:$0xff] }
  0xaa   : > { %4574 = vst [vmem:[#allocation54_spill] sm:$0xff] %v3596_v34  ;;  %4576 = vst [vmem:[#allocation55_spill] sm:$0xff] %v3599_v6  ;;  %v992_v50 = vmul.f32 %v990_v27, %v4590_v47  ;;  %v993_v0 = vmul.f32 %v990_v27, %v4591_v55  ;;  %v994_v21 = vmul.f32 %v990_v27, %v4592_v41  ;;  %v4597_v40 = vld [vmem:[#allocation25_spill] sm:$0xff]  ;;  %v4598_v37 = vld [vmem:[#allocation32_spill] sm:$0xff] }
  0xab   : > { %4578 = vst [vmem:[#allocation57_spill] sm:$0xff] %v3602_v54  ;;  %4580 = vst [vmem:[#allocation58_spill] sm:$0xff] %v3605_v44  ;;  %v995_v32 = vmul.f32 %v990_v27, %v4593_v4  ;;  %v996_v17 = vmul.f32 %v990_v27, %v4594_v20  ;;  %v997_v60 = vmul.f32 %v990_v27, %v4595_v14  ;;  %v4599_v33 = vld [vmem:[#allocation56_spill] sm:$0xff]  ;;  %v1800_v20 = vld [vmem:[%s2115_s19 + $0x19a] sm:$0xff] }
  0xac   : > { %4582 = vst [vmem:[#allocation59_spill] sm:$0xff] %v3608_v26  ;;  %4584 = vst [vmem:[#allocation61_spill] sm:$0xff] %v3611_v1  ;;  %v998_v56 = vmul.f32 %v990_v27, %v4596_v58  ;;  %v999_v7 = vmul.f32 %v990_v27, %v4597_v40  ;;  %v1000_v30 = vmul.f32 %v990_v27, %v4598_v37  ;;  %v4600_v15 = vld [vmem:[#allocation60_spill] sm:$0xff]  ;;  %v4607_v14 = vld [vmem:[#allocation31_spill] sm:$0xff] }
  0xad   : > { %4586 = vst [vmem:[#allocation62_spill] sm:$0xff] %v3614_v16  ;;  %4588 = vst [vmem:[#allocation63_spill] sm:$0xff] %v3617_v36  ;;  %v1001_v43 = vmul.f32 %v990_v27, %v4599_v33  ;;  %v1002_v62 = vmul.f32 %v990_v27, %v4600_v15  ;;  %v4601_v5 = vld [vmem:[#allocation12_spill] sm:$0xff]  ;;  %v1009_v58 = vmul.f32 %v990_v27, %v4607_v14  ;;  %v4608_v40 = vld [vmem:[#allocation33_spill] sm:$0xff] }
  0xae   : > { %v1003_v25 = vmul.f32 %v990_v27, %v4601_v5  ;;  %v4602_v38 = vld [vmem:[#allocation68_spill] sm:$0xff]  ;;  %v1010_v37 = vmul.f32 %v990_v27, %v4608_v40  ;;  %v1801_v5 = vld [vmem:[%s2115_s19 + $0x1a2] sm:$0xff]  ;;  %v4615_v6 = vld [vmem:[#allocation73_spill] sm:$0xff]  ;;  %v1024_v28 = vadd.f32 %v992_v50, %v3523_v45 }
  0xaf   : > { %v1004_v22 = vmul.f32 %v990_v27, %v4602_v38  ;;  %v4603_v23 = vld [vmem:[#allocation16_spill] sm:$0xff]  ;;  %v4616_v34 = vld [vmem:[#allocation74_spill] sm:$0xff]  ;;  %v4618_v40 = vld [vmem:[#allocation3_spill] sm:$0xff]  ;;  %v1034_v45 = vadd.f32 %v1002_v62, %v3553_v35  ;;  %v3676_v35 = vadd.f32 %v1009_v58, %v3578_v51 }
  0xb0   : > { %v1005_v53 = vmul.f32 %v990_v27, %v4603_v23  ;;  %v4604_v59 = vld [vmem:[#allocation20_spill] sm:$0xff]  ;;  %v1018_v11 = vmul.f32 %v990_v27, %v4616_v34  ;;  %v1020_v2 = vmul.f32 %v4618_v40, %v990_v27  ;;  %v1029_v34 = vadd.f32 %v997_v60, %v3538_v9  ;;  %v4620_v50 = vld [vmem:[#allocation50_spill] sm:$0xff] }
  0xb1   : > { %v1006_v24 = vmul.f32 %v990_v27, %v4604_v59  ;;  %v4605_v47 = vld [vmem:[#allocation24_spill] sm:$0xff]  ;;  %v1031_v40 = vadd.f32 %v999_v7, %v3544_v39  ;;  %v4624_v60 = vld [vmem:[#allocation55_spill] sm:$0xff] }
  0xb2   : > { %v1007_v55 = vmul.f32 %v990_v27, %v4605_v47  ;;  %v4606_v41 = vld [vmem:[#allocation28_spill] sm:$0xff]  ;;  %v1093_v51 = vmul.f32 0.70710677, %v1029_v34 }
  0xb3   : > { %v1008_v4 = vmul.f32 %v990_v27, %v4606_v41  ;;  %v4609_v33 = vld [vmem:[#allocation36_spill] sm:$0xff]  ;;  %v1017_v41 = vmul.f32 %v990_v27, %v4615_v6  ;;  %v1028_v6 = vadd.f32 %v996_v17, %v3535_v3  ;;  %v1095_v62 = vmul.f32 0.70710677, %v1031_v40 }
  0xb4   : > { %v1011_v36 = vmul.f32 %v990_v27, %v4609_v33  ;;  %v4610_v15 = vld [vmem:[#allocation40_spill] sm:$0xff]  ;;  %v1021_v33 = vmul.f32 %v1800_v20, %v990_v27  ;;  %v1032_v20 = vadd.f32 %v1000_v30, %v3547_v13  ;;  %v3670_v39 = vadd.f32 %v1007_v55, %v3568_v57  ;;  %v4626_v30 = vld [vmem:[#allocation58_spill] sm:$0xff] }
  0xb5   : > { %v1012_v16 = vmul.f32 %v990_v27, %v4610_v15  ;;  %v4611_v1 = vld [vmem:[#allocation44_spill] sm:$0xff]  ;;  %v1023_v15 = vadd.f32 %v991_v18, %v3520_v52  ;;  %v1033_v52 = vadd.f32 %v1001_v43, %v3550_v61  ;;  %v3673_v13 = vadd.f32 %v1008_v4, %v3571_v10  ;;  %v4629_v4 = vld [vmem:[#allocation62_spill] sm:$0xff] }
  0xb6   : > { %v1013_v38 = vmul.f32 %v990_v27, %v4611_v1  ;;  %v4612_v26 = vld [vmem:[#allocation48_spill] sm:$0xff]  ;;  %v1025_v1 = vadd.f32 %v993_v0, %v3526_v49  ;;  %v1035_v49 = vadd.f32 %v1003_v25, %v3556_v29  ;;  %v3679_v29 = vadd.f32 %v1010_v37, %v3581_v42  ;;  %v4621_v0 = vld [vmem:[#allocation51_spill] sm:$0xff]  ;;  %v4623_v42 = vld [vmem:[#allocation54_spill] sm:$0xff] }
  0xb7   : > { %v1014_v23 = vmul.f32 %v990_v27, %v4612_v26  ;;  %v4613_v44 = vld [vmem:[#allocation52_spill] sm:$0xff]  ;;  %v1022_v26 = vmul.f32 %v1801_v5, %v990_v27  ;;  %v1087_v3 = vmul.f32 0.70710677, %v1023_v15  ;;  %v1092_v57 = vmul.f32 0.70710677, %v1028_v6  ;;  %v4627_v25 = vld [vmem:[#allocation59_spill] sm:$0xff] }
  0xb8   : > { %v1015_v59 = vmul.f32 %v990_v27, %v4613_v44  ;;  %v4614_v54 = vld [vmem:[#allocation4_spill] sm:$0xff]  ;;  %v1026_v44 = vadd.f32 %v994_v21, %v3529_v63  ;;  %v1036_v63 = vadd.f32 %v1004_v22, %v3559_v46  ;;  %v1089_v9 = vmul.f32 0.70710677, %v1025_v1  ;;  %v4622_v21 = vld [vmem:[#allocation53_spill] sm:$0xff]  ;;  %v4630_v37 = vld [vmem:[#allocation63_spill] sm:$0xff] }
  0xb9   : > { %v1016_v47 = vmul.f32 %v990_v27, %v4614_v54  ;;  %v4617_v14 = vld [vmem:[#allocation64_spill] sm:$0xff]  ;;  %v1027_v54 = vadd.f32 %v995_v32, %v3532_v19  ;;  %v3666_v19 = vadd.f32 %v1005_v53, %v3562_v31  ;;  %1973 = verf.f32 %v1087_v3  ;;  %v4619_v31 = vld [vmem:[#allocation49_spill] sm:$0xff] }
  0xba   : > { %v1019_v8 = vmul.f32 %v4617_v14, %v990_v27  ;;  %v1030_v14 = vadd.f32 %v998_v56, %v3541_v48  ;;  %v1088_v27 = vmul.f32 0.70710677, %v1024_v28  ;;  %v1038_v48 = vadd.f32 %v1006_v24, %v3565_v12  ;;  %v4628_v53 = vld [vmem:[#allocation61_spill] sm:$0xff] }
  0xbb   : > { %v1090_v61 = vmul.f32 0.70710677, %v1026_v44  ;;  %v1091_v46 = vmul.f32 0.70710677, %v1027_v54  ;;  %v3682_v18 = vadd.f32 %v1011_v36, %v4619_v31  ;;  %v3685_v12 = vadd.f32 %v1012_v16, %v4620_v50  ;;  %v4625_v16 = vld [vmem:[#allocation57_spill] sm:$0xff] }
  0xbc   : > { %1975 = verf.f32 %v1088_v27  ;;  %v3688_v10 = vadd.f32 %v1013_v38, %v4621_v0  ;;  %v3691_v32 = vadd.f32 %v1014_v23, %v4622_v21  ;;  %v3694_v17 = vadd.f32 %v1015_v59, %v4623_v42 }
  0xbd   : > { %1977 = verf.f32 %v1089_v9  ;;  %v3697_v56 = vadd.f32 %v1016_v47, %v4624_v60  ;;  %v1094_v36 = vmul.f32 0.70710677, %v1030_v14  ;;  %v3700_v7 = vadd.f32 %v1017_v41, %v4625_v16 }
  0xbe   : > { %1979 = verf.f32 %v1090_v61  ;;  %v3703_v43 = vadd.f32 %v1018_v11, %v4626_v30  ;;  %v3706_v22 = vadd.f32 %v1019_v8, %v4627_v25  ;;  %v3709_v24 = vadd.f32 %v1020_v2, %v4628_v53 }
  0xbf   : > { %1981 = verf.f32 %v1091_v46  ;;  %v1096_v55 = vmul.f32 0.70710677, %v1032_v20  ;;  %v3712_v58 = vadd.f32 %v1021_v33, %v4629_v4  ;;  %v3715_v5 = vadd.f32 %v1022_v26, %v4630_v37 }
  0xc0   : > { %1983 = verf.f32 %v1092_v57  ;;  %v1097_v38 = vmul.f32 0.70710677, %v1033_v52  ;;  %v3717_v11 = vmul.f32 0.5, %v1023_v15  ;;  %v3719_v23 = vmul.f32 0.5, %v1024_v28 }
  0xc1   : > { %1985 = verf.f32 %v1093_v51  ;;  %v1098_v59 = vmul.f32 0.70710677, %v1034_v45  ;;  %v3721_v8 = vmul.f32 0.5, %v1025_v1  ;;  %v3723_v2 = vmul.f32 0.5, %v1026_v44 }
  0xc2   : > { %1987 = verf.f32 %v1094_v36  ;;  %v1099_v47 = vmul.f32 0.70710677, %v1035_v49  ;;  %v3725_v41 = vmul.f32 0.5, %v1027_v54  ;;  %v3727_v33 = vmul.f32 0.5, %v1028_v6 }
  0xc3   : > { %1989 = verf.f32 %v1095_v62  ;;  %v1100_v26 = vmul.f32 0.70710677, %v1036_v63  ;;  %v3729_v3 = vmul.f32 0.5, %v1029_v34  ;;  %v3731_v15 = vmul.f32 0.5, %v1030_v14 }
  0xc4   : > { %1991 = verf.f32 %v1096_v55  ;;  %v1101_v28 = vmul.f32 0.70710677, %v3666_v19  ;;  %v3734_v27 = vmul.f32 0.5, %v1031_v40  ;;  %v3736_v1 = vmul.f32 0.5, %v1032_v20 }
  0xc5   : > { %1993 = verf.f32 %v1097_v38  ;;  %v1102_v44 = vmul.f32 0.70710677, %v1038_v48  ;;  %v3738_v9 = vmul.f32 0.5, %v1033_v52  ;;  %v3740_v54 = vmul.f32 0.5, %v1034_v45 }
  0xc6   : > { %1995 = verf.f32 %v1098_v59  ;;  %v1103_v6 = vmul.f32 0.70710677, %v3670_v39  ;;  %v1974_v34 = vpop.eup %1973  ;;  %v3743_v61 = vmul.f32 0.5, %v1035_v49  ;;  %v3745_v14 = vmul.f32 0.5, %v1036_v63 }
  0xc7   : > { %1997 = verf.f32 %v1099_v47  ;;  %v1104_v46 = vmul.f32 0.70710677, %v3673_v13  ;;  %v3749_v20 = vmul.f32 0.5, %v3666_v19  ;;  %v3751_v31 = vmul.f32 0.5, %v1038_v48 }
  0xc8   : > { %1999 = verf.f32 %v1100_v26  ;;  %v1105_v52 = vmul.f32 0.70710677, %v3676_v35  ;;  %v3755_v50 = vmul.f32 0.5, %v3670_v39  ;;  %v3758_v49 = vmul.f32 0.5, %v3673_v13 }
  0xc9   : > { %v1976_v40 = vpop.eup %1975  ;;  %2001 = verf.f32 %v1101_v28  ;;  %v1106_v63 = vmul.f32 0.70710677, %v3679_v29  ;;  %v3762_v0 = vmul.f32 0.5, %v3676_v35  ;;  %v3765_v19 = vmul.f32 0.5, %v3679_v29 }
  0xca   : > { %v1978_v45 = vpop.eup %1977  ;;  %2003 = verf.f32 %v1102_v44  ;;  %v1107_v48 = vmul.f32 0.70710677, %v3682_v18  ;;  %v3769_v39 = vmul.f32 0.5, %v3682_v18  ;;  %v3772_v13 = vmul.f32 0.5, %v3685_v12 }
  0xcb   : > { %v1980_v57 = vpop.eup %1979  ;;  %2005 = verf.f32 %v1103_v6  ;;  %v1108_v51 = vmul.f32 0.70710677, %v3685_v12  ;;  %v3776_v35 = vmul.f32 0.5, %v3688_v10  ;;  %v3779_v29 = vmul.f32 0.5, %v3691_v32 }
  0xcc   : > { %v1982_v21 = vpop.eup %1981  ;;  %2007 = verf.f32 %v1104_v46  ;;  %v1109_v60 = vmul.f32 0.70710677, %v3688_v10  ;;  %v3783_v18 = vmul.f32 0.5, %v3694_v17  ;;  %v3786_v16 = vmul.f32 0.5, %v3697_v56 }
  0xcd   : > { %v1984_v42 = vpop.eup %1983  ;;  %2009 = verf.f32 %v1105_v52  ;;  %v1110_v12 = vmul.f32 0.70710677, %v3691_v32  ;;  %v1111_v62 = vmul.f32 0.70710677, %v3694_v17  ;;  %v1151_v25 = vadd.f32 1.0, %v1974_v34 }
  0xce   : > { %v1986_v36 = vpop.eup %1985  ;;  %2011 = verf.f32 %v1106_v63  ;;  %v1152_v53 = vadd.f32 1.0, %v1976_v40  ;;  %v3791_v10 = vmul.f32 0.5, %v3700_v7  ;;  %v1112_v4 = vmul.f32 0.70710677, %v3697_v56 }
  0xcf   : > { %v1988_v30 = vpop.eup %1987  ;;  %2013 = verf.f32 %v1107_v48  ;;  %v1153_v37 = vadd.f32 1.0, %v1978_v45  ;;  %v3795_v59 = vmul.f32 0.5, %v3703_v43  ;;  %v1113_v32 = vmul.f32 0.70710677, %v3700_v7 }
  0xd0   : > { %v1990_v55 = vpop.eup %1989  ;;  %2015 = verf.f32 %v1108_v51  ;;  %v1154_v47 = vadd.f32 1.0, %v1980_v57  ;;  %v3799_v26 = vmul.f32 0.5, %v3706_v22  ;;  %v3802_v28 = vmul.f32 0.5, %v3709_v24  ;;  %v2038_v51 = vld [vmem:[%s2115_s19 + $0x19] sm:$0xff] }
  0xd1   : > { %v1992_v38 = vpop.eup %1991  ;;  %2017 = verf.f32 %v1109_v60  ;;  %v1114_v44 = vmul.f32 0.70710677, %v3703_v43  ;;  %v1115_v6 = vmul.f32 0.70710677, %v3706_v22  ;;  %v1183_v34 = vmul.f32 %v1151_v25, %v3717_v11  ;;  %v2040_v25 = vld [vmem:[%s2115_s19 + $0x31] sm:$0xff] }
  0xd2   : > { %v1994_v17 = vpop.eup %1993  ;;  %2019 = verf.f32 %v1110_v12  ;;  %v1184_v7 = vmul.f32 %v1152_v53, %v3719_v23  ;;  %v1116_v40 = vmul.f32 0.70710677, %v3709_v24  ;;  %v1155_v52 = vadd.f32 1.0, %v1982_v21 }
  0xd3   : > { %v1996_v56 = vpop.eup %1995  ;;  %2021 = verf.f32 %v1111_v62  ;;  %v1185_v45 = vmul.f32 %v1153_v37, %v3721_v8  ;;  %v1117_v43 = vmul.f32 0.70710677, %v3712_v58  ;;  %v1156_v57 = vadd.f32 1.0, %v1984_v42  ;;  %v2039_v42 = vld [vmem:[%s2115_s19 + $0x21] sm:$0xff] }
  0xd4   : > { %v1998_v46 = vpop.eup %1997  ;;  %2023 = verf.f32 %v1112_v4  ;;  %v1186_v22 = vmul.f32 %v1154_v47, %v3723_v2  ;;  %v3813_v11 = vmul.f32 0.5, %v3712_v58  ;;  %v3816_v24 = vmul.f32 0.5, %v3715_v5 }
  0xd5   : > { %v2000_v63 = vpop.eup %1999  ;;  %2025 = verf.f32 %v1113_v32  ;;  %v1118_v23 = vmul.f32 0.70710677, %v3715_v5  ;;  %v1157_v21 = vadd.f32 1.0, %v1986_v36  ;;  %v3820_v60 = vadd.f32 %v2038_v51, %v1183_v34  ;;  %v2041_v36 = vld [vmem:[%s2115_s19 + $0x39] sm:$0xff] }
  0xd6   : > { %v2002_v48 = vpop.eup %2001  ;;  %2027 = verf.f32 %v1114_v44  ;;  %v3823_v2 = vadd.f32 %v2039_v42, %v1184_v7  ;;  %v1158_v58 = vadd.f32 1.0, %v1988_v30  ;;  %v1187_v62 = vmul.f32 %v1155_v52, %v3725_v41 }
  0xd7   : > { %v2004_v8 = vpop.eup %2003  ;;  %2029 = verf.f32 %v1115_v6  ;;  %v3827_v53 = vadd.f32 %v2040_v25, %v1185_v45  ;;  %v1159_v4 = vadd.f32 1.0, %v1990_v55  ;;  %v1188_v37 = vmul.f32 %v1156_v57, %v3727_v33  ;;  %v2042_v57 = vld [vmem:[%s2115_s19 + $0x49] sm:$0xff] }
  0xd8   : > { %v2006_v12 = vpop.eup %2005  ;;  %2031 = verf.f32 %v1116_v40  ;;  %v3831_v32 = vadd.f32 %v2041_v36, %v1186_v22  ;;  %v1160_v44 = vadd.f32 1.0, %v1992_v38  ;;  %v1161_v6 = vadd.f32 1.0, %v1994_v17  ;;  %v2046_v36 = vld [vmem:[%s2115_s19 + $0x79] sm:$0xff] }
  0xd9   : > { %v2008_v5 = vpop.eup %2007  ;;  %2033 = verf.f32 %v1117_v43  ;;  %v1162_v30 = vadd.f32 1.0, %v1996_v56  ;;  %v1163_v41 = vadd.f32 1.0, %v1998_v46  ;;  %v1164_v7 = vadd.f32 1.0, %v2000_v63  ;;  %v2043_v46 = vld [vmem:[%s2115_s19 + $0x51] sm:$0xff] }
  0xda   : > { %v2010_v47 = vpop.eup %2009  ;;  %2035 = verf.f32 %v1118_v23  ;;  %v1189_v40 = vmul.f32 %v1157_v21, %v3729_v3  ;;  %v1247_v55 = vadd.f32 %v3823_v2, %v3820_v60  ;;  %v1165_v33 = vadd.f32 1.0, %v2002_v48 }
  0xdb   : > { %v2012_v34 = vpop.eup %2011  ;;  %v1166_v45 = vadd.f32 1.0, %v2004_v8  ;;  %v1190_v43 = vmul.f32 %v1158_v58, %v3731_v15  ;;  %v3838_v22 = vadd.f32 %v2042_v57, %v1187_v62  ;;  %v1167_v17 = vadd.f32 1.0, %v2006_v12  ;;  %v2044_v12 = vld [vmem:[%s2115_s19 + $0x61] sm:$0xff] }
  0xdc   : > { %v2014_v52 = vpop.eup %2013  ;;  %v1191_v56 = vmul.f32 %v1159_v4, %v3734_v27  ;;  %v3842_v63 = vadd.f32 %v2043_v46, %v1188_v37  ;;  %v1248_v3 = vadd.f32 %v1247_v55, %v3827_v53  ;;  %v1168_v21 = vadd.f32 1.0, %v2008_v5  ;;  %v2052_v46 = vld [vmem:[%s2115_s19 + $0xc1] sm:$0xff] }
  0xdd   : > { %v2016_v38 = vpop.eup %2015  ;;  %v1192_v48 = vmul.f32 %v1160_v44, %v3736_v1  ;;  %v1193_v15 = vmul.f32 %v1161_v6, %v3738_v9  ;;  %v1194_v8 = vmul.f32 %v1162_v30, %v3740_v54  ;;  %v1195_v42 = vmul.f32 %v1163_v41, %v3743_v61  ;;  %v2045_v54 = vld [vmem:[%s2115_s19 + $0x69] sm:$0xff]  ;;  %v2047_v30 = vld [vmem:[%s2115_s19 + $0x81] sm:$0xff]  ;;  %v2048_v41 = vld [vmem:[%s2115_s19 + $0x91] sm:$0xff] }
  0xde   : > { %v2018_v23 = vpop.eup %2017  ;;  %v1196_v27 = vmul.f32 %v1164_v7, %v3745_v14  ;;  %v3851_v58 = vadd.f32 %v2044_v12, %v1189_v40  ;;  %v1249_v62 = vadd.f32 %v1248_v3, %v3831_v32  ;;  %v1169_v5 = vadd.f32 1.0, %v2010_v47 }
  0xdf   : > { %v2020_v51 = vpop.eup %2019  ;;  %v1197_v1 = vmul.f32 %v1165_v33, %v3749_v20  ;;  %v1198_v9 = vmul.f32 %v1166_v45, %v3751_v31  ;;  %v3857_v4 = vadd.f32 %v2045_v54, %v1190_v43  ;;  %v1170_v14 = vadd.f32 1.0, %v2012_v34  ;;  %v2049_v34 = vld [vmem:[%s2115_s19 + $0x99] sm:$0xff]  ;;  %v2050_v33 = vld [vmem:[%s2115_s19 + $0xa9] sm:$0xff]  ;;  %v2051_v43 = vld [vmem:[%s2115_s19 + $0xb1] sm:$0xff] }
  0xe0   : > { %v2022_v25 = vpop.eup %2021  ;;  %v1199_v37 = vmul.f32 %v1167_v17, %v3755_v50  ;;  %v3861_v44 = vadd.f32 %v2046_v36, %v1191_v56  ;;  %v1250_v6 = vadd.f32 %v1249_v62, %v3838_v22  ;;  %v1200_v20 = vmul.f32 %v1168_v21, %v3758_v49  ;;  %v2053_v21 = vld [vmem:[%s2115_s19 + $0xc9] sm:$0xff]  ;;  %v2055_v54 = vld [vmem:[%s2115_s19 + $0xe1] sm:$0xff] }
  0xe1   : > { %v2024_v61 = vpop.eup %2023  ;;  %v3866_v31 = vadd.f32 %v2047_v30, %v1192_v48  ;;  %v3869_v7 = vadd.f32 %v2048_v41, %v1193_v15  ;;  %v3872_v40 = vadd.f32 %v2049_v34, %v1194_v8  ;;  %v1171_v55 = vadd.f32 1.0, %v2014_v52 }
  0xe2   : > { %v2026_v47 = vpop.eup %2025  ;;  %v3875_v45 = vadd.f32 %v2050_v33, %v1195_v42  ;;  %v3878_v57 = vadd.f32 %v2051_v43, %v1196_v27  ;;  %v1251_v49 = vadd.f32 %v1250_v6, %v3842_v63  ;;  %v1201_v56 = vmul.f32 %v1169_v5, %v3762_v0  ;;  %v2054_v27 = vld [vmem:[%s2115_s19 + $0xd9] sm:$0xff]  ;;  %v2056_v33 = vld [vmem:[%s2115_s19 + $0xf1] sm:$0xff] }
  0xe3   : > { %v2028_v50 = vpop.eup %2027  ;;  %v3883_v3 = vadd.f32 %v2052_v46, %v1197_v1  ;;  %v3886_v48 = vadd.f32 %v2053_v21, %v1198_v9  ;;  %v3890_v52 = vmul.f32 %v3820_v60, %v3820_v60  ;;  %v1172_v8 = vadd.f32 1.0, %v2016_v38  ;;  %v2058_v21 = vld [vmem:[%s2115_s19 + $0x109] sm:$0xff] }
  0xe4   : > { %v2030_v17 = vpop.eup %2029  ;;  %v1202_v42 = vmul.f32 %v1170_v14, %v3765_v19  ;;  %v3894_v12 = vadd.f32 %v2054_v27, %v1199_v37  ;;  %v1252_v0 = vadd.f32 %v1251_v49, %v3851_v58  ;;  %v1173_v5 = vadd.f32 1.0, %v2018_v23 }
  0xe5   : > { %v2032_v15 = vpop.eup %2031  ;;  %v1174_v1 = vadd.f32 1.0, %v2020_v51  ;;  %v3898_v9 = vadd.f32 %v2055_v54, %v1200_v20  ;;  %v1286_v36 = vmul.f32 %v3823_v2, %v3823_v2  ;;  %v1175_v30 = vadd.f32 1.0, %v2022_v25 }
  0xe6   : > { %v2034_v62 = vpop.eup %2033  ;;  %v1176_v38 = vadd.f32 1.0, %v2024_v61  ;;  %v1203_v19 = vmul.f32 %v1171_v55, %v3769_v39  ;;  %v1253_v14 = vadd.f32 %v1252_v0, %v3857_v4  ;;  %v1177_v37 = vadd.f32 1.0, %v2026_v47  ;;  %v2057_v55 = vld [vmem:[%s2115_s19 + $0xf9] sm:$0xff]  ;;  %v2061_v0 = vld [vmem:[%s2115_s19 + $0x129] sm:$0xff] }
  0xe7   : > { %v2036_v6 = vpop.eup %2035  ;;  %v1178_v41 = vadd.f32 1.0, %v2028_v50  ;;  %v1179_v34 = vadd.f32 1.0, %v2030_v17  ;;  %v3905_v23 = vadd.f32 %v2056_v33, %v1201_v56  ;;  %v1180_v51 = vadd.f32 1.0, %v2032_v15  ;;  %v2067_v33 = vld [vmem:[%s2115_s19 + $0x171] sm:$0xff] }
  0xe8   : > { %v1181_v20 = vadd.f32 1.0, %v2034_v62  ;;  %v1182_v43 = vadd.f32 1.0, %v2036_v6  ;;  %v1254_v49 = vadd.f32 %v1253_v14, %v3861_v44  ;;  %v1204_v25 = vmul.f32 %v1172_v8, %v3772_v13 }
  0xe9   : > { %v1205_v61 = vmul.f32 %v1173_v5, %v3776_v35  ;;  %v1206_v39 = vmul.f32 %v1174_v1, %v3779_v29  ;;  %v3912_v47 = vadd.f32 %v2057_v55, %v1202_v42  ;;  %v1207_v50 = vmul.f32 %v1175_v30, %v3783_v18  ;;  %v2063_v5 = vld [vmem:[%s2115_s19 + $0x141] sm:$0xff]  ;;  %v2064_v30 = vld [vmem:[%s2115_s19 + $0x151] sm:$0xff] }
  0xea   : > { %v1208_v17 = vmul.f32 %v1176_v38, %v3786_v16  ;;  %v1255_v56 = vadd.f32 %v1254_v49, %v3866_v31  ;;  %v1287_v13 = vmul.f32 %v3827_v53, %v3827_v53  ;;  %v1209_v35 = vmul.f32 %v1177_v37, %v3791_v10  ;;  %v2059_v10 = vld [vmem:[%s2115_s19 + $0x111] sm:$0xff]  ;;  %v2066_v37 = vld [vmem:[%s2115_s19 + $0x169] sm:$0xff] }
  0xeb   : > { %v1210_v29 = vmul.f32 %v1178_v41, %v3795_v59  ;;  %v1211_v46 = vmul.f32 %v1179_v34, %v3799_v26  ;;  %v3923_v15 = vadd.f32 %v2058_v21, %v1203_v19  ;;  %v1212_v18 = vmul.f32 %v1180_v51, %v3802_v28  ;;  %v2060_v26 = vld [vmem:[%s2115_s19 + $0x121] sm:$0xff]  ;;  %v2065_v19 = vld [vmem:[%s2115_s19 + $0x159] sm:$0xff]  ;;  %v2069_v49 = vld [vmem:[%s2115_s19 + $0x189] sm:$0xff] }
  0xec   : > { %v1213_v16 = vmul.f32 %v1181_v20, %v3813_v11  ;;  %v1214_v8 = vmul.f32 %v1182_v43, %v3816_v24  ;;  %v1256_v42 = vadd.f32 %v1255_v56, %v3869_v7  ;;  %v3931_v59 = vadd.f32 %v2059_v10, %v1204_v25  ;;  %v2062_v11 = vld [vmem:[%s2115_s19 + $0x139] sm:$0xff]  ;;  %v2068_v20 = vld [vmem:[%s2115_s19 + $0x181] sm:$0xff] }
  0xed   : > { %v3934_v27 = vadd.f32 %v2060_v26, %v1205_v61  ;;  %v3937_v62 = vadd.f32 %v2061_v0, %v1206_v39  ;;  %v1288_v28 = vmul.f32 %v3831_v32, %v3831_v32  ;;  %v3942_v24 = vadd.f32 %v2062_v11, %v1207_v50 }
  0xee   : > { %v3945_v1 = vadd.f32 %v2063_v5, %v1208_v17  ;;  %v1257_v54 = vadd.f32 %v1256_v42, %v3872_v40  ;;  %v1289_v6 = vmul.f32 %v3838_v22, %v3838_v22  ;;  %v3951_v38 = vadd.f32 %v2064_v30, %v1209_v35 }
  0xef   : > { %v3954_v14 = vadd.f32 %v2065_v19, %v1210_v29  ;;  %v3957_v41 = vadd.f32 %v2066_v37, %v1211_v46  ;;  %v1290_v34 = vmul.f32 %v3842_v63, %v3842_v63  ;;  %v3967_v51 = vadd.f32 %v2067_v33, %v1212_v18 }
  0xf0   : > { %v3970_v43 = vadd.f32 %v2068_v20, %v1213_v16  ;;  %v3973_v25 = vadd.f32 %v2069_v49, %v1214_v8  ;;  %v1258_v61 = vadd.f32 %v1257_v54, %v3875_v45  ;;  %v1317_v39 = vadd.f32 %v1286_v36, %v3890_v52 }
  0xf1   : > { %v1872_v55 = vpack.c.bf16 %v3823_v2, %v3820_v60  ;;  %v1877_v50 = vpack.c.bf16 %v3831_v32, %v3827_v53  ;;  %v1882_v17 = vpack.c.bf16 %v3842_v63, %v3838_v22  ;;  %v1887_v35 = vpack.c.bf16 %v3857_v4, %v3851_v58 }
  0xf2   : > { %v1259_v56 = vadd.f32 %v1258_v61, %v3878_v57  ;;  %v1892_v52 = vpack.c.bf16 %v3866_v31, %v3861_v44  ;;  %v1897_v36 = vpack.c.bf16 %v3872_v40, %v3869_v7  ;;  %v1318_v60 = vadd.f32 %v1317_v39, %v1287_v13 }
  0xf3   : > { %1873 = vst [vmem:[%s3964_s29] sm:$0xff] %v1872_v55   ;;  %1949 = vst [vmem:[%s3964_s29 + $0x8] sm:$0xff] %v1877_v50   ;;  %v1902_v2 = vpack.c.bf16 %v3878_v57, %v3875_v45  ;;  %v1907_v53 = vpack.c.bf16 %v3886_v48, %v3883_v3  ;;  %v1912_v32 = vpack.c.bf16 %v3898_v9, %v3894_v12 }
  0xf4   : > { %1950 = vst [vmem:[%s3964_s29 + $0x10] sm:$0xff] %v1882_v17   ;;  %v1260_v22 = vadd.f32 %v1259_v56, %v3883_v3  ;;  %1951 = vst [vmem:[%s3964_s29 + $0x18] sm:$0xff] %v1887_v35   ;;  %v1917_v63 = vpack.c.bf16 %v3912_v47, %v3905_v23  ;;  %v1922_v13 = vpack.c.bf16 %v3931_v59, %v3923_v15 }
  0xf5   : > { %1952 = vst [vmem:[%s3964_s29 + $0x20] sm:$0xff] %v1892_v52   ;;  %1953 = vst [vmem:[%s3964_s29 + $0x28] sm:$0xff] %v1897_v36   ;;  %v1927_v29 = vpack.c.bf16 %v3937_v62, %v3934_v27  ;;  %v1319_v46 = vadd.f32 %v1318_v60, %v1288_v28  ;;  %v1932_v21 = vpack.c.bf16 %v3945_v1, %v3942_v24 }
  0xf6   : > { %1954 = vst [vmem:[%s3964_s29 + $0x30] sm:$0xff] %v1902_v2   ;;  %1955 = vst [vmem:[%s3964_s29 + $0x38] sm:$0xff] %v1907_v53   ;;  %v1937_v18 = vpack.c.bf16 %v3954_v14, %v3951_v38  ;;  %v1942_v16 = vpack.c.bf16 %v3967_v51, %v3957_v41  ;;  %v1261_v8 = vadd.f32 %v1260_v22, %v3886_v48 }
  0xf7   : > { %1956 = vst [vmem:[%s3964_s29 + $0x40] sm:$0xff] %v1912_v32   ;;  %1957 = vst [vmem:[%s3964_s29 + $0x48] sm:$0xff] %v1917_v63   ;;  %v1947_v42 = vpack.c.bf16 %v3973_v25, %v3970_v43  ;;  %v1291_v10 = vmul.f32 %v3851_v58, %v3851_v58  ;;  %v1320_v26 = vadd.f32 %v1319_v46, %v1289_v6 }
  0xf8   : > { %1958 = vst [vmem:[%s3964_s29 + $0x50] sm:$0xff] %v1922_v13   ;;  %1959 = vst [vmem:[%s3964_s29 + $0x58] sm:$0xff] %v1927_v29   ;;  %v1262_v0 = vadd.f32 %v1261_v8, %v3894_v12  ;;  %v1292_v28 = vmul.f32 %v3857_v4, %v3857_v4  ;;  %v1293_v54 = vmul.f32 %v3861_v44, %v3861_v44 }
  0xf9   : > { %1960 = vst [vmem:[%s3964_s29 + $0x60] sm:$0xff] %v1932_v21   ;;  %1961 = vst [vmem:[%s3964_s29 + $0x68] sm:$0xff] %v1937_v18   ;;  %v1321_v11 = vadd.f32 %v1320_v26, %v1290_v34  ;;  %v1294_v58 = vmul.f32 %v3866_v31, %v3866_v31  ;;  %v1295_v33 = vmul.f32 %v3869_v7, %v3869_v7 }
  0xfa   : > { %1962 = vst [vmem:[%s3964_s29 + $0x70] sm:$0xff] %v1942_v16   ;;  %1963 = vst [vmem:[%s3964_s29 + $0x78] sm:$0xff] %v1947_v42   ;;  %v1263_v5 = vadd.f32 %v1262_v0, %v3898_v9  ;;  %v1296_v34 = vmul.f32 %v3872_v40, %v3872_v40  ;;  %v1297_v61 = vmul.f32 %v3875_v45, %v3875_v45 }
  0xfb   : > { %v1322_v30 = vadd.f32 %v1321_v11, %v1291_v10  ;;  %v1298_v55 = vmul.f32 %v3878_v57, %v3878_v57  ;;  %v1299_v17 = vmul.f32 %v3883_v3, %v3883_v3  ;;  %v1300_v35 = vmul.f32 %v3886_v48, %v3886_v48 }
  0xfc   : > { %v1264_v19 = vadd.f32 %v1263_v5, %v3905_v23  ;;  %v1301_v36 = vmul.f32 %v3894_v12, %v3894_v12  ;;  %v1302_v2 = vmul.f32 %v3898_v9, %v3898_v9  ;;  %v1303_v32 = vmul.f32 %v3905_v23, %v3905_v23 }
  0xfd   : > { %v1323_v6 = vadd.f32 %v1322_v30, %v1292_v28  ;;  %v1304_v63 = vmul.f32 %v3912_v47, %v3912_v47  ;;  %v1305_v29 = vmul.f32 %v3923_v15, %v3923_v15  ;;  %v1306_v21 = vmul.f32 %v3931_v59, %v3931_v59 }
  0xfe   : > { %v1265_v37 = vadd.f32 %v1264_v19, %v3912_v47  ;;  %v1307_v16 = vmul.f32 %v3934_v27, %v3934_v27  ;;  %v1308_v42 = vmul.f32 %v3937_v62, %v3937_v62  ;;  %v1309_v26 = vmul.f32 %v3942_v24, %v3942_v24 }
  0xff   : > { %v1324_v20 = vadd.f32 %v1323_v6, %v1293_v54  ;;  %v1314_v6 = vmul.f32 %v3967_v51, %v3967_v51 }
 0x100   : > { %v1266_v4 = vadd.f32 %v1265_v37, %v3923_v15  ;;  %v1315_v37 = vmul.f32 %v3970_v43, %v3970_v43 }
 0x101   : > { %v1325_v49 = vadd.f32 %v1324_v20, %v1294_v58  ;;  %v1316_v20 = vmul.f32 %v3973_v25, %v3973_v25 }
 0x102   : > { %v1267_v44 = vadd.f32 %v1266_v4, %v3931_v59  ;;  %v1310_v59 = vmul.f32 %v3945_v1, %v3945_v1 }
 0x103   : > { %v1326_v39 = vadd.f32 %v1325_v49, %v1295_v33 }
 0x104   : > { %v1268_v31 = vadd.f32 %v1267_v44, %v3934_v27  ;;  %v1311_v27 = vmul.f32 %v3951_v38, %v3951_v38 }
 0x105   : > { %v1327_v50 = vadd.f32 %v1326_v39, %v1296_v34 }
 0x106   : > { %v1269_v7 = vadd.f32 %v1268_v31, %v3937_v62  ;;  %v1312_v62 = vmul.f32 %v3954_v14, %v3954_v14 }
 0x107   : > { %v1328_v56 = vadd.f32 %v1327_v50, %v1297_v61 }
 0x108   : > { %v1270_v40 = vadd.f32 %v1269_v7, %v3942_v24 }
 0x109   : > { %v1329_v52 = vadd.f32 %v1328_v56, %v1298_v55 }
 0x10a   : > { %v1271_v45 = vadd.f32 %v1270_v40, %v3945_v1  ;;  %v1313_v1 = vmul.f32 %v3957_v41, %v3957_v41 }
 0x10b   : > { %v1330_v60 = vadd.f32 %v1329_v52, %v1299_v17 }
 0x10c   : > { %v1272_v57 = vadd.f32 %v1271_v45, %v3951_v38 }
 0x10d   : > { %v1331_v53 = vadd.f32 %v1330_v60, %v1300_v35 }
 0x10e   : > { %v1273_v3 = vadd.f32 %v1272_v57, %v3954_v14 }
 0x10f   : > { %v1332_v22 = vadd.f32 %v1331_v53, %v1301_v36 }
 0x110   : > { %v1274_v48 = vadd.f32 %v1273_v3, %v3957_v41 }
 0x111   : > { %v1333_v13 = vadd.f32 %v1332_v22, %v1302_v2 }
 0x112   : > { %v1275_v12 = vadd.f32 %v1274_v48, %v3967_v51 }
 0x113   : > { %v1334_v46 = vadd.f32 %v1333_v13, %v1303_v32 }
 0x114   : > { %v1276_v9 = vadd.f32 %v1275_v12, %v3970_v43 }
 0x115   : > { %v1335_v23 = vadd.f32 %v1334_v46, %v1304_v63 }
 0x116   : > { %v1277_v18 = vadd.f32 %v1276_v9, %v3973_v25 }
 0x117   : > { %v1336_v47 = vadd.f32 %v1335_v23, %v1305_v29 }
 0x118   : > { %v1278_v8 = vrot.slane %v1277_v18, 4 }
 0x119   : > { %v1337_v10 = vadd.f32 %v1336_v47, %v1306_v21 }
 0x11a   : > { %v1279_v15 = vadd.f32 %v1278_v8, %v1277_v18 }
 0x11b   : > { %v1338_v0 = vadd.f32 %v1337_v10, %v1307_v16 }
 0x11c   : > { %v1280_v28 = vrot.slane %v1279_v15, 2 }
 0x11d   : > { %v1339_v11 = vadd.f32 %v1338_v0, %v1308_v42 }
 0x11e   : > { %v1281_v5 = vadd.f32 %v1280_v28, %v1279_v15 }
 0x11f   : > { %v1340_v54 = vadd.f32 %v1339_v11, %v1309_v26 }
 0x120   : > { %v1282_v30 = vrot.slane %v1281_v5, 1 }
 0x121   : > { %v1341_v24 = vadd.f32 %v1340_v54, %v1310_v59 }
 0x122   : > { %v1283_v19 = vadd.f32 %v1282_v30, %v1281_v5 }
 0x123   : > { %v1342_v58 = vadd.f32 %v1341_v24, %v1311_v27 }
 0x124   : > { %1284 = vst [vmem:[%s181_s6] sm:$0x1] %v1283_v19 }
 0x125   : > { %v1343_v38 = vadd.f32 %v1342_v58, %v1312_v62 }
 0x127   : > { %v1344_v33 = vadd.f32 %v1343_v38, %v1313_v1 }
 0x129   : > { %v1345_v4 = vadd.f32 %v1344_v33, %v1314_v6 }
 0x12b   : > { %v1346_v14 = vadd.f32 %v1345_v4, %v1315_v37 }
 0x12d   : > { %v1347_v34 = vadd.f32 %v1346_v14, %v1316_v20 }
 0x12f   : > { %v1348_v49 = vrot.slane %v1347_v34, 4 }
 0x131   : > { %v1349_v44 = vadd.f32 %v1348_v49, %v1347_v34 }
 0x133   : > { %v1350_v61 = vrot.slane %v1349_v44, 2 }
 0x135   : > { %v1351_v41 = vadd.f32 %v1350_v61, %v1349_v44 }
 0x137   : > { %v1352_v39 = vrot.slane %v1351_v41, 1 }
 0x139   : > { %v1353_v31 = vadd.f32 %v1352_v39, %v1351_v41 }
 0x13b   : > { %1354 = vst [vmem:[%s181_s6 + $0x1] sm:$0x1] %v1353_v31 }
 0x13c PF: > { %s14_s12 = sadd.s32 1, %s2076_s12  }
 0x13d   : > { %p11_p4 = scmp.ge.s32.totalorder %s14_s12, 4  }
 0x13f   :  { %13 = sbr.rel (!%p11_p4) target bundleno = 1 (0x1), region = 72 }

// kernel: irmlp_forward.4
= control target key start
LH: loop header
LB: loop body
LE: loop exit
PB: predicated region body
PF: predicated region fallthrough
CT: control target
= control target key end

     0   :  { %s3669_s1 = inlined_call_operand.vmem [shape: bf16[128,128], index: 1, kind: input, shape index: {}]   ;;  %s3670_s0 = inlined_call_operand.vmem [shape: bf16[512,128], index: 0, kind: input, shape index: {}]   ;;  %s3671_s3 = inlined_call_operand.vmem [shape: f32[1,128], index: 3, kind: input, shape index: {}]   ;;  %s3672_s4 = inlined_call_operand.vmem [shape: f32[1,128], index: 4, kind: input, shape index: {}]   ;;  %s3673_s2 = inlined_call_operand.vmem [shape: bf16[128,128], index: 2, kind: input, shape index: {}]   ;;  %s3674_s5 = inlined_call_operand.vmem [shape: bf16[512,128], index: 5, kind: output, shape index: {0}]   ;;  %s3675_s6 = inlined_call_operand.vmem [shape: f32[1,2,128], index: 6, kind: output, shape index: {1}]  }
   0x1   :  { %v2651_v0 = vld [vmem:[%s3669_s1 + $0x38] sm:$0xff]   ;;  %v2652_v1 = vld [vmem:[%s3669_s1 + $0x30] sm:$0xff]   ;;  %v2653_v2 = vld [vmem:[%s3669_s1 + $0x28] sm:$0xff]  }
   0x2   :  { %2491 = vmatprep.subr.bf16.mxu0 %v2651_v0  ;;  %v2654_v3 = vld [vmem:[%s3669_s1 + $0x20] sm:$0xff]   ;;  %v2349_v8 = vld [vmem:[%s3670_s0 + $0x8] sm:$0xff]   ;;  %v2350_v9 = vld [vmem:[%s3670_s0 + $0x10] sm:$0xff]  }
   0x3   :  { %2492 = vmatpush3.bf16.msra.mxu0 %v2651_v0  ;;  %v2062_v4 = vld [vmem:[%s3670_s0] sm:$0xff]   ;;  %v2351_v10 = vld [vmem:[%s3670_s0 + $0x18] sm:$0xff]   ;;  %v2067_v12 = vunpack.c.l.bf16 %v2349_v8  ;;  %v2068_v13 = vunpack.c.h.bf16 %v2349_v8  ;;  %v2071_v14 = vunpack.c.l.bf16 %v2350_v9  ;;  %v2072_v17 = vunpack.c.h.bf16 %v2350_v9  ;;  %v2353_v26 = vld [vmem:[%s3670_s0 + $0x28] sm:$0xff]  }
   0x4   :  { %2493 = vmatprep.subr.bf16.mxu0 %v2652_v1  ;;  %v2848_v5 = vld [vmem:[%s3671_s3] ss:$0 sm:$0xff]  ;;  %v2063_v6 = vunpack.c.l.bf16 %v2062_v4  ;;  %v2064_v7 = vunpack.c.h.bf16 %v2062_v4  ;;  %v2075_v18 = vunpack.c.l.bf16 %v2351_v10  ;;  %v2655_v19 = vld [vmem:[%s3669_s1 + $0x18] sm:$0xff]   ;;  %v2076_v21 = vunpack.c.h.bf16 %v2351_v10  ;;  %v2354_v28 = vld [vmem:[%s3670_s0 + $0x30] sm:$0xff]  }
   0x5   :  { %v2862_v11 = vld [vmem:[%s3672_s4] ss:$0 sm:$0xff]  ;;  %v160_v20 = vsub.f32 %v2067_v12, %v2848_v5  ;;  %v161_v25 = vsub.f32 %v2068_v13, %v2848_v5  ;;  %v162_v27 = vsub.f32 %v2071_v14, %v2848_v5  ;;  %v163_v30 = vsub.f32 %v2072_v17, %v2848_v5  ;;  %v2355_v33 = vld [vmem:[%s3670_s0 + $0x38] sm:$0xff]   ;;  %v2656_v34 = vld [vmem:[%s3669_s1 + $0x10] sm:$0xff]  }
   0x6   :  { %v158_v15 = vsub.f32 %v2063_v6, %v2848_v5  ;;  %v159_v16 = vsub.f32 %v2064_v7, %v2848_v5  ;;  %v2352_v22 = vld [vmem:[%s3670_s0 + $0x20] sm:$0xff]   ;;  %v164_v31 = vsub.f32 %v2075_v18, %v2848_v5  ;;  %v165_v36 = vsub.f32 %v2076_v21, %v2848_v5  ;;  %v2657_v52 = vld [vmem:[%s3669_s1 + $0x8] sm:$0xff]   ;;  %v2358_v62 = vld [vmem:[%s3670_s0 + $0x50] sm:$0xff]  }
   0x7   :  { %2494 = vmatpush3.bf16.msra.mxu0 %v2652_v1  ;;  %v2079_v32 = vunpack.c.l.bf16 %v2352_v22  ;;  %v2892_v35 = vmul.f32 %v2862_v11, %v160_v20  ;;  %v2080_v37 = vunpack.c.h.bf16 %v2352_v22  ;;  %v2083_v38 = vunpack.c.l.bf16 %v2353_v26  ;;  %v2356_v47 = vld [vmem:[%s3670_s0 + $0x40] sm:$0xff]   ;;  %v2357_v57 = vld [vmem:[%s3670_s0 + $0x48] sm:$0xff]   ;;  %v2359_v14 = vld [vmem:[%s3670_s0 + $0x58] sm:$0xff]  }
   0x8   :  { %2495 = vmatprep.subr.bf16.mxu0 %v2653_v2  ;;  %v229_v23 = vmul.f32 %v2862_v11, %v158_v15  ;;  %v230_v24 = vmul.f32 %v2862_v11, %v159_v16  ;;  %v2896_v39 = vmul.f32 %v2862_v11, %v161_v25  ;;  %v2084_v41 = vunpack.c.h.bf16 %v2353_v26  ;;  %v2658_v8 = vld [vmem:[%s3669_s1] sm:$0xff]  }
   0x9   :  { %v166_v40 = vsub.f32 %v2079_v32, %v2848_v5  ;;  %v2087_v42 = vunpack.c.l.bf16 %v2354_v28  ;;  %v167_v43 = vsub.f32 %v2080_v37, %v2848_v5  ;;  %v168_v44 = vsub.f32 %v2083_v38, %v2848_v5 }
   0xa   :  { %v293_v29 = vpack.c.bf16 %v230_v24, %v229_v23  ;;  %v2088_v45 = vunpack.c.h.bf16 %v2354_v28  ;;  %v2091_v46 = vunpack.c.l.bf16 %v2355_v33  ;;  %v2905_v48 = vmul.f32 %v2862_v11, %v162_v27  ;;  %v2976_v23 = vld [vmem:[%s3670_s0 + $0x60] sm:$0xff]   ;;  %v2361_v24 = vld [vmem:[%s3670_s0 + $0x68] sm:$0xff]  }
   0xb   :  { %2496 = vmatpush3.bf16.msra.mxu0 %v2653_v2  ;;  %v169_v49 = vsub.f32 %v2084_v41, %v2848_v5  ;;  %v170_v50 = vsub.f32 %v2087_v42, %v2848_v5  ;;  %v2092_v51 = vunpack.c.h.bf16 %v2355_v33  ;;  %v2913_v53 = vmul.f32 %v2862_v11, %v163_v30  ;;  %v2659_v30 = vld [vmem:[%s3673_s2 + $0x38] sm:$0xff]  }
   0xc   :  { %2497 = vmatprep.subr.bf16.mxu0 %v2654_v3  ;;  %2507 = vmatprep.mubr.bf16.mxu0 %v293_v29  ;;  %v2916_v54 = vmul.f32 %v2862_v11, %v164_v31  ;;  %v2919_v55 = vmul.f32 %v2862_v11, %v165_v36  ;;  %v171_v56 = vsub.f32 %v2088_v45, %v2848_v5  ;;  %v2095_v61 = vunpack.c.l.bf16 %v2356_v47  ;;  %v2362_v29 = vld [vmem:[%s3670_s0 + $0x70] sm:$0xff]   ;;  %v2363_v36 = vld [vmem:[%s3670_s0 + $0x78] sm:$0xff]  }
   0xd   :  { %v294_v58 = vpack.c.bf16 %v2896_v39, %v2892_v35  ;;  %v172_v59 = vsub.f32 %v2091_v46, %v2848_v5  ;;  %v173_v60 = vsub.f32 %v2092_v51, %v2848_v5  ;;  %v2933_v63 = vmul.f32 %v2862_v11, %v166_v40  ;;  %2571 = vmatprep.subr.bf16.mxu1 %v2659_v30 }
   0xe   :  { %v2936_v0 = vmul.f32 %v2862_v11, %v167_v43  ;;  %v2939_v1 = vmul.f32 %v2862_v11, %v168_v44  ;;  %v2096_v2 = vunpack.c.h.bf16 %v2356_v47  ;;  %v2945_v4 = vmul.f32 %v2862_v11, %v170_v50  ;;  %2572 = vmatpush3.bf16.msra.mxu1 %v2659_v30 }
   0xf   :  { %2498 = vmatpush3.bf16.msra.mxu0 %v2654_v3  ;;  %v2942_v3 = vmul.f32 %v2862_v11, %v169_v49  ;;  %v174_v6 = vsub.f32 %v2095_v61, %v2848_v5  ;;  %v2099_v7 = vunpack.c.l.bf16 %v2357_v57  ;;  %v2952_v9 = vmul.f32 %v2862_v11, %v171_v56  ;;  %v2364_v56 = vld [vmem:[%s3670_s0 + $0x80] sm:$0xff]  }
  0x10   :  { %2499 = vmatprep.subr.bf16.mxu0 %v2655_v19  ;;  %v175_v10 = vsub.f32 %v2096_v2, %v2848_v5  ;;  %v2100_v12 = vunpack.c.h.bf16 %v2357_v57  ;;  %v2103_v13 = vunpack.c.l.bf16 %v2358_v62  ;;  %v2959_v15 = vmul.f32 %v2862_v11, %v172_v59 }
  0x11   :  { %v2962_v16 = vmul.f32 %v2862_v11, %v173_v60  ;;  %v176_v17 = vsub.f32 %v2099_v7, %v2848_v5  ;;  %v2104_v18 = vunpack.c.h.bf16 %v2358_v62  ;;  %v295_v25 = vpack.c.bf16 %v2913_v53, %v2905_v48 }
  0x12   :  { %v2969_v20 = vmul.f32 %v2862_v11, %v175_v10  ;;  %v177_v21 = vsub.f32 %v2100_v12, %v2848_v5  ;;  %v178_v22 = vsub.f32 %v2103_v13, %v2848_v5  ;;  %v2107_v27 = vunpack.c.l.bf16 %v2359_v14  ;;  %v2366_v12 = vld [vmem:[%s3670_s0 + $0x90] sm:$0xff]  }
  0x13   :  { %2500 = vmatpush3.bf16.msra.mxu0 %v2655_v19  ;;  %v2966_v19 = vmul.f32 %v2862_v11, %v174_v6  ;;  %v179_v26 = vsub.f32 %v2104_v18, %v2848_v5  ;;  %v2108_v28 = vunpack.c.h.bf16 %v2359_v14  ;;  %v296_v31 = vpack.c.bf16 %v2919_v55, %v2916_v54 }
  0x14   :  { %2501 = vmatprep.subr.bf16.mxu0 %v2656_v34  ;;  %v297_v32 = vpack.c.bf16 %v2936_v0, %v2933_v63  ;;  %v298_v33 = vpack.c.bf16 %v2942_v3, %v2939_v1  ;;  %v300_v37 = vpack.c.bf16 %v2962_v16, %v2959_v15  ;;  %v3004_v38 = vmul.f32 %v2862_v11, %v176_v17 }
  0x15   :  { %v3007_v40 = vmul.f32 %v2862_v11, %v177_v21  ;;  %v2111_v41 = vunpack.c.l.bf16 %v2976_v23  ;;  %v301_v42 = vpack.c.bf16 %v2969_v20, %v2966_v19  ;;  %v3013_v43 = vmul.f32 %v2862_v11, %v178_v22 }
  0x16   :  { %v2115_v44 = vunpack.c.l.bf16 %v2361_v24  ;;  %v2116_v45 = vunpack.c.h.bf16 %v2361_v24  ;;  %v3016_v46 = vmul.f32 %v2862_v11, %v179_v26  ;;  %v3019_v47 = vsub.f32 %v2107_v27, %v2848_v5  ;;  %v2367_v26 = vld [vmem:[%s3670_s0 + $0x98] sm:$0xff]  }
  0x17   :  { %2502 = vmatpush3.bf16.msra.mxu0 %v2656_v34  ;;  %v299_v34 = vpack.c.bf16 %v2952_v9, %v2945_v4  ;;  %v3022_v48 = vsub.f32 %v2108_v28, %v2848_v5  ;;  %v2112_v49 = vunpack.c.h.bf16 %v2976_v23  ;;  %v2120_v53 = vunpack.c.h.bf16 %v2362_v29 }
  0x18   :  { %2503 = vmatprep.subr.bf16.mxu0 %v2657_v52  ;;  %v184_v50 = vsub.f32 %v2115_v44, %v2848_v5  ;;  %v185_v51 = vsub.f32 %v2116_v45, %v2848_v5  ;;  %v302_v57 = vpack.c.bf16 %v3007_v40, %v3004_v38  ;;  %v3033_v59 = vsub.f32 %v2111_v41, %v2848_v5  ;;  %v2660_v40 = vld [vmem:[%s3673_s2 + $0x30] sm:$0xff]  }
  0x19   :  { %v2123_v60 = vunpack.c.l.bf16 %v2363_v36  ;;  %v2124_v61 = vunpack.c.h.bf16 %v2363_v36  ;;  %v187_v7 = vsub.f32 %v2120_v53, %v2848_v5  ;;  %v303_v10 = vpack.c.bf16 %v3016_v46, %v3013_v43  ;;  %v2368_v36 = vld [vmem:[%s3670_s0 + $0xa0] sm:$0xff]   ;;  %2573 = vmatprep.subr.bf16.mxu1 %v2660_v40  ;;  %v2661_v46 = vld [vmem:[%s3673_s2 + $0x28] sm:$0xff]  }
  0x1a   :  { %v3039_v62 = vmul.f32 %v2862_v11, %v184_v50  ;;  %v3042_v2 = vmul.f32 %v2862_v11, %v185_v51  ;;  %v2128_v18 = vunpack.c.h.bf16 %v2364_v56  ;;  %v2135_v30 = vunpack.c.l.bf16 %v2366_v12  ;;  %2574 = vmatpush3.bf16.msra.mxu1 %v2660_v40 }
  0x1b   :  { %2504 = vmatpush3.bf16.msra.mxu0 %v2657_v52  ;;  %v2119_v52 = vunpack.c.l.bf16 %v2362_v29  ;;  %v188_v35 = vsub.f32 %v2123_v60, %v2848_v5  ;;  %v189_v39 = vsub.f32 %v2124_v61, %v2848_v5  ;;  %v3062_v17 = vmul.f32 %v2862_v11, %v187_v7  ;;  %2575 = vmatprep.subr.bf16.mxu1 %v2661_v46 }
  0x1c   :  { %2505 = vmatprep.subr.bf16.mxu0 %v2658_v8  ;;  %v306_v13 = vpack.c.bf16 %v3042_v2, %v3039_v62  ;;  %v191_v28 = vsub.f32 %v2128_v18, %v2848_v5  ;;  %v2136_v50 = vunpack.c.h.bf16 %v2366_v12  ;;  %v194_v53 = vsub.f32 %v2135_v30, %v2848_v5  ;;  %v2664_v2 = vld [vmem:[%s3673_s2 + $0x10] sm:$0xff]  }
  0x1d   :  { %v186_v6 = vsub.f32 %v2119_v52, %v2848_v5  ;;  %v3065_v21 = vmul.f32 %v2862_v11, %v188_v35  ;;  %v3068_v22 = vmul.f32 %v2862_v11, %v189_v39  ;;  %v2143_v7 = vunpack.c.l.bf16 %v2368_v36 }
  0x1e   :  { %v3087_v51 = vmul.f32 %v2862_v11, %v191_v28  ;;  %v195_v61 = vsub.f32 %v2136_v50, %v2848_v5  ;;  %v2144_v55 = vunpack.c.h.bf16 %v2368_v36  ;;  %v251_v23 = vmul.f32 %v2862_v11, %v3019_v47  ;;  %2576 = vmatpush3.bf16.msra.mxu1 %v2661_v46 }
  0x1f   :  { %2506 = vmatpush3.bf16.msra.mxu0 %v2658_v8  ;;  %v2365_v8 = vld [vmem:[%s3670_s0 + $0x88] sm:$0xff]   ;;  %v3059_v14 = vmul.f32 %v2862_v11, %v186_v6  ;;  %v308_v41 = vpack.c.bf16 %v3068_v22, %v3065_v21  ;;  %v2140_v6 = vunpack.c.h.bf16 %v2367_v26  ;;  %v2666_v21 = vld [vmem:[%s3673_s2] sm:$0xff]  }
  0x20   :  { %v2132_v29 = vunpack.c.h.bf16 %v2365_v8  ;;  %v3114_v18 = vmul.f32 %v2862_v11, %v195_v61  ;;  %v199_v30 = vsub.f32 %v2144_v55, %v2848_v5 }
  0x21   :  { %v307_v27 = vpack.c.bf16 %v3062_v17, %v3059_v14  ;;  %v197_v54 = vsub.f32 %v2140_v6, %v2848_v5 }
  0x22   :  { %2508 = vmatmul.mubr.bf16.vlgmr.msra.gmra.mxu0 %v294_v58  ;;  %v2127_v58 = vunpack.c.l.bf16 %v2364_v56  ;;  %v193_v52 = vsub.f32 %v2132_v29, %v2848_v5  ;;  %v2139_v56 = vunpack.c.l.bf16 %v2367_v26  ;;  %v3146_v6 = vmul.f32 %v2862_v11, %v199_v30 }
  0x23   :  { %2511 = vmatprep.mubr.bf16.mxu0 %v295_v25  ;;  %v2131_v25 = vunpack.c.l.bf16 %v2365_v8  ;;  %v2369_v8 = vld [vmem:[%s3670_s0 + $0xa8] sm:$0xff]   ;;  %v3132_v29 = vmul.f32 %v2862_v11, %v197_v54 }
  0x24   :  { %v190_v24 = vsub.f32 %v2127_v58, %v2848_v5  ;;  %v3104_v39 = vmul.f32 %v2862_v11, %v193_v52  ;;  %v3107_v58 = vmul.f32 %v2862_v11, %v194_v53  ;;  %v196_v12 = vsub.f32 %v2139_v56, %v2848_v5  ;;  %v2372_v56 = vld [vmem:[%s3670_s0 + $0xc0] sm:$0xff]  }
  0x25   :  { %v192_v45 = vsub.f32 %v2131_v25, %v2848_v5  ;;  %v2147_v63 = vunpack.c.l.bf16 %v2369_v8  ;;  %v2148_v0 = vunpack.c.h.bf16 %v2369_v8  ;;  %v2159_v30 = vunpack.c.l.bf16 %v2372_v56 }
  0x26   :  { %v3083_v44 = vmul.f32 %v2862_v11, %v190_v24  ;;  %v2370_v24 = vld [vmem:[%s3670_s0 + $0xb0] sm:$0xff]   ;;  %v3124_v26 = vmul.f32 %v2862_v11, %v196_v12  ;;  %v3677_v43 = vpack.c.bf16 %v3114_v18, %v3107_v58 }
  0x27   :  { %v3092_v60 = vmul.f32 %v2862_v11, %v192_v45  ;;  %v200_v45 = vsub.f32 %v2147_v63, %v2848_v5  ;;  %v201_v50 = vsub.f32 %v2148_v0, %v2848_v5  ;;  %v2151_v52 = vunpack.c.l.bf16 %v2370_v24 }
  0x28   :  { %v309_v35 = vpack.c.bf16 %v3087_v51, %v3083_v44  ;;  %v2152_v53 = vunpack.c.h.bf16 %v2370_v24  ;;  %v2373_v24 = vld [vmem:[%s3670_s0 + $0xc8] sm:$0xff]   ;;  %v206_v3 = vsub.f32 %v2159_v30, %v2848_v5  ;;  %v3678_v47 = vpack.c.bf16 %v3132_v29, %v3124_v26 }
  0x29   :  { %v3149_v12 = vmul.f32 %v2862_v11, %v200_v45  ;;  %v3152_v54 = vmul.f32 %v2862_v11, %v201_v50  ;;  %v202_v55 = vsub.f32 %v2151_v52, %v2848_v5  ;;  %v2374_v45 = vld [vmem:[%s3670_s0 + $0xd0] sm:$0xff]   ;;  %v2164_v4 = vunpack.c.h.bf16 %v2373_v24 }
  0x2a   :  { %2512 = vmatmul.mubr.bf16.gmra.mxu0 %v296_v31  ;;  %v198_v31 = vsub.f32 %v2143_v7, %v2848_v5  ;;  %v2167_v9 = vunpack.c.l.bf16 %v2374_v45  ;;  %v2168_v50 = vunpack.c.h.bf16 %v2374_v45  ;;  %v2378_v45 = vld [vmem:[%s3670_s0 + $0xf0] sm:$0xff]  }
  0x2b   :  { %2515 = vmatprep.mubr.bf16.mxu0 %v297_v32  ;;  %v2371_v32 = vld [vmem:[%s3670_s0 + $0xb8] sm:$0xff]   ;;  %v3172_v52 = vmul.f32 %v2862_v11, %v202_v55  ;;  %v3680_v62 = vpack.c.bf16 %v3152_v54, %v3149_v12 }
  0x2c   :  { %v3136_v36 = vmul.f32 %v2862_v11, %v198_v31  ;;  %v2155_v7 = vunpack.c.l.bf16 %v2371_v32  ;;  %v2156_v8 = vunpack.c.h.bf16 %v2371_v32  ;;  %v203_v31 = vsub.f32 %v2152_v53, %v2848_v5  ;;  %v2375_v55 = vld [vmem:[%s3670_s0 + $0xd8] sm:$0xff]  }
  0x2d   :  { %v211_v28 = vsub.f32 %v2168_v50, %v2848_v5 }
  0x2e   :  { %v204_v0 = vsub.f32 %v2155_v7, %v2848_v5  ;;  %v205_v32 = vsub.f32 %v2156_v8, %v2848_v5  ;;  %v3175_v53 = vmul.f32 %v2862_v11, %v203_v31  ;;  %v2160_v7 = vunpack.c.h.bf16 %v2372_v56 }
  0x2f   :  { %v2171_v56 = vunpack.c.l.bf16 %v2375_v55 }
  0x30   :  { %v3181_v8 = vmul.f32 %v2862_v11, %v204_v0  ;;  %v3184_v1 = vmul.f32 %v2862_v11, %v205_v32  ;;  %v207_v31 = vsub.f32 %v2160_v7, %v2848_v5  ;;  %v3199_v32 = vmul.f32 %v2862_v11, %v206_v3  ;;  %v2377_v3 = vld [vmem:[%s3670_s0 + $0xe8] sm:$0xff]  }
  0x31   :  { %v209_v7 = vsub.f32 %v2164_v4, %v2848_v5  ;;  %v2172_v0 = vunpack.c.h.bf16 %v2375_v55  ;;  %v212_v4 = vsub.f32 %v2171_v56, %v2848_v5 }
  0x32   :  { %2516 = vmatmul.mubr.bf16.gmra.mxu0 %v298_v33  ;;  %v2163_v33 = vunpack.c.l.bf16 %v2373_v24  ;;  %v3203_v63 = vmul.f32 %v2862_v11, %v207_v31  ;;  %v210_v24 = vsub.f32 %v2167_v9, %v2848_v5  ;;  %v3224_v9 = vmul.f32 %v2862_v11, %v211_v28 }
  0x33   :  { %2519 = vmatprep.mubr.bf16.mxu0 %v299_v34  ;;  %v2376_v34 = vld [vmem:[%s3670_s0 + $0xe0] sm:$0xff]   ;;  %v213_v50 = vsub.f32 %v2172_v0, %v2848_v5  ;;  %v3237_v56 = vmul.f32 %v2862_v11, %v212_v4  ;;  %v2179_v28 = vunpack.c.l.bf16 %v2377_v3  ;;  %v2183_v4 = vunpack.c.l.bf16 %v2378_v45 }
  0x34   :  { %v208_v30 = vsub.f32 %v2163_v33, %v2848_v5  ;;  %v2175_v25 = vunpack.c.l.bf16 %v2376_v34  ;;  %v3217_v33 = vmul.f32 %v2862_v11, %v209_v7  ;;  %v3220_v31 = vmul.f32 %v2862_v11, %v210_v24 }
  0x35   :  { %v2176_v55 = vunpack.c.h.bf16 %v2376_v34  ;;  %v2180_v24 = vunpack.c.h.bf16 %v2377_v3  ;;  %v3248_v16 = vmul.f32 %v2862_v11, %v213_v50  ;;  %v216_v0 = vsub.f32 %v2179_v28, %v2848_v5 }
  0x36   :  { %v3208_v61 = vmul.f32 %v2862_v11, %v208_v30  ;;  %v214_v30 = vsub.f32 %v2175_v25, %v2848_v5  ;;  %v2379_v25 = vld [vmem:[%s3670_s0 + $0xf8] sm:$0xff]   ;;  %v2184_v7 = vunpack.c.h.bf16 %v2378_v45  ;;  %v183_v45 = vsub.f32 %v2112_v49, %v2848_v5 }
  0x37   :  { %v217_v3 = vsub.f32 %v2180_v24, %v2848_v5  ;;  %v2188_v50 = vunpack.c.h.bf16 %v2379_v25  ;;  %v287_v15 = vmul.f32 %v2862_v11, %v216_v0  ;;  %v252_v49 = vmul.f32 %v2862_v11, %v3022_v48  ;;  %v2662_v48 = vld [vmem:[%s3673_s2 + $0x20] sm:$0xff]  }
  0x38   :  { %v3252_v34 = vmul.f32 %v2862_v11, %v214_v30  ;;  %v218_v30 = vsub.f32 %v2183_v4, %v2848_v5  ;;  %v219_v28 = vsub.f32 %v2184_v7, %v2848_v5  ;;  %2577 = vmatprep.subr.bf16.mxu1 %v2662_v48  ;;  %v3682_v14 = vpack.c.bf16 %v3184_v1, %v3181_v8 }
  0x39   :  { %v221_v19 = vsub.f32 %v2188_v50, %v2848_v5  ;;  %2578 = vmatpush3.bf16.msra.mxu1 %v2662_v48  ;;  %v3683_v17 = vpack.c.bf16 %v3203_v63, %v3199_v32  ;;  %v3684_v22 = vpack.c.bf16 %v3217_v33, %v3208_v61 }
  0x3a   :  { %2520 = vmatmul.mubr.bf16.gmra.mxu0 %v300_v37  ;;  %v215_v37 = vsub.f32 %v2176_v55, %v2848_v5  ;;  %v288_v55 = vmul.f32 %v2862_v11, %v217_v3  ;;  %v289_v0 = vmul.f32 %v2862_v11, %v218_v30  ;;  %v290_v3 = vmul.f32 %v2862_v11, %v219_v28 }
  0x3b   :  { %2523 = vmatprep.mubr.bf16.mxu0 %v301_v42  ;;  %v2187_v42 = vunpack.c.l.bf16 %v2379_v25  ;;  %v292_v7 = vmul.f32 %v2862_v11, %v221_v19 }
  0x3c   :  { %v3259_v20 = vmul.f32 %v2862_v11, %v215_v37  ;;  %v322_v25 = vpack.c.bf16 %v288_v55, %v287_v15  ;;  %v253_v15 = vmul.f32 %v2862_v11, %v3033_v59  ;;  %v2663_v59 = vld [vmem:[%s3673_s2 + $0x18] sm:$0xff]  }
  0x3d   :  { %v220_v37 = vsub.f32 %v2187_v42, %v2848_v5  ;;  %v323_v5 = vpack.c.bf16 %v290_v3, %v289_v0  ;;  %2579 = vmatprep.subr.bf16.mxu1 %v2663_v59 }
  0x3e   :  { %v321_v24 = vpack.c.bf16 %v3259_v20, %v3252_v34  ;;  %v254_v34 = vmul.f32 %v2862_v11, %v183_v45  ;;  %v304_v20 = vpack.c.bf16 %v252_v49, %v251_v23  ;;  %2580 = vmatpush3.bf16.msra.mxu1 %v2663_v59 }
  0x3f   :  { %v291_v4 = vmul.f32 %v2862_v11, %v220_v37  ;;  %v3676_v11 = vpack.c.bf16 %v3104_v39, %v3092_v60  ;;  %2581 = vmatprep.subr.bf16.mxu1 %v2664_v2 }
  0x40   :  { %v305_v38 = vpack.c.bf16 %v254_v34, %v253_v15 }
  0x41   :  { %v324_v19 = vpack.c.bf16 %v292_v7, %v291_v4 }
  0x42   :  { %2524 = vmatmul.mubr.bf16.gmra.mxu0 %v302_v57  ;;  %v3679_v57 = vpack.c.bf16 %v3146_v6, %v3136_v36  ;;  %2582 = vmatpush3.bf16.msra.mxu1 %v2664_v2 }
  0x43   :  { %2527 = vmatprep.mubr.bf16.mxu0 %v303_v10  ;;  %v3681_v10 = vpack.c.bf16 %v3175_v53, %v3172_v52 }
  0x4a   :  { %2528 = vmatmul.mubr.bf16.gmra.mxu0 %v304_v20 }
  0x4b   :  { %2531 = vmatprep.mubr.bf16.mxu0 %v305_v38 }
  0x52   :  { %2532 = vmatmul.mubr.bf16.gmra.mxu0 %v306_v13  ;;  %v2665_v13 = vld [vmem:[%s3673_s2 + $0x8] sm:$0xff]  }
  0x53   :  { %2535 = vmatprep.mubr.bf16.mxu0 %v307_v27  ;;  %2583 = vmatprep.subr.bf16.mxu1 %v2665_v13  ;;  %v3685_v27 = vpack.c.bf16 %v3224_v9, %v3220_v31 }
  0x54   :  { %2584 = vmatpush3.bf16.msra.mxu1 %v2665_v13 }
  0x55   :  { %2585 = vmatprep.subr.bf16.mxu1 %v2666_v21 }
  0x58   :  { %2586 = vmatpush3.bf16.msra.mxu1 %v2666_v21 }
  0x5a   :  { %2536 = vmatmul.mubr.bf16.gmra.mxu0 %v308_v41  ;;  %v3686_v41 = vpack.c.bf16 %v3248_v16, %v3237_v56 }
  0x5b   :  { %2539 = vmatprep.mubr.bf16.mxu0 %v309_v35 }
  0x62   :  { %2540 = vmatmul.mubr.bf16.gmra.mxu0 %v3676_v11 }
  0x63   :  { %2543 = vmatprep.mubr.bf16.mxu0 %v3677_v43 }
  0x6a   :  { %2544 = vmatmul.mubr.bf16.gmra.mxu0 %v3678_v47 }
  0x6b   :  { %2547 = vmatprep.mubr.bf16.mxu0 %v3679_v57 }
  0x72   :  { %2548 = vmatmul.mubr.bf16.gmra.mxu0 %v3680_v62 }
  0x73   :  { %2551 = vmatprep.mubr.bf16.mxu0 %v3681_v10 }
  0x7a   :  { %2552 = vmatmul.mubr.bf16.gmra.mxu0 %v3682_v14 }
  0x7b   :  { %2555 = vmatprep.mubr.bf16.mxu0 %v3683_v17 }
  0x82   :  { %2556 = vmatmul.mubr.bf16.gmra.mxu0 %v3684_v22 }
  0x83   :  { %2559 = vmatprep.mubr.bf16.mxu0 %v3685_v27 }
  0x8a   :  { %2560 = vmatmul.mubr.bf16.gmra.mxu0 %v3686_v41 }
  0x8b   :  { %2563 = vmatprep.mubr.bf16.mxu0 %v321_v24 }
  0x92   :  { %2564 = vmatmul.mubr.bf16.gmra.mxu0 %v322_v25 }
  0x93   :  { %2567 = vmatprep.mubr.bf16.mxu0 %v323_v5 }
  0x9a   :  { %2568 = vmatmul.mubr.bf16.gmra.mxu0 %v324_v19 }
  0xe2   :  { %v2509_v44 = vpop.f32.mrf.mxu0 }
  0xe3   :  { %v744_v51 = vmul.f32 0.70710677, %v2509_v44  ;;  %v680_v4 = vmul.f32 0.5, %v2509_v44 }
  0xe4   :  { %v423_v60 = vpop.f32.mrf.mxu0 }
  0xe5   :  { %v742_v35 = vmul.f32 0.70710677, %v423_v60  ;;  %2667 = verf.f32 %v744_v51  ;;  %v678_v37 = vmul.f32 0.5, %v423_v60 }
  0xe6   :  { %v2510_v39 = vpop.f32.mrf.mxu0 }
  0xe7   :  { %v745_v58 = vmul.f32 0.70710677, %v2510_v39  ;;  %2669 = verf.f32 %v742_v35  ;;  %v681_v45 = vmul.f32 0.5, %v2510_v39 }
  0xe8   :  { %v426_v18 = vpop.f32.mrf.mxu0 }
  0xe9   :  { %2671 = verf.f32 %v745_v58  ;;  %v743_v26 = vmul.f32 0.70710677, %v426_v18  ;;  %v679_v25 = vmul.f32 0.5, %v426_v18 }
  0xea   :  { %v3355_v29 = vpop.f32.mrf.mxu0 }
  0xeb   :  { %2673 = verf.f32 %v743_v26  ;;  %v748_v36 = vmul.f32 0.70710677, %v3355_v29  ;;  %v684_v27 = vmul.f32 0.5, %v3355_v29 }
  0xec   :  { %v439_v61 = vpop.f32.mrf.mxu0 }
  0xed   :  { %v746_v6 = vmul.f32 0.70710677, %v439_v61  ;;  %2675 = verf.f32 %v748_v36  ;;  %v682_v17 = vmul.f32 0.5, %v439_v61 }
  0xee   :  { %v2514_v12 = vpop.f32.mrf.mxu0 }
  0xef   :  { %v749_v54 = vmul.f32 0.70710677, %v2514_v12  ;;  %2677 = verf.f32 %v746_v6  ;;  %v685_v62 = vmul.f32 0.5, %v2514_v12 }
  0xf0   :  { %v442_v63 = vpop.f32.mrf.mxu0 }
  0xf1   :  { %2679 = verf.f32 %v749_v54  ;;  %v747_v52 = vmul.f32 0.70710677, %v442_v63  ;;  %v683_v13 = vmul.f32 0.5, %v442_v63 }
  0xf2   :  { %v3358_v53 = vpop.f32.mrf.mxu0  ;;  %v2668_v1 = vpop.eup %2667 }
  0xf3   :  { %2681 = verf.f32 %v747_v52  ;;  %v752_v8 = vmul.f32 0.70710677, %v3358_v53  ;;  %v872_v28 = vadd.f32 1.0, %v2668_v1 }
  0xf4   :  { %v3361_v32 = vpop.f32.mrf.mxu0  ;;  %v2670_v33 = vpop.eup %2669 }
  0xf5   :  { %v750_v31 = vmul.f32 0.70710677, %v3361_v32  ;;  %2683 = verf.f32 %v752_v8  ;;  %v870_v30 = vadd.f32 1.0, %v2670_v33  ;;  %v936_v20 = vmul.f32 %v872_v28, %v680_v4 }
  0xf6   :  { %v2672_v9 = vpop.eup %2671  ;;  %v3364_v56 = vpop.f32.mrf.mxu0 }
  0xf7   :  { %v873_v16 = vadd.f32 1.0, %v2672_v9  ;;  %v753_v42 = vmul.f32 0.70710677, %v3364_v56  ;;  %2685 = verf.f32 %v750_v31  ;;  %v934_v15 = vmul.f32 %v870_v30, %v678_v37 }
  0xf8   :  { %v2674_v50 = vpop.eup %2673  ;;  %v3367_v55 = vpop.f32.mrf.mxu0  ;;  %v689_v8 = vmul.f32 0.5, %v3364_v56  ;;  %v688_v30 = vmul.f32 0.5, %v3358_v53 }
  0xf9   :  { %2687 = verf.f32 %v753_v42  ;;  %v751_v24 = vmul.f32 0.70710677, %v3367_v55  ;;  %v871_v3 = vadd.f32 1.0, %v2674_v50  ;;  %v937_v7 = vmul.f32 %v873_v16, %v681_v45 }
  0xfa   :  { %v3370_v0 = vpop.f32.mrf.mxu0  ;;  %v2676_v49 = vpop.eup %2675  ;;  %v687_v31 = vmul.f32 0.5, %v3367_v55  ;;  %v686_v16 = vmul.f32 0.5, %v3361_v32 }
  0xfb   :  { %2689 = verf.f32 %v751_v24  ;;  %v756_v23 = vmul.f32 0.70710677, %v3370_v0  ;;  %v935_v34 = vmul.f32 %v871_v3, %v679_v25  ;;  %v999_v48 = vpack.c.bf16 %v937_v7, %v936_v20 }
  0xfc   :  { %v3373_v5 = vpop.f32.mrf.mxu0  ;;  %v2678_v19 = vpop.eup %2677  ;;  %v876_v10 = vadd.f32 1.0, %v2676_v49 }
  0xfd   :  { %v754_v11 = vmul.f32 0.70710677, %v3373_v5  ;;  %v998_v43 = vpack.c.bf16 %v935_v34, %v934_v15  ;;  %2691 = verf.f32 %v756_v23  ;;  %v874_v59 = vadd.f32 1.0, %v2678_v19 }
  0xfe   :  { %v2680_v38 = vpop.eup %2679  ;;  %v3376_v40 = vpop.f32.mrf.mxu0  ;;  %v940_v18 = vmul.f32 %v876_v10, %v684_v27 }
  0xff   :  { %v877_v46 = vadd.f32 1.0, %v2680_v38  ;;  %v757_v47 = vmul.f32 0.70710677, %v3376_v40  ;;  %2693 = verf.f32 %v754_v11  ;;  %2587 = vmatprep.mubr.bf16.mxu1 %v998_v43  ;;  %v938_v35 = vmul.f32 %v874_v59, %v682_v17 }
 0x100   :  { %v2682_v57 = vpop.eup %2681  ;;  %v3379_v2 = vpop.f32.mrf.mxu0  ;;  %2588 = vmatmul.mubr.bf16.vlgmr.msra.gmra.mxu1 %v999_v48  ;;  %v693_v11 = vmul.f32 0.5, %v3376_v40  ;;  %v692_v59 = vmul.f32 0.5, %v3370_v0 }
 0x101   :  { %v875_v14 = vadd.f32 1.0, %v2682_v57  ;;  %2695 = verf.f32 %v757_v47  ;;  %v755_v21 = vmul.f32 0.70710677, %v3379_v2  ;;  %v941_v41 = vmul.f32 %v877_v46, %v685_v62 }
 0x102   :  { %v3382_v22 = vpop.f32.mrf.mxu0  ;;  %v2684_v60 = vpop.eup %2683  ;;  %v690_v46 = vmul.f32 0.5, %v3373_v5  ;;  %v691_v47 = vmul.f32 0.5, %v3379_v2 }
 0x103   :  { %v939_v44 = vmul.f32 %v875_v14, %v683_v13  ;;  %v760_v51 = vmul.f32 0.70710677, %v3382_v22  ;;  %2697 = verf.f32 %v755_v21  ;;  %v1001_v54 = vpack.c.bf16 %v941_v41, %v940_v18 }
 0x104   :  { %v3386_v39 = vpop.f32.mrf.mxu0  ;;  %v2686_v58 = vpop.eup %2685  ;;  %v880_v33 = vadd.f32 1.0, %v2684_v60 }
 0x105   :  { %v758_v36 = vmul.f32 0.70710677, %v3386_v39  ;;  %v1000_v6 = vpack.c.bf16 %v939_v44, %v938_v35  ;;  %2699 = verf.f32 %v760_v51  ;;  %v878_v52 = vadd.f32 1.0, %v2686_v58 }
 0x106   :  { %v2688_v26 = vpop.eup %2687  ;;  %v3389_v61 = vpop.f32.mrf.mxu0  ;;  %v944_v3 = vmul.f32 %v880_v33, %v688_v30 }
 0x107   :  { %v881_v12 = vadd.f32 1.0, %v2688_v26  ;;  %v761_v29 = vmul.f32 0.70710677, %v3389_v61  ;;  %2701 = verf.f32 %v758_v36  ;;  %2591 = vmatprep.mubr.bf16.mxu1 %v1000_v6  ;;  %v942_v37 = vmul.f32 %v878_v52, %v686_v16 }
 0x108   :  { %v2690_v63 = vpop.eup %2689  ;;  %v3393_v1 = vpop.f32.mrf.mxu0  ;;  %2592 = vmatmul.mubr.bf16.gmra.mxu1 %v1001_v54  ;;  %v697_v36 = vmul.f32 0.5, %v3389_v61  ;;  %v696_v52 = vmul.f32 0.5, %v3382_v22 }
 0x109   :  { %v879_v9 = vadd.f32 1.0, %v2690_v63  ;;  %2703 = verf.f32 %v761_v29  ;;  %v759_v42 = vmul.f32 0.70710677, %v3393_v1  ;;  %v945_v28 = vmul.f32 %v881_v12, %v689_v8 }
 0x10a   :  { %v3398_v50 = vpop.f32.mrf.mxu0  ;;  %v2692_v24 = vpop.eup %2691  ;;  %v694_v12 = vmul.f32 0.5, %v3386_v39  ;;  %v695_v29 = vmul.f32 0.5, %v3393_v1 }
 0x10b   :  { %v943_v56 = vmul.f32 %v879_v9, %v687_v31  ;;  %v764_v45 = vmul.f32 0.70710677, %v3398_v50  ;;  %2705 = verf.f32 %v759_v42  ;;  %v1003_v15 = vpack.c.bf16 %v945_v28, %v944_v3 }
 0x10c   :  { %v3402_v25 = vpop.f32.mrf.mxu0  ;;  %v2694_v55 = vpop.eup %2693  ;;  %v884_v38 = vadd.f32 1.0, %v2692_v24 }
 0x10d   :  { %v762_v4 = vmul.f32 0.70710677, %v3402_v25  ;;  %v1002_v23 = vpack.c.bf16 %v943_v56, %v942_v37  ;;  %2707 = verf.f32 %v764_v45  ;;  %v882_v34 = vadd.f32 1.0, %v2694_v55 }
 0x10e   :  { %v2696_v32 = vpop.eup %2695  ;;  %v3405_v7 = vpop.f32.mrf.mxu0  ;;  %v948_v27 = vmul.f32 %v884_v38, %v692_v59 }
 0x10f   :  { %v885_v49 = vadd.f32 1.0, %v2696_v32  ;;  %v765_v53 = vmul.f32 0.70710677, %v3405_v7  ;;  %2709 = verf.f32 %v762_v4  ;;  %2595 = vmatprep.mubr.bf16.mxu1 %v1002_v23  ;;  %v946_v14 = vmul.f32 %v882_v34, %v690_v46 }
 0x110   :  { %v3408_v19 = vpop.f32.mrf.mxu0  ;;  %v2698_v20 = vpop.eup %2697  ;;  %2596 = vmatmul.mubr.bf16.gmra.mxu1 %v1003_v15  ;;  %v701_v3 = vmul.f32 0.5, %v3405_v7 }
 0x111   :  { %2711 = verf.f32 %v765_v53  ;;  %v763_v43 = vmul.f32 0.70710677, %v3408_v19  ;;  %v883_v48 = vadd.f32 1.0, %v2698_v20  ;;  %v949_v62 = vmul.f32 %v885_v49, %v693_v11 }
 0x112   :  { %v3414_v57 = vpop.f32.mrf.mxu0  ;;  %v2700_v13 = vpop.eup %2699  ;;  %v699_v23 = vmul.f32 0.5, %v3408_v19  ;;  %v698_v53 = vmul.f32 0.5, %v3402_v25  ;;  %v700_v20 = vmul.f32 0.5, %v3398_v50 }
 0x113   :  { %2713 = verf.f32 %v763_v43  ;;  %v768_v10 = vmul.f32 0.70710677, %v3414_v57  ;;  %v947_v40 = vmul.f32 %v883_v48, %v691_v47  ;;  %v1005_v60 = vpack.c.bf16 %v949_v62, %v948_v27 }
 0x114   :  { %v3418_v17 = vpop.f32.mrf.mxu0  ;;  %v2702_v21 = vpop.eup %2701  ;;  %v888_v26 = vadd.f32 1.0, %v2700_v13 }
 0x115   :  { %v766_v5 = vmul.f32 0.70710677, %v3418_v17  ;;  %v1004_v44 = vpack.c.bf16 %v947_v40, %v946_v14  ;;  %2715 = verf.f32 %v768_v10  ;;  %v886_v35 = vadd.f32 1.0, %v2702_v21 }
 0x116   :  { %v2704_v41 = vpop.eup %2703  ;;  %v3421_v2 = vpop.f32.mrf.mxu0  ;;  %v952_v30 = vmul.f32 %v888_v26, %v696_v52 }
 0x117   :  { %v889_v51 = vadd.f32 1.0, %v2704_v41  ;;  %v769_v0 = vmul.f32 0.70710677, %v3421_v2  ;;  %2717 = verf.f32 %v766_v5  ;;  %2599 = vmatprep.mubr.bf16.mxu1 %v1004_v44  ;;  %v950_v9 = vmul.f32 %v886_v35, %v694_v12 }
 0x118   :  { %v3424_v58 = vpop.f32.mrf.mxu0  ;;  %v2706_v18 = vpop.eup %2705  ;;  %2600 = vmatmul.mubr.bf16.gmra.mxu1 %v1005_v60  ;;  %v705_v27 = vmul.f32 0.5, %v3421_v2 }
 0x119   :  { %2719 = verf.f32 %v769_v0  ;;  %v767_v6 = vmul.f32 0.70710677, %v3424_v58  ;;  %v887_v54 = vadd.f32 1.0, %v2706_v18  ;;  %v953_v8 = vmul.f32 %v889_v51, %v697_v36 }
 0x11a   :  { %v3430_v63 = vpop.f32.mrf.mxu0  ;;  %v2708_v31 = vpop.eup %2707  ;;  %v703_v44 = vmul.f32 0.5, %v3424_v58  ;;  %v702_v0 = vmul.f32 0.5, %v3418_v17  ;;  %v704_v18 = vmul.f32 0.5, %v3414_v57 }
 0x11b   :  { %2721 = verf.f32 %v767_v6  ;;  %v772_v33 = vmul.f32 0.70710677, %v3430_v63  ;;  %v951_v61 = vmul.f32 %v887_v54, %v695_v29  ;;  %v1007_v24 = vpack.c.bf16 %v953_v8, %v952_v30 }
 0x11c   :  { %v3434_v16 = vpop.f32.mrf.mxu0  ;;  %v2710_v42 = vpop.eup %2709  ;;  %v892_v32 = vadd.f32 1.0, %v2708_v31 }
 0x11d   :  { %v770_v39 = vmul.f32 0.70710677, %v3434_v16  ;;  %v1006_v56 = vpack.c.bf16 %v951_v61, %v950_v9  ;;  %2723 = verf.f32 %v772_v33  ;;  %v890_v55 = vadd.f32 1.0, %v2710_v42 }
 0x11e   :  { %v2712_v28 = vpop.eup %2711  ;;  %v3437_v1 = vpop.f32.mrf.mxu0  ;;  %v956_v48 = vmul.f32 %v892_v32, %v700_v20 }
 0x11f   :  { %v893_v45 = vadd.f32 1.0, %v2712_v28  ;;  %v773_v22 = vmul.f32 0.70710677, %v3437_v1  ;;  %2725 = verf.f32 %v770_v39  ;;  %2603 = vmatprep.mubr.bf16.mxu1 %v1006_v56  ;;  %v954_v46 = vmul.f32 %v890_v55, %v698_v53 }
 0x120   :  { %v2714_v37 = vpop.eup %2713  ;;  %v3441_v4 = vpop.f32.mrf.mxu0  ;;  %2604 = vmatmul.mubr.bf16.gmra.mxu1 %v1007_v24  ;;  %v709_v39 = vmul.f32 0.5, %v3437_v1  ;;  %v708_v55 = vmul.f32 0.5, %v3430_v63 }
 0x121   :  { %v891_v49 = vadd.f32 1.0, %v2714_v37  ;;  %2727 = verf.f32 %v773_v22  ;;  %v771_v15 = vmul.f32 0.70710677, %v3441_v4  ;;  %v957_v38 = vmul.f32 %v893_v45, %v701_v3 }
 0x122   :  { %v3446_v34 = vpop.f32.mrf.mxu0  ;;  %v2716_v43 = vpop.eup %2715  ;;  %v706_v45 = vmul.f32 0.5, %v3434_v16  ;;  %v707_v22 = vmul.f32 0.5, %v3441_v4 }
 0x123   :  { %v955_v7 = vmul.f32 %v891_v49, %v699_v23  ;;  %v776_v11 = vmul.f32 0.70710677, %v3446_v34  ;;  %2729 = verf.f32 %v771_v15  ;;  %v1009_v14 = vpack.c.bf16 %v957_v38, %v956_v48 }
 0x124   :  { %v3450_v47 = vpop.f32.mrf.mxu0  ;;  %v2718_v19 = vpop.eup %2717  ;;  %v896_v41 = vadd.f32 1.0, %v2716_v43 }
 0x125   :  { %v774_v25 = vmul.f32 0.70710677, %v3450_v47  ;;  %v1008_v10 = vpack.c.bf16 %v955_v7, %v954_v46  ;;  %2731 = verf.f32 %v776_v11  ;;  %v894_v21 = vadd.f32 1.0, %v2718_v19 }
 0x126   :  { %v2720_v59 = vpop.eup %2719  ;;  %v3453_v62 = vpop.f32.mrf.mxu0  ;;  %v960_v54 = vmul.f32 %v896_v41, %v704_v18 }
 0x127   :  { %v897_v13 = vadd.f32 1.0, %v2720_v59  ;;  %v777_v50 = vmul.f32 0.70710677, %v3453_v62  ;;  %2733 = verf.f32 %v774_v25  ;;  %2607 = vmatprep.mubr.bf16.mxu1 %v1008_v10  ;;  %v958_v12 = vmul.f32 %v894_v21, %v702_v0 }
 0x128   :  { %v2722_v40 = vpop.eup %2721  ;;  %v3457_v5 = vpop.f32.mrf.mxu0  ;;  %2608 = vmatmul.mubr.bf16.gmra.mxu1 %v1009_v14  ;;  %v713_v25 = vmul.f32 0.5, %v3453_v62  ;;  %v712_v21 = vmul.f32 0.5, %v3446_v34 }
 0x129   :  { %v895_v51 = vadd.f32 1.0, %v2722_v40  ;;  %2735 = verf.f32 %v777_v50  ;;  %v775_v60 = vmul.f32 0.70710677, %v3457_v5  ;;  %v961_v26 = vmul.f32 %v897_v13, %v705_v27 }
 0x12a   :  { %v3462_v35 = vpop.f32.mrf.mxu0  ;;  %v2724_v6 = vpop.eup %2723  ;;  %v710_v13 = vmul.f32 0.5, %v3450_v47  ;;  %v711_v50 = vmul.f32 0.5, %v3457_v5 }
 0x12b   :  { %v959_v2 = vmul.f32 %v895_v51, %v703_v44  ;;  %v780_v36 = vmul.f32 0.70710677, %v3462_v35  ;;  %2737 = verf.f32 %v775_v60  ;;  %v1011_v9 = vpack.c.bf16 %v961_v26, %v960_v54 }
 0x12c   :  { %v3466_v29 = vpop.f32.mrf.mxu0  ;;  %v2726_v58 = vpop.eup %2725  ;;  %v900_v28 = vadd.f32 1.0, %v2724_v6 }
 0x12d   :  { %v778_v52 = vmul.f32 0.70710677, %v3466_v29  ;;  %v1010_v33 = vpack.c.bf16 %v959_v2, %v958_v12  ;;  %2739 = verf.f32 %v780_v36  ;;  %v898_v61 = vadd.f32 1.0, %v2726_v58 }
 0x12e   :  { %v2728_v17 = vpop.eup %2727  ;;  %v3469_v8 = vpop.f32.mrf.mxu0  ;;  %v964_v20 = vmul.f32 %v900_v28, %v708_v55 }
 0x12f   :  { %v901_v31 = vadd.f32 1.0, %v2728_v17  ;;  %v781_v57 = vmul.f32 0.70710677, %v3469_v8  ;;  %2741 = verf.f32 %v778_v52  ;;  %2611 = vmatprep.mubr.bf16.mxu1 %v1010_v33  ;;  %v962_v49 = vmul.f32 %v898_v61, %v706_v45 }
 0x130   :  { %v3472_v42 = vpop.f32.mrf.mxu0  ;;  %v2730_v30 = vpop.eup %2729  ;;  %2612 = vmatmul.mubr.bf16.gmra.mxu1 %v1011_v9  ;;  %v717_v54 = vmul.f32 0.5, %v3469_v8 }
 0x131   :  { %2743 = verf.f32 %v781_v57  ;;  %v779_v56 = vmul.f32 0.70710677, %v3472_v42  ;;  %v899_v24 = vadd.f32 1.0, %v2730_v30  ;;  %v965_v3 = vmul.f32 %v901_v31, %v709_v39 }
 0x132   :  { %v3478_v37 = vpop.f32.mrf.mxu0  ;;  %v2732_v23 = vpop.eup %2731  ;;  %v715_v33 = vmul.f32 0.5, %v3472_v42  ;;  %v714_v57 = vmul.f32 0.5, %v3466_v29  ;;  %v716_v30 = vmul.f32 0.5, %v3462_v35 }
 0x133   :  { %2745 = verf.f32 %v779_v56  ;;  %v784_v32 = vmul.f32 0.70710677, %v3478_v37  ;;  %v963_v1 = vmul.f32 %v899_v24, %v707_v22  ;;  %v1013_v43 = vpack.c.bf16 %v965_v3, %v964_v20 }
 0x134   :  { %v3482_v53 = vpop.f32.mrf.mxu0  ;;  %v2734_v15 = vpop.eup %2733  ;;  %v904_v59 = vadd.f32 1.0, %v2732_v23 }
 0x135   :  { %v782_v16 = vmul.f32 0.70710677, %v3482_v53  ;;  %v1012_v7 = vpack.c.bf16 %v963_v1, %v962_v49  ;;  %2747 = verf.f32 %v784_v32  ;;  %v902_v46 = vadd.f32 1.0, %v2734_v15 }
 0x136   :  { %v2736_v38 = vpop.eup %2735  ;;  %v3485_v4 = vpop.f32.mrf.mxu0  ;;  %v968_v18 = vmul.f32 %v904_v59, %v712_v21 }
 0x137   :  { %v905_v11 = vadd.f32 1.0, %v2736_v38  ;;  %v785_v63 = vmul.f32 0.70710677, %v3485_v4  ;;  %2749 = verf.f32 %v782_v16  ;;  %2615 = vmatprep.mubr.bf16.mxu1 %v1012_v7  ;;  %v966_v51 = vmul.f32 %v902_v46, %v710_v13 }
 0x138   :  { %v3488_v19 = vpop.f32.mrf.mxu0  ;;  %v2738_v48 = vpop.eup %2737  ;;  %2616 = vmatmul.mubr.bf16.gmra.mxu1 %v1013_v43  ;;  %v721_v20 = vmul.f32 0.5, %v3485_v4 }
 0x139   :  { %2751 = verf.f32 %v785_v63  ;;  %v783_v10 = vmul.f32 0.70710677, %v3488_v19  ;;  %v903_v14 = vadd.f32 1.0, %v2738_v48  ;;  %v969_v27 = vmul.f32 %v905_v11, %v713_v25 }
 0x13a   :  { %v3494_v40 = vpop.f32.mrf.mxu0  ;;  %v2740_v44 = vpop.eup %2739  ;;  %v719_v7 = vmul.f32 0.5, %v3488_v19  ;;  %v718_v63 = vmul.f32 0.5, %v3482_v53  ;;  %v720_v48 = vmul.f32 0.5, %v3478_v37 }
 0x13b   :  { %2753 = verf.f32 %v783_v10  ;;  %v788_v41 = vmul.f32 0.70710677, %v3494_v40  ;;  %v967_v62 = vmul.f32 %v903_v14, %v711_v50  ;;  %v1015_v6 = vpack.c.bf16 %v969_v27, %v968_v18 }
 0x13c   :  { %v3498_v0 = vpop.f32.mrf.mxu0  ;;  %v2742_v60 = vpop.eup %2741  ;;  %v908_v17 = vadd.f32 1.0, %v2740_v44 }
 0x13d   :  { %v786_v47 = vmul.f32 0.70710677, %v3498_v0  ;;  %v1014_v2 = vpack.c.bf16 %v967_v62, %v966_v51  ;;  %2755 = verf.f32 %v788_v41  ;;  %v906_v58 = vadd.f32 1.0, %v2742_v60 }
 0x13e   :  { %v2744_v26 = vpop.eup %2743  ;;  %v3501_v5 = vpop.f32.mrf.mxu0  ;;  %v972_v24 = vmul.f32 %v908_v17, %v716_v30 }
 0x13f   :  { %v909_v36 = vadd.f32 1.0, %v2744_v26  ;;  %v789_v34 = vmul.f32 0.70710677, %v3501_v5  ;;  %2757 = verf.f32 %v786_v47  ;;  %2619 = vmatprep.mubr.bf16.mxu1 %v1014_v2  ;;  %v970_v45 = vmul.f32 %v906_v58, %v714_v57 }
 0x140   :  { %v2746_v12 = vpop.eup %2745  ;;  %v3505_v52 = vpop.f32.mrf.mxu0  ;;  %2620 = vmatmul.mubr.bf16.gmra.mxu1 %v1015_v6  ;;  %v725_v47 = vmul.f32 0.5, %v3501_v5  ;;  %v724_v58 = vmul.f32 0.5, %v3494_v40 }
 0x141   :  { %v907_v31 = vadd.f32 1.0, %v2746_v12  ;;  %2759 = verf.f32 %v789_v34  ;;  %v787_v9 = vmul.f32 0.70710677, %v3505_v52  ;;  %v973_v28 = vmul.f32 %v909_v36, %v717_v54 }
 0x142   :  { %v3510_v61 = vpop.f32.mrf.mxu0  ;;  %v2748_v56 = vpop.eup %2747  ;;  %v722_v36 = vmul.f32 0.5, %v3498_v0  ;;  %v723_v34 = vmul.f32 0.5, %v3505_v52 }
 0x143   :  { %v971_v8 = vmul.f32 %v907_v31, %v715_v33  ;;  %v792_v39 = vmul.f32 0.70710677, %v3510_v61  ;;  %2761 = verf.f32 %v787_v9  ;;  %v1017_v49 = vpack.c.bf16 %v973_v28, %v972_v24 }
 0x144   :  { %v3514_v22 = vpop.f32.mrf.mxu0  ;;  %v2750_v42 = vpop.eup %2749  ;;  %v912_v38 = vadd.f32 1.0, %v2748_v56 }
 0x145   :  { %v790_v29 = vmul.f32 0.70710677, %v3514_v22  ;;  %v1016_v32 = vpack.c.bf16 %v971_v8, %v970_v45  ;;  %2763 = verf.f32 %v792_v39  ;;  %v910_v15 = vadd.f32 1.0, %v2750_v42 }
 0x146   :  { %v2752_v55 = vpop.eup %2751  ;;  %v3517_v3 = vpop.f32.mrf.mxu0  ;;  %v976_v14 = vmul.f32 %v912_v38, %v720_v48 }
 0x147   :  { %v913_v23 = vadd.f32 1.0, %v2752_v55  ;;  %v793_v35 = vmul.f32 0.70710677, %v3517_v3  ;;  %2765 = verf.f32 %v790_v29  ;;  %2623 = vmatprep.mubr.bf16.mxu1 %v1016_v32  ;;  %v974_v10 = vmul.f32 %v910_v15, %v718_v63 }
 0x148   :  { %v2754_v1 = vpop.eup %2753  ;;  %v3521_v16 = vpop.f32.mrf.mxu0  ;;  %2624 = vmatmul.mubr.bf16.gmra.mxu1 %v1017_v49  ;;  %v729_v24 = vmul.f32 0.5, %v3517_v3  ;;  %v728_v32 = vmul.f32 0.5, %v3510_v61 }
 0x149   :  { %v911_v11 = vadd.f32 1.0, %v2754_v1  ;;  %2767 = verf.f32 %v793_v35  ;;  %v791_v43 = vmul.f32 0.70710677, %v3521_v16  ;;  %v977_v59 = vmul.f32 %v913_v23, %v721_v20 }
 0x14a   :  { %v3526_v46 = vpop.f32.mrf.mxu0  ;;  %v2756_v25 = vpop.eup %2755  ;;  %v726_v35 = vmul.f32 0.5, %v3514_v22  ;;  %v727_v1 = vmul.f32 0.5, %v3521_v16 }
 0x14b   :  { %v975_v4 = vmul.f32 %v911_v11, %v719_v7  ;;  %2769 = verf.f32 %v791_v43  ;;  %v796_v13 = vmul.f32 0.70710677, %v3526_v46  ;;  %v1019_v51 = vpack.c.bf16 %v977_v59, %v976_v14 }
 0x14c   :  { %v3530_v50 = vpop.f32.mrf.mxu0  ;;  %v2758_v19 = vpop.eup %2757  ;;  %v916_v26 = vadd.f32 1.0, %v2756_v25 }
 0x14d   :  { %v794_v21 = vmul.f32 0.70710677, %v3530_v50  ;;  %v1018_v41 = vpack.c.bf16 %v975_v4, %v974_v10  ;;  %v914_v62 = vadd.f32 1.0, %v2758_v19  ;;  %v730_v14 = vmul.f32 0.5, %v3530_v50 }
 0x14e   :  { %v2760_v53 = vpop.eup %2759  ;;  %v3533_v27 = vpop.f32.mrf.mxu0  ;;  %v980_v30 = vmul.f32 %v916_v26, %v724_v58 }
 0x14f   :  { %v917_v44 = vadd.f32 1.0, %v2760_v53  ;;  %2771 = verf.f32 %v794_v21  ;;  %v797_v37 = vmul.f32 0.70710677, %v3533_v27  ;;  %2627 = vmatprep.mubr.bf16.mxu1 %v1018_v41  ;;  %v978_v33 = vmul.f32 %v914_v62, %v722_v36 }
 0x150   :  { %2773 = verf.f32 %v796_v13  ;;  %v3536_v60 = vpop.f32.mrf.mxu0  ;;  %v2762_v18 = vpop.eup %2761  ;;  %2628 = vmatmul.mubr.bf16.gmra.mxu1 %v1019_v51  ;;  %v733_v21 = vmul.f32 0.5, %v3533_v27  ;;  %v732_v62 = vmul.f32 0.5, %v3526_v46 }
 0x151   :  { %2775 = verf.f32 %v797_v37  ;;  %v795_v2 = vmul.f32 0.70710677, %v3536_v60  ;;  %v915_v6 = vadd.f32 1.0, %v2762_v18  ;;  %v981_v54 = vmul.f32 %v917_v44, %v725_v47 }
 0x152   :  { %v3542_v12 = vpop.f32.mrf.mxu0  ;;  %v2764_v17 = vpop.eup %2763  ;;  %v731_v44 = vmul.f32 0.5, %v3536_v60 }
 0x153   :  { %2777 = verf.f32 %v795_v2  ;;  %v979_v31 = vmul.f32 %v915_v6, %v723_v34  ;;  %v800_v5 = vmul.f32 0.70710677, %v3542_v12  ;;  %v1021_v56 = vpack.c.bf16 %v981_v54, %v980_v30 }
 0x154   :  { %v3546_v57 = vpop.f32.mrf.mxu0  ;;  %v2766_v9 = vpop.eup %2765  ;;  %v920_v45 = vadd.f32 1.0, %v2764_v17 }
 0x155   :  { %v798_v0 = vmul.f32 0.70710677, %v3546_v57  ;;  %v1020_v8 = vpack.c.bf16 %v979_v31, %v978_v33  ;;  %v918_v42 = vadd.f32 1.0, %v2766_v9  ;;  %v734_v17 = vmul.f32 0.5, %v3546_v57 }
 0x156   :  { %v2768_v28 = vpop.eup %2767  ;;  %v3549_v52 = vpop.f32.mrf.mxu0  ;;  %v984_v7 = vmul.f32 %v920_v45, %v728_v32  ;;  %v736_v9 = vmul.f32 0.5, %v3542_v12 }
 0x157   :  { %v921_v39 = vadd.f32 1.0, %v2768_v28  ;;  %2779 = verf.f32 %v798_v0  ;;  %v801_v40 = vmul.f32 0.70710677, %v3549_v52  ;;  %2631 = vmatprep.mubr.bf16.mxu1 %v1020_v8  ;;  %v982_v11 = vmul.f32 %v918_v42, %v726_v35 }
 0x158   :  { %2781 = verf.f32 %v800_v5  ;;  %v650_v55 = vpop.f32.mrf.mxu0  ;;  %v2770_v29 = vpop.eup %2769  ;;  %2632 = vmatmul.mubr.bf16.gmra.mxu1 %v1021_v56  ;;  %v737_v31 = vmul.f32 0.5, %v3549_v52 }
 0x159   :  { %2783 = verf.f32 %v801_v40  ;;  %v799_v23 = vmul.f32 0.70710677, %v650_v55  ;;  %v985_v49 = vmul.f32 %v921_v39, %v729_v24  ;;  %v919_v15 = vadd.f32 1.0, %v2770_v29 }
 0x15a   :  { %v3556_v20 = vpop.f32.mrf.mxu0  ;;  %v735_v46 = vmul.f32 0.5, %v650_v55 }
 0x15b   :  { %2785 = verf.f32 %v799_v23  ;;  %v804_v3 = vmul.f32 0.70710677, %v3556_v20  ;;  %v983_v63 = vmul.f32 %v919_v15, %v727_v1  ;;  %v1023_v22 = vpack.c.bf16 %v985_v49, %v984_v7 }
 0x15c   :  { %v2772_v38 = vpop.eup %2771  ;;  %v663_v43 = vpop.f32.mrf.mxu0  ;;  %v740_v12 = vmul.f32 0.5, %v3556_v20 }
 0x15d   :  { %v2774_v61 = vpop.eup %2773  ;;  %v802_v59 = vmul.f32 0.70710677, %v663_v43  ;;  %v1022_v25 = vpack.c.bf16 %v983_v63, %v982_v11  ;;  %v922_v10 = vadd.f32 1.0, %v2772_v38  ;;  %2787 = verf.f32 %v804_v3 }
 0x15e   :  { %v2776_v48 = vpop.eup %2775  ;;  %v2570_v4 = vpop.f32.mrf.mxu0  ;;  %v924_v41 = vadd.f32 1.0, %v2774_v61  ;;  %v738_v55 = vmul.f32 0.5, %v663_v43 }
 0x15f   :  { %v925_v13 = vadd.f32 1.0, %v2776_v48  ;;  %v805_v16 = vmul.f32 0.70710677, %v2570_v4  ;;  %2789 = verf.f32 %v802_v59  ;;  %2635 = vmatprep.mubr.bf16.mxu1 %v1022_v25  ;;  %v986_v18 = vmul.f32 %v922_v10, %v730_v14 }
 0x160   :  { %v2778_v19 = vpop.eup %2777  ;;  %v666_v53 = vpop.f32.mrf.mxu0  ;;  %2636 = vmatmul.mubr.bf16.gmra.mxu1 %v1023_v22  ;;  %v988_v36 = vmul.f32 %v924_v41, %v732_v62  ;;  %v741_v52 = vmul.f32 0.5, %v2570_v4 }
 0x161   :  { %v923_v37 = vadd.f32 1.0, %v2778_v19  ;;  %2791 = verf.f32 %v805_v16  ;;  %v803_v51 = vmul.f32 0.70710677, %v666_v53  ;;  %v989_v26 = vmul.f32 %v925_v13, %v733_v21 }
 0x162   :  { %v739_v23 = vmul.f32 0.5, %v666_v53 }
 0x163   :  { %v987_v47 = vmul.f32 %v923_v37, %v731_v44  ;;  %2793 = verf.f32 %v803_v51  ;;  %v1025_v54 = vpack.c.bf16 %v989_v26, %v988_v36 }
 0x164   :  { %v2780_v2 = vpop.eup %2779 }
 0x165   :  { %v2782_v50 = vpop.eup %2781  ;;  %v1024_v27 = vpack.c.bf16 %v987_v47, %v986_v18  ;;  %v926_v6 = vadd.f32 1.0, %v2780_v2 }
 0x166   :  { %v2784_v34 = vpop.eup %2783  ;;  %v928_v33 = vadd.f32 1.0, %v2782_v50 }
 0x167   :  { %v929_v58 = vadd.f32 1.0, %v2784_v34  ;;  %2639 = vmatprep.mubr.bf16.mxu1 %v1024_v27  ;;  %v990_v30 = vmul.f32 %v926_v6, %v734_v17 }
 0x168   :  { %v2786_v60 = vpop.eup %2785  ;;  %2640 = vmatmul.mubr.bf16.gmra.mxu1 %v1025_v54  ;;  %v992_v40 = vmul.f32 %v928_v33, %v736_v9 }
 0x169   :  { %v927_v5 = vadd.f32 1.0, %v2786_v60  ;;  %v993_v0 = vmul.f32 %v929_v58, %v737_v31 }
 0x16a   :  { %v2788_v8 = vpop.eup %2787 }
 0x16b   :  { %v991_v28 = vmul.f32 %v927_v5, %v735_v46  ;;  %v1027_v24 = vpack.c.bf16 %v993_v0, %v992_v40  ;;  %v932_v32 = vadd.f32 1.0, %v2788_v8 }
 0x16c   :  { %v2790_v39 = vpop.eup %2789 }
 0x16d   :  { %v1026_v56 = vpack.c.bf16 %v991_v28, %v990_v30  ;;  %v930_v57 = vadd.f32 1.0, %v2790_v39  ;;  %v996_v3 = vmul.f32 %v932_v32, %v740_v12 }
 0x16e   :  { %v2792_v45 = vpop.eup %2791 }
 0x16f   :  { %v933_v42 = vadd.f32 1.0, %v2792_v45  ;;  %2643 = vmatprep.mubr.bf16.mxu1 %v1026_v56  ;;  %v994_v1 = vmul.f32 %v930_v57, %v738_v55 }
 0x170   :  { %v2794_v29 = vpop.eup %2793  ;;  %2644 = vmatmul.mubr.bf16.gmra.mxu1 %v1027_v24 }
 0x171   :  { %v931_v35 = vadd.f32 1.0, %v2794_v29  ;;  %v997_v49 = vmul.f32 %v933_v42, %v741_v52 }
 0x173   :  { %v995_v15 = vmul.f32 %v931_v35, %v739_v23  ;;  %v1029_v7 = vpack.c.bf16 %v997_v49, %v996_v3 }
 0x175   :  { %v1028_v38 = vpack.c.bf16 %v995_v15, %v994_v1 }
 0x177   :  { %2647 = vmatprep.mubr.bf16.mxu1 %v1028_v38 }
 0x178   :  { %2648 = vmatmul.mubr.bf16.gmra.mxu1 %v1029_v7 }
 0x1c0   :  { %v2589_v11 = vpop.f32.mrf.mxu1 }
 0x1c1   :  { %v1455_v10 = vmul.f32 %v2589_v11, %v2589_v11 }
 0x1c2   :  { %v1128_v63 = vpop.f32.mrf.mxu1 }
 0x1c3   :  { %v1453_v4 = vmul.f32 %v1128_v63, %v1128_v63 }
 0x1c4   :  { %v2590_v61 = vpop.f32.mrf.mxu1 }
 0x1c5   :  { %v2197_v48 = vpack.c.bf16 %v2590_v61, %v2589_v11  ;;  %v1456_v14 = vmul.f32 %v2590_v61, %v2590_v61 }
 0x1c6   :  { %v1131_v59 = vpop.f32.mrf.mxu1 }
 0x1c7   :  { %2380 = vst [vmem:[%s3674_s5 + $0x8] sm:$0xff] %v2197_v48   ;;  %v1383_v43 = vadd.f32 %v1131_v59, %v1128_v63  ;;  %v1454_v20 = vmul.f32 %v1131_v59, %v1131_v59  ;;  %v2192_v25 = vpack.c.bf16 %v1131_v59, %v1128_v63 }
 0x1c8   :  { %v2593_v22 = vpop.f32.mrf.mxu1 }
 0x1c9   :  { %v1384_v13 = vadd.f32 %v2589_v11, %v1383_v43  ;;  %v1517_v16 = vadd.f32 %v1454_v20, %v1453_v4  ;;  %2193 = vst [vmem:[%s3674_s5] sm:$0xff] %v2192_v25   ;;  %v1459_v27 = vmul.f32 %v2593_v22, %v2593_v22 }
 0x1ca   :  { %v1144_v19 = vpop.f32.mrf.mxu1 }
 0x1cb   :  { %v1518_v21 = vadd.f32 %v1517_v16, %v1455_v10  ;;  %v1385_v53 = vadd.f32 %v2590_v61, %v1384_v13  ;;  %v1457_v37 = vmul.f32 %v1144_v19, %v1144_v19 }
 0x1cc   :  { %v2594_v41 = vpop.f32.mrf.mxu1 }
 0x1cd   :  { %v1386_v44 = vadd.f32 %v1385_v53, %v1144_v19  ;;  %v1519_v51 = vadd.f32 %v1518_v21, %v1456_v14  ;;  %v2207_v62 = vpack.c.bf16 %v2594_v41, %v2593_v22  ;;  %v1460_v54 = vmul.f32 %v2594_v41, %v2594_v41 }
 0x1ce   :  { %v1147_v18 = vpop.f32.mrf.mxu1 }
 0x1cf   :  { %v1520_v26 = vadd.f32 %v1519_v51, %v1457_v37  ;;  %2382 = vst [vmem:[%s3674_s5 + $0x18] sm:$0xff] %v2207_v62   ;;  %v1387_v47 = vadd.f32 %v1386_v44, %v1147_v18  ;;  %v1458_v2 = vmul.f32 %v1147_v18, %v1147_v18  ;;  %v2202_v50 = vpack.c.bf16 %v1147_v18, %v1144_v19 }
 0x1d0   :  { %v2597_v36 = vpop.f32.mrf.mxu1 }
 0x1d1   :  { %v1388_v34 = vadd.f32 %v2593_v22, %v1387_v47  ;;  %v1521_v6 = vadd.f32 %v1520_v26, %v1458_v2  ;;  %2381 = vst [vmem:[%s3674_s5 + $0x10] sm:$0xff] %v2202_v50   ;;  %v1463_v56 = vmul.f32 %v2597_v36, %v2597_v36 }
 0x1d2   :  { %v1160_v58 = vpop.f32.mrf.mxu1 }
 0x1d3   :  { %v1522_v60 = vadd.f32 %v1521_v6, %v1459_v27  ;;  %v1389_v17 = vadd.f32 %v2594_v41, %v1388_v34  ;;  %v1461_v46 = vmul.f32 %v1160_v58, %v1160_v58 }
 0x1d4   :  { %v2598_v33 = vpop.f32.mrf.mxu1 }
 0x1d5   :  { %v1390_v31 = vadd.f32 %v1389_v17, %v1160_v58  ;;  %v1523_v5 = vadd.f32 %v1522_v60, %v1460_v54  ;;  %v2217_v9 = vpack.c.bf16 %v2598_v33, %v2597_v36  ;;  %v1464_v57 = vmul.f32 %v2598_v33, %v2598_v33 }
 0x1d6   :  { %v1163_v30 = vpop.f32.mrf.mxu1 }
 0x1d7   :  { %v1524_v0 = vadd.f32 %v1523_v5, %v1461_v46  ;;  %2384 = vst [vmem:[%s3674_s5 + $0x28] sm:$0xff] %v2217_v9   ;;  %v1391_v28 = vadd.f32 %v1390_v31, %v1163_v30  ;;  %v1462_v8 = vmul.f32 %v1163_v30, %v1163_v30  ;;  %v2212_v39 = vpack.c.bf16 %v1163_v30, %v1160_v58 }
 0x1d8   :  { %v2601_v40 = vpop.f32.mrf.mxu1 }
 0x1d9   :  { %v1392_v45 = vadd.f32 %v2597_v36, %v1391_v28  ;;  %v1525_v42 = vadd.f32 %v1524_v0, %v1462_v8  ;;  %2383 = vst [vmem:[%s3674_s5 + $0x20] sm:$0xff] %v2212_v39   ;;  %v1467_v11 = vmul.f32 %v2601_v40, %v2601_v40 }
 0x1da   :  { %v1176_v24 = vpop.f32.mrf.mxu1 }
 0x1db   :  { %v1526_v29 = vadd.f32 %v1525_v42, %v1463_v56  ;;  %v1393_v32 = vadd.f32 %v2598_v33, %v1392_v45  ;;  %v1465_v23 = vmul.f32 %v1176_v24, %v1176_v24 }
 0x1dc   :  { %v2602_v52 = vpop.f32.mrf.mxu1 }
 0x1dd   :  { %v1394_v55 = vadd.f32 %v1393_v32, %v1176_v24  ;;  %v1527_v35 = vadd.f32 %v1526_v29, %v1464_v57  ;;  %v2227_v12 = vpack.c.bf16 %v2602_v52, %v2601_v40  ;;  %v1468_v59 = vmul.f32 %v2602_v52, %v2602_v52 }
 0x1de   :  { %v1179_v49 = vpop.f32.mrf.mxu1 }
 0x1df   :  { %v1528_v1 = vadd.f32 %v1527_v35, %v1465_v23  ;;  %2386 = vst [vmem:[%s3674_s5 + $0x38] sm:$0xff] %v2227_v12   ;;  %v1395_v15 = vadd.f32 %v1394_v55, %v1179_v49  ;;  %v1466_v3 = vmul.f32 %v1179_v49, %v1179_v49  ;;  %v2222_v38 = vpack.c.bf16 %v1179_v49, %v1176_v24 }
 0x1e0   :  { %v2605_v7 = vpop.f32.mrf.mxu1 }
 0x1e1   :  { %v1396_v63 = vadd.f32 %v2601_v40, %v1395_v15  ;;  %v1529_v61 = vadd.f32 %v1528_v1, %v1466_v3  ;;  %2385 = vst [vmem:[%s3674_s5 + $0x30] sm:$0xff] %v2222_v38   ;;  %v1471_v44 = vmul.f32 %v2605_v7, %v2605_v7 }
 0x1e2   :  { %v1192_v48 = vpop.f32.mrf.mxu1 }
 0x1e3   :  { %v1530_v4 = vadd.f32 %v1529_v61, %v1467_v11  ;;  %v1397_v43 = vadd.f32 %v2602_v52, %v1396_v63  ;;  %v1469_v22 = vmul.f32 %v1192_v48, %v1192_v48 }
 0x1e4   :  { %v2606_v20 = vpop.f32.mrf.mxu1 }
 0x1e5   :  { %v1398_v25 = vadd.f32 %v1397_v43, %v1192_v48  ;;  %v1531_v10 = vadd.f32 %v1530_v4, %v1468_v59  ;;  %v2237_v13 = vpack.c.bf16 %v2606_v20, %v2605_v7  ;;  %v1472_v18 = vmul.f32 %v2606_v20, %v2606_v20 }
 0x1e6   :  { %v1195_v16 = vpop.f32.mrf.mxu1 }
 0x1e7   :  { %v1532_v19 = vadd.f32 %v1531_v10, %v1469_v22  ;;  %2388 = vst [vmem:[%s3674_s5 + $0x48] sm:$0xff] %v2237_v13   ;;  %v1399_v14 = vadd.f32 %v1398_v25, %v1195_v16  ;;  %v1470_v21 = vmul.f32 %v1195_v16, %v1195_v16  ;;  %v2232_v53 = vpack.c.bf16 %v1195_v16, %v1192_v48 }
 0x1e8   :  { %v2609_v41 = vpop.f32.mrf.mxu1 }
 0x1e9   :  { %v1400_v37 = vadd.f32 %v2605_v7, %v1399_v14  ;;  %v1533_v51 = vadd.f32 %v1532_v19, %v1470_v21  ;;  %2387 = vst [vmem:[%s3674_s5 + $0x40] sm:$0xff] %v2232_v53   ;;  %v1475_v31 = vmul.f32 %v2609_v41, %v2609_v41 }
 0x1ea   :  { %v1208_v62 = vpop.f32.mrf.mxu1 }
 0x1eb   :  { %v1534_v26 = vadd.f32 %v1533_v51, %v1471_v44  ;;  %v1401_v47 = vadd.f32 %v2606_v20, %v1400_v37  ;;  %v1473_v36 = vmul.f32 %v1208_v62, %v1208_v62 }
 0x1ec   :  { %v2610_v2 = vpop.f32.mrf.mxu1 }
 0x1ed   :  { %v1402_v50 = vadd.f32 %v1401_v47, %v1208_v62  ;;  %v1535_v27 = vadd.f32 %v1534_v26, %v1472_v18  ;;  %v2247_v34 = vpack.c.bf16 %v2610_v2, %v2609_v41  ;;  %v1476_v30 = vmul.f32 %v2610_v2, %v2610_v2 }
 0x1ee   :  { %v1211_v6 = vpop.f32.mrf.mxu1 }
 0x1ef   :  { %v1536_v58 = vadd.f32 %v1535_v27, %v1473_v36  ;;  %2390 = vst [vmem:[%s3674_s5 + $0x58] sm:$0xff] %v2247_v34   ;;  %v1403_v54 = vadd.f32 %v1402_v50, %v1211_v6  ;;  %v1474_v60 = vmul.f32 %v1211_v6, %v1211_v6  ;;  %v2242_v17 = vpack.c.bf16 %v1211_v6, %v1208_v62 }
 0x1f0   :  { %v2613_v33 = vpop.f32.mrf.mxu1 }
 0x1f1   :  { %v1404_v46 = vadd.f32 %v2609_v41, %v1403_v54  ;;  %v1537_v5 = vadd.f32 %v1536_v58, %v1474_v60  ;;  %2389 = vst [vmem:[%s3674_s5 + $0x50] sm:$0xff] %v2242_v17   ;;  %v1479_v55 = vmul.f32 %v2613_v33, %v2613_v33 }
 0x1f2   :  { %v1224_v9 = vpop.f32.mrf.mxu1 }
 0x1f3   :  { %v1538_v0 = vadd.f32 %v1537_v5, %v1475_v31  ;;  %v1405_v28 = vadd.f32 %v2610_v2, %v1404_v46  ;;  %v1477_v40 = vmul.f32 %v1224_v9, %v1224_v9 }
 0x1f4   :  { %v2614_v8 = vpop.f32.mrf.mxu1 }
 0x1f5   :  { %v1406_v39 = vadd.f32 %v1405_v28, %v1224_v9  ;;  %v1539_v56 = vadd.f32 %v1538_v0, %v1476_v30  ;;  %v2257_v45 = vpack.c.bf16 %v2614_v8, %v2613_v33  ;;  %v1480_v49 = vmul.f32 %v2614_v8, %v2614_v8 }
 0x1f6   :  { %v1227_v42 = vpop.f32.mrf.mxu1 }
 0x1f7   :  { %v1540_v24 = vadd.f32 %v1539_v56, %v1477_v40  ;;  %2392 = vst [vmem:[%s3674_s5 + $0x68] sm:$0xff] %v2257_v45   ;;  %v1407_v57 = vadd.f32 %v1406_v39, %v1227_v42  ;;  %v1478_v29 = vmul.f32 %v1227_v42, %v1227_v42  ;;  %v2252_v32 = vpack.c.bf16 %v1227_v42, %v1224_v9 }
 0x1f8   :  { %v2617_v52 = vpop.f32.mrf.mxu1 }
 0x1f9   :  { %v1408_v23 = vadd.f32 %v2613_v33, %v1407_v57  ;;  %v1541_v35 = vadd.f32 %v1540_v24, %v1478_v29  ;;  %2391 = vst [vmem:[%s3674_s5 + $0x60] sm:$0xff] %v2252_v32   ;;  %v1483_v25 = vmul.f32 %v2617_v52, %v2617_v52 }
 0x1fa   :  { %v1240_v12 = vpop.f32.mrf.mxu1 }
 0x1fb   :  { %v1542_v1 = vadd.f32 %v1541_v35, %v1479_v55  ;;  %v1409_v15 = vadd.f32 %v2614_v8, %v1408_v23  ;;  %v1481_v7 = vmul.f32 %v1240_v12, %v1240_v12 }
 0x1fc   :  { %v2618_v3 = vpop.f32.mrf.mxu1 }
 0x1fd   :  { %v1410_v38 = vadd.f32 %v1409_v15, %v1240_v12  ;;  %v1543_v11 = vadd.f32 %v1542_v1, %v1480_v49  ;;  %v2267_v63 = vpack.c.bf16 %v2618_v3, %v2617_v52  ;;  %v1484_v16 = vmul.f32 %v2618_v3, %v2618_v3 }
 0x1fe   :  { %v1243_v61 = vpop.f32.mrf.mxu1 }
 0x1ff   :  { %v1544_v48 = vadd.f32 %v1543_v11, %v1481_v7  ;;  %2394 = vst [vmem:[%s3674_s5 + $0x78] sm:$0xff] %v2267_v63   ;;  %v1411_v59 = vadd.f32 %v1410_v38, %v1243_v61  ;;  %v1482_v4 = vmul.f32 %v1243_v61, %v1243_v61  ;;  %v2262_v43 = vpack.c.bf16 %v1243_v61, %v1240_v12 }
 0x200   :  { %v2621_v20 = vpop.f32.mrf.mxu1 }
 0x201   :  { %v1412_v22 = vadd.f32 %v2617_v52, %v1411_v59  ;;  %v1545_v10 = vadd.f32 %v1544_v48, %v1482_v4  ;;  %2393 = vst [vmem:[%s3674_s5 + $0x70] sm:$0xff] %v2262_v43   ;;  %v1487_v50 = vmul.f32 %v2621_v20, %v2621_v20 }
 0x202   :  { %v1256_v13 = vpop.f32.mrf.mxu1 }
 0x203   :  { %v1546_v19 = vadd.f32 %v1545_v10, %v1483_v25  ;;  %v1413_v14 = vadd.f32 %v2618_v3, %v1412_v22  ;;  %v1485_v41 = vmul.f32 %v1256_v13, %v1256_v13 }
 0x204   :  { %v2622_v21 = vpop.f32.mrf.mxu1 }
 0x205   :  { %v1414_v53 = vadd.f32 %v1413_v14, %v1256_v13  ;;  %v1547_v44 = vadd.f32 %v1546_v19, %v1484_v16  ;;  %v2277_v37 = vpack.c.bf16 %v2622_v21, %v2621_v20  ;;  %v1488_v6 = vmul.f32 %v2622_v21, %v2622_v21 }
 0x206   :  { %v1259_v51 = vpop.f32.mrf.mxu1 }
 0x207   :  { %v1548_v62 = vadd.f32 %v1547_v44, %v1485_v41  ;;  %2396 = vst [vmem:[%s3674_s5 + $0x88] sm:$0xff] %v2277_v37   ;;  %v1415_v18 = vadd.f32 %v1414_v53, %v1259_v51  ;;  %v1486_v26 = vmul.f32 %v1259_v51, %v1259_v51  ;;  %v2272_v47 = vpack.c.bf16 %v1259_v51, %v1256_v13 }
 0x208   :  { %v2625_v2 = vpop.f32.mrf.mxu1 }
 0x209   :  { %v1416_v36 = vadd.f32 %v2621_v20, %v1415_v18  ;;  %v1549_v27 = vadd.f32 %v1548_v62, %v1486_v26  ;;  %2395 = vst [vmem:[%s3674_s5 + $0x80] sm:$0xff] %v2272_v47   ;;  %v1491_v39 = vmul.f32 %v2625_v2, %v2625_v2 }
 0x20a   :  { %v1272_v34 = vpop.f32.mrf.mxu1 }
 0x20b   :  { %v1550_v58 = vadd.f32 %v1549_v27, %v1487_v50  ;;  %v1417_v54 = vadd.f32 %v2622_v21, %v1416_v36  ;;  %v1489_v33 = vmul.f32 %v1272_v34, %v1272_v34 }
 0x20c   :  { %v2626_v60 = vpop.f32.mrf.mxu1 }
 0x20d   :  { %v1418_v17 = vadd.f32 %v1417_v54, %v1272_v34  ;;  %v1551_v31 = vadd.f32 %v1550_v58, %v1488_v6  ;;  %v2287_v46 = vpack.c.bf16 %v2626_v60, %v2625_v2  ;;  %v1492_v42 = vmul.f32 %v2626_v60, %v2626_v60 }
 0x20e   :  { %v1275_v5 = vpop.f32.mrf.mxu1 }
 0x20f   :  { %v1552_v9 = vadd.f32 %v1551_v31, %v1489_v33  ;;  %2398 = vst [vmem:[%s3674_s5 + $0x98] sm:$0xff] %v2287_v46   ;;  %v1419_v30 = vadd.f32 %v1418_v17, %v1275_v5  ;;  %v1490_v0 = vmul.f32 %v1275_v5, %v1275_v5  ;;  %v2282_v28 = vpack.c.bf16 %v1275_v5, %v1272_v34 }
 0x210   :  { %v2629_v8 = vpop.f32.mrf.mxu1 }
 0x211   :  { %v1420_v40 = vadd.f32 %v2625_v2, %v1419_v30  ;;  %v1553_v56 = vadd.f32 %v1552_v9, %v1490_v0  ;;  %2397 = vst [vmem:[%s3674_s5 + $0x90] sm:$0xff] %v2282_v28   ;;  %v1495_v38 = vmul.f32 %v2629_v8, %v2629_v8 }
 0x212   :  { %v1288_v45 = vpop.f32.mrf.mxu1 }
 0x213   :  { %v1554_v24 = vadd.f32 %v1553_v56, %v1491_v39  ;;  %v1421_v57 = vadd.f32 %v2626_v60, %v1420_v40  ;;  %v1493_v52 = vmul.f32 %v1288_v45, %v1288_v45 }
 0x214   :  { %v2630_v29 = vpop.f32.mrf.mxu1 }
 0x215   :  { %v1422_v32 = vadd.f32 %v1421_v57, %v1288_v45  ;;  %v1555_v55 = vadd.f32 %v1554_v24, %v1492_v42  ;;  %v2297_v23 = vpack.c.bf16 %v2630_v29, %v2629_v8  ;;  %v1496_v61 = vmul.f32 %v2630_v29, %v2630_v29 }
 0x216   :  { %v1291_v35 = vpop.f32.mrf.mxu1 }
 0x217   :  { %v1556_v12 = vadd.f32 %v1555_v55, %v1493_v52  ;;  %2400 = vst [vmem:[%s3674_s5 + $0xa8] sm:$0xff] %v2297_v23   ;;  %v1423_v49 = vadd.f32 %v1422_v32, %v1291_v35  ;;  %v1494_v1 = vmul.f32 %v1291_v35, %v1291_v35  ;;  %v2292_v15 = vpack.c.bf16 %v1291_v35, %v1288_v45 }
 0x218   :  { %v2633_v3 = vpop.f32.mrf.mxu1 }
 0x219   :  { %v1424_v7 = vadd.f32 %v2629_v8, %v1423_v49  ;;  %v1557_v11 = vadd.f32 %v1556_v12, %v1494_v1  ;;  %2399 = vst [vmem:[%s3674_s5 + $0xa0] sm:$0xff] %v2292_v15   ;;  %v1499_v53 = vmul.f32 %v2633_v3, %v2633_v3 }
 0x21a   :  { %v1304_v63 = vpop.f32.mrf.mxu1 }
 0x21b   :  { %v1558_v48 = vadd.f32 %v1557_v11, %v1495_v38  ;;  %v1425_v59 = vadd.f32 %v2630_v29, %v1424_v7  ;;  %v1497_v20 = vmul.f32 %v1304_v63, %v1304_v63 }
 0x21c   :  { %v2634_v4 = vpop.f32.mrf.mxu1 }
 0x21d   :  { %v1426_v43 = vadd.f32 %v1425_v59, %v1304_v63  ;;  %v1559_v25 = vadd.f32 %v1558_v48, %v1496_v61  ;;  %v2307_v22 = vpack.c.bf16 %v2634_v4, %v2633_v3  ;;  %v1500_v51 = vmul.f32 %v2634_v4, %v2634_v4 }
 0x21e   :  { %v1307_v10 = vpop.f32.mrf.mxu1 }
 0x21f   :  { %v1560_v13 = vadd.f32 %v1559_v25, %v1497_v20  ;;  %2402 = vst [vmem:[%s3674_s5 + $0xb8] sm:$0xff] %v2307_v22   ;;  %v1427_v16 = vadd.f32 %v1426_v43, %v1307_v10  ;;  %v1498_v19 = vmul.f32 %v1307_v10, %v1307_v10  ;;  %v2302_v14 = vpack.c.bf16 %v1307_v10, %v1304_v63 }
 0x220   :  { %v2637_v21 = vpop.f32.mrf.mxu1 }
 0x221   :  { %v1428_v41 = vadd.f32 %v2633_v3, %v1427_v16  ;;  %v1561_v44 = vadd.f32 %v1560_v13, %v1498_v19  ;;  %2401 = vst [vmem:[%s3674_s5 + $0xb0] sm:$0xff] %v2302_v14   ;;  %v1503_v17 = vmul.f32 %v2637_v21, %v2637_v21 }
 0x222   :  { %v1320_v37 = vpop.f32.mrf.mxu1 }
 0x223   :  { %v1562_v62 = vadd.f32 %v1561_v44, %v1499_v53  ;;  %v1429_v18 = vadd.f32 %v2634_v4, %v1428_v41  ;;  %v1501_v2 = vmul.f32 %v1320_v37, %v1320_v37 }
 0x224   :  { %v2638_v26 = vpop.f32.mrf.mxu1 }
 0x225   :  { %v1430_v47 = vadd.f32 %v1429_v18, %v1320_v37  ;;  %v1563_v50 = vadd.f32 %v1562_v62, %v1500_v51  ;;  %v2317_v36 = vpack.c.bf16 %v2638_v26, %v2637_v21  ;;  %v1504_v5 = vmul.f32 %v2638_v26, %v2638_v26 }
 0x226   :  { %v1323_v27 = vpop.f32.mrf.mxu1 }
 0x227   :  { %v1564_v34 = vadd.f32 %v1563_v50, %v1501_v2  ;;  %2404 = vst [vmem:[%s3674_s5 + $0xc8] sm:$0xff] %v2317_v36   ;;  %v1431_v6 = vadd.f32 %v1430_v47, %v1323_v27  ;;  %v1502_v58 = vmul.f32 %v1323_v27, %v1323_v27  ;;  %v2312_v54 = vpack.c.bf16 %v1323_v27, %v1320_v37 }
 0x228   :  { %v2641_v60 = vpop.f32.mrf.mxu1 }
 0x229   :  { %v1432_v33 = vadd.f32 %v2637_v21, %v1431_v6  ;;  %v1565_v31 = vadd.f32 %v1564_v34, %v1502_v58  ;;  %2403 = vst [vmem:[%s3674_s5 + $0xc0] sm:$0xff] %v2312_v54   ;;  %v1507_v32 = vmul.f32 %v2641_v60, %v2641_v60 }
 0x22a   :  { %v1336_v46 = vpop.f32.mrf.mxu1 }
 0x22b   :  { %v1566_v9 = vadd.f32 %v1565_v31, %v1503_v17  ;;  %v1433_v30 = vadd.f32 %v2638_v26, %v1432_v33  ;;  %v1505_v8 = vmul.f32 %v1336_v46, %v1336_v46 }
 0x22c   :  { %v2642_v0 = vpop.f32.mrf.mxu1 }
 0x22d   :  { %v1434_v28 = vadd.f32 %v1433_v30, %v1336_v46  ;;  %v1567_v39 = vadd.f32 %v1566_v9, %v1504_v5  ;;  %v2327_v40 = vpack.c.bf16 %v2642_v0, %v2641_v60  ;;  %v1508_v35 = vmul.f32 %v2642_v0, %v2642_v0 }
 0x22e   :  { %v1339_v56 = vpop.f32.mrf.mxu1 }
 0x22f   :  { %v1568_v45 = vadd.f32 %v1567_v39, %v1505_v8  ;;  %2406 = vst [vmem:[%s3674_s5 + $0xd8] sm:$0xff] %v2327_v40   ;;  %v1435_v42 = vadd.f32 %v1434_v28, %v1339_v56  ;;  %v1506_v24 = vmul.f32 %v1339_v56, %v1339_v56  ;;  %v2322_v57 = vpack.c.bf16 %v1339_v56, %v1336_v46 }
 0x230   :  { %v2645_v29 = vpop.f32.mrf.mxu1 }
 0x231   :  { %v1436_v52 = vadd.f32 %v2641_v60, %v1435_v42  ;;  %v1569_v55 = vadd.f32 %v1568_v45, %v1506_v24  ;;  %2405 = vst [vmem:[%s3674_s5 + $0xd0] sm:$0xff] %v2322_v57   ;;  %v1511_v43 = vmul.f32 %v2645_v29, %v2645_v29 }
 0x232   :  { %v1352_v23 = vpop.f32.mrf.mxu1 }
 0x233   :  { %v1570_v12 = vadd.f32 %v1569_v55, %v1507_v32  ;;  %v1437_v49 = vadd.f32 %v2642_v0, %v1436_v52  ;;  %v1509_v3 = vmul.f32 %v1352_v23, %v1352_v23 }
 0x234   :  { %v2646_v1 = vpop.f32.mrf.mxu1 }
 0x235   :  { %v1438_v15 = vadd.f32 %v1437_v49, %v1352_v23  ;;  %v1571_v38 = vadd.f32 %v1570_v12, %v1508_v35  ;;  %v2337_v7 = vpack.c.bf16 %v2646_v1, %v2645_v29  ;;  %v1512_v10 = vmul.f32 %v2646_v1, %v2646_v1 }
 0x236   :  { %v1355_v11 = vpop.f32.mrf.mxu1 }
 0x237   :  { %v1572_v63 = vadd.f32 %v1571_v38, %v1509_v3  ;;  %2408 = vst [vmem:[%s3674_s5 + $0xe8] sm:$0xff] %v2337_v7   ;;  %v1439_v61 = vadd.f32 %v1438_v15, %v1355_v11  ;;  %v1510_v48 = vmul.f32 %v1355_v11, %v1355_v11  ;;  %v2332_v59 = vpack.c.bf16 %v1355_v11, %v1352_v23 }
 0x238   :  { %v2649_v4 = vpop.f32.mrf.mxu1 }
 0x239   :  { %v1440_v20 = vadd.f32 %v2645_v29, %v1439_v61  ;;  %v1573_v25 = vadd.f32 %v1572_v63, %v1510_v48  ;;  %2407 = vst [vmem:[%s3674_s5 + $0xe0] sm:$0xff] %v2332_v59   ;;  %v1515_v26 = vmul.f32 %v2649_v4, %v2649_v4 }
 0x23a   :  { %v1368_v22 = vpop.f32.mrf.mxu1 }
 0x23b   :  { %v1574_v13 = vadd.f32 %v1573_v25, %v1511_v43  ;;  %v1441_v16 = vadd.f32 %v2646_v1, %v1440_v20  ;;  %v1513_v21 = vmul.f32 %v1368_v22, %v1368_v22 }
 0x23c   :  { %v2650_v19 = vpop.f32.mrf.mxu1 }
 0x23d   :  { %v1442_v14 = vadd.f32 %v1441_v16, %v1368_v22  ;;  %v1575_v53 = vadd.f32 %v1574_v13, %v1512_v10  ;;  %v2347_v41 = vpack.c.bf16 %v2650_v19, %v2649_v4  ;;  %v1516_v50 = vmul.f32 %v2650_v19, %v2650_v19 }
 0x23e   :  { %v1371_v44 = vpop.f32.mrf.mxu1 }
 0x23f   :  { %v1576_v37 = vadd.f32 %v1575_v53, %v1513_v21  ;;  %2410 = vst [vmem:[%s3674_s5 + $0xf8] sm:$0xff] %v2347_v41   ;;  %v1443_v51 = vadd.f32 %v1442_v14, %v1371_v44  ;;  %v1514_v62 = vmul.f32 %v1371_v44, %v1371_v44  ;;  %v2342_v18 = vpack.c.bf16 %v1371_v44, %v1368_v22 }
 0x241   :  { %v1444_v47 = vadd.f32 %v2649_v4, %v1443_v51  ;;  %v1577_v2 = vadd.f32 %v1576_v37, %v1514_v62  ;;  %2409 = vst [vmem:[%s3674_s5 + $0xf0] sm:$0xff] %v2342_v18  }
 0x243   :  { %v1445_v36 = vadd.f32 %v2650_v19, %v1444_v47  ;;  %v1578_v27 = vadd.f32 %v1577_v2, %v1515_v26 }
 0x245   :  { %v1446_v34 = vrot.slane %v1445_v36, 4  ;;  %v1579_v6 = vadd.f32 %v1578_v27, %v1516_v50 }
 0x247   :  { %v1447_v58 = vadd.f32 %v1446_v34, %v1445_v36  ;;  %v1580_v54 = vrot.slane %v1579_v6, 4 }
 0x249   :  { %v1448_v60 = vrot.slane %v1447_v58, 2  ;;  %v1581_v17 = vadd.f32 %v1580_v54, %v1579_v6 }
 0x24b   :  { %v1449_v33 = vadd.f32 %v1448_v60, %v1447_v58  ;;  %v1582_v31 = vrot.slane %v1581_v17, 2 }
 0x24d   :  { %v1450_v46 = vrot.slane %v1449_v33, 1  ;;  %v1583_v5 = vadd.f32 %v1582_v31, %v1581_v17 }
 0x24f   :  { %v1451_v9 = vadd.f32 %v1450_v46, %v1449_v33  ;;  %v1584_v30 = vrot.slane %v1583_v5, 1 }
 0x251   :  { %1452 = vst [vmem:[%s3675_s6] sm:$0x1] %v1451_v9  ;;  %v1585_v0 = vadd.f32 %v1584_v30, %v1583_v5 }
 0x253   :  { %1586 = vst [vmem:[%s3675_s6 + $0x1] sm:$0x1] %v1585_v0 }

</bundles_post_ra>
